<compile_context>
chip_gen: v7x
topology: tpu7x:2x2x1
jax: 0.10.0
libtpu: 0.0.40
codegen_flags: <defaults>
</compile_context>

<pallas_src>
import functools

import jax
import jax.numpy as jnp
from jax import lax
from jax.experimental import pallas as pl
from jax.experimental.pallas import tpu as pltpu


_VMEM_LIMIT = 32 * 1024 * 1024  # safe on v5e/v6e (128 MiB) and v7x (64 MiB phys)
_CP = 128                       # padded channel width for all internal activations


def _pick_divisor(n, target):
    t = int(max(1, min(n, target)))
    while n % t:
        t -= 1
    return t


# ----------------------------------------------------------------------------
# Pallas kernels
# ----------------------------------------------------------------------------
def _mm_kernel(x_ref, w_ref, b_ref, o_ref, *, relu):
    # x: (tm, Kp) bf16, w: (Kp, Np) bf16, b: (1, Np) f32 -> o: (tm, Np) bf16
    acc = jnp.dot(x_ref[...], w_ref[...], preferred_element_type=jnp.float32)
    acc = acc + b_ref[...]
    if relu:
        acc = jnp.maximum(acc, 0.0)
    o_ref[...] = acc.astype(o_ref.dtype)


def _conv_tap_kernel(x_ref, w_ref, b_ref, o_ref, acc_ref, *, k, dil, relu):
    # Grid: (B, H // th, k);  kh = tap-row reduction axis ("arbitrary").
    # x_ref:  (1, th, W + 2p, Cinp) bf16  -- kh-shifted padded row band
    # w_ref:  (1, k, Cinp, Coutp)  bf16   -- weights for tap-row kh
    # b_ref:  (1, Coutp) f32
    # o_ref:  (1, th, W, Coutp)    out dtype
    # acc_ref:(th, W, Coutp)       f32 scratch accumulator
    kh = pl.program_id(2)
    th, wo = acc_ref.shape[0], acc_ref.shape[1]

    @pl.when(kh == 0)
    def _init():
        acc_ref[...] = jnp.zeros_like(acc_ref)

    for r in range(th):                       # small static unroll over band rows
        part = None
        for kw in range(k):                   # kw taps sliced in-kernel (no im2col)
            lhs = x_ref[0, r, kw * dil: kw * dil + wo, :]          # (W, Cinp) bf16
            d = jnp.dot(lhs, w_ref[0, kw], preferred_element_type=jnp.float32)
            part = d if part is None else part + d
        acc_ref[r] = acc_ref[r] + part

    @pl.when(kh == k - 1)
    def _finalize():
        out = acc_ref[...] + b_ref[...]
        if relu:
            out = jnp.maximum(out, 0.0)
        o_ref[0] = out.astype(o_ref.dtype)


def _conv_tap_head_kernel(x_ref, w_ref, b_ref, w2_ref, b2_ref, o_ref, acc_ref,
                          *, k, dil):
    # Same as _conv_tap_kernel but the 1x1 `output` conv is fused as an epilogue
    # dot on the ReLU'd accumulator (applied row by row, no relu on the head).
    kh = pl.program_id(2)
    th, wo = acc_ref.shape[0], acc_ref.shape[1]

    @pl.when(kh == 0)
    def _init():
        acc_ref[...] = jnp.zeros_like(acc_ref)

    for r in range(th):
        part = None
        for kw in range(k):
            lhs = x_ref[0, r, kw * dil: kw * dil + wo, :]
            d = jnp.dot(lhs, w_ref[0, kw], preferred_element_type=jnp.float32)
            part = d if part is None else part + d
        acc_ref[r] = acc_ref[r] + part

    @pl.when(kh == k - 1)
    def _finalize():
        for r in range(th):
            h = jnp.maximum(acc_ref[r] + b_ref[...], 0.0)          # (W, Coutp) f32
            o = jnp.dot(h.astype(w2_ref.dtype), w2_ref[...],
                        preferred_element_type=jnp.float32)        # (W, N2p)
            o_ref[0, r] = o + b2_ref[...]


def _pool_kernel(x_ref, o_ref, *, mode, c):
    # x block: (tr, 2, Wo, 2*C) bf16; out block: (tr, Wo, C) bf16.
    v = x_ref[...].astype(jnp.float32)
    top, bot = v[:, 0], v[:, 1]               # vertical pair (leading-dim selects)
    if mode == "max":
        m = jnp.maximum(top, bot)
        res = jnp.maximum(m[:, :, :c], m[:, :, c:])
    else:  # avg
        s = top + bot
        res = (s[:, :, :c] + s[:, :, c:]) * 0.25
    o_ref[...] = res.astype(o_ref.dtype)


# ----------------------------------------------------------------------------
# Wrappers
# ----------------------------------------------------------------------------
def matmul_bias_act(x, w, b, *, relu, out_dtype, tm):
    """(M,K)@(K,N)+b with bf16 MXU feeds, f32 accumulation, tiled over M."""
    M, K = x.shape
    N = w.shape[1]
    assert M % tm == 0
    return pl.pallas_call(
        functools.partial(_mm_kernel, relu=relu),
        out_shape=jax.ShapeDtypeStruct((M, N), out_dtype),
        grid=(M // tm,),
        in_specs=[
            pl.BlockSpec((tm, K), lambda i: (i, 0)),
            pl.BlockSpec((K, N), lambda i: (0, 0)),
            pl.BlockSpec((1, N), lambda i: (0, 0)),
        ],
        out_specs=pl.BlockSpec((tm, N), lambda i: (i, 0)),
        compiler_params=pltpu.CompilerParams(
            dimension_semantics=("parallel",),
            vmem_limit_bytes=_VMEM_LIMIT),
    )(x, w, b)


def conv_dilated(x, w_taps, bias, *, dil, relu=True, out_dtype=jnp.bfloat16,
                 head_w=None, head_b=None, th_target=8):
    """Stride-1 dilated kxk conv on a padded-128-channel bf16 NHWC activation.

    Tap-row (kh) reduction runs on the trailing 'arbitrary' grid axis; kw taps
    are sliced in-kernel from kh-shifted row bands; accumulation in f32 VMEM.
    Optional fused 1x1 head (for c4 + `output`)."""
    B, H, W, Cinp = x.shape
    k = w_taps.shape[0]
    Coutp = w_taps.shape[-1]
    p = dil * (k - 1) // 2
    Wp = W + 2 * p

    xp = jnp.pad(x, ((0, 0), (p, p), (p, p), (0, 0)))
    # k row-shifted views stacked along the leading axis (entry kh*B + b).
    # Only k (=3) copies of the activation hit HBM, vs k^2 for im2col.
    views = jnp.concatenate([xp[:, kh * dil: kh * dil + H] for kh in range(k)],
                            axis=0)

    th = _pick_divisor(H, th_target)
    if B * (H // th) < 2 and th % 2 == 0:
        th //= 2                       # keep both v7x TensorCores busy if possible
    grid = (B, H // th, k)

    in_specs = [
        pl.BlockSpec((1, th, Wp, Cinp), lambda b, i, kh: (kh * B + b, i, 0, 0)),
        pl.BlockSpec((1, k, Cinp, Coutp), lambda b, i, kh: (kh, 0, 0, 0)),
        pl.BlockSpec((1, Coutp), lambda b, i, kh: (0, 0)),
    ]
    args = [views, w_taps, bias]
    if head_w is None:
        kern = functools.partial(_conv_tap_kernel, k=k, dil=dil, relu=relu)
        n_out = Coutp
    else:
        n_out = head_w.shape[1]
        in_specs += [
            pl.BlockSpec((Coutp, n_out), lambda b, i, kh: (0, 0)),
            pl.BlockSpec((1, n_out), lambda b, i, kh: (0, 0)),
        ]
        args += [head_w, head_b]
        kern = functools.partial(_conv_tap_head_kernel, k=k, dil=dil)

    return pl.pallas_call(
        kern,
        out_shape=jax.ShapeDtypeStruct((B, H, W, n_out), out_dtype),
        grid=grid,
        in_specs=in_specs,
        out_specs=pl.BlockSpec((1, th, W, n_out), lambda b, i, kh: (b, i, 0, 0)),
        scratch_shapes=[pltpu.VMEM((th, W, Coutp), jnp.float32)],
        compiler_params=pltpu.CompilerParams(
            dimension_semantics=("parallel", "parallel", "arbitrary"),
            vmem_limit_bytes=_VMEM_LIMIT),
    )(*args)


def pool2x2(x, mode, *, block_bytes=8 * 1024 * 1024):
    """2x2 pooling, stride 2 (floor mode), NHWC, bf16 in/out, f32 math."""
    B, H, W, C = x.shape
    Ho, Wo = H // 2, W // 2
    rows = B * Ho
    # Pure reshape (no data movement): [r, i, wo, j*C + ch] == x[b, 2ho+i, 2wo+j, ch].
    xr = x[:, :2 * Ho, :2 * Wo, :].reshape(rows, 2, Wo, 2 * C)

    row_bytes = 2 * Wo * 2 * C * x.dtype.itemsize
    tr = _pick_divisor(rows, max(1, block_bytes // row_bytes))
    if rows // tr < 2 and tr % 2 == 0:
        tr //= 2

    out = pl.pallas_call(
        functools.partial(_pool_kernel, mode=mode, c=C),
        out_shape=jax.ShapeDtypeStruct((rows, Wo, C), x.dtype),
        grid=(rows // tr,),
        in_specs=[pl.BlockSpec((tr, 2, Wo, 2 * C), lambda i: (i, 0, 0, 0))],
        out_specs=pl.BlockSpec((tr, Wo, C), lambda i: (i, 0, 0)),
        compiler_params=pltpu.CompilerParams(
            dimension_semantics=("parallel",),
            vmem_limit_bytes=_VMEM_LIMIT),
    )(xr)
    return out.reshape(B, Ho, Wo, C)


def _stem_row_tile(bh, w, tm_max):
    cap = max(1, min(bh, tm_max // max(1, w)))
    t = bh
    for cand in range(cap, 0, -1):
        if bh % cand == 0 and (cand * w) % 8 == 0:
            t = cand
            break
    if bh // t < 2 and t % 2 == 0 and ((t // 2) * w) % 8 == 0:
        t //= 2                        # make the grid split across 2 TCs if possible
    return t


def stem_conv(x_nhwc, w_mat, bias, *, k=9, pad=4, tm_max=4096):
    """Fused red/green/blue stem as one 9x9 conv: im2col (bf16) + one matmul."""
    B, H, W, Cin = x_nhwc.shape
    Kp, Np = w_mat.shape
    xb = x_nhwc.astype(jnp.bfloat16)
    xp = jnp.pad(xb, ((0, 0), (pad, pad), (pad, pad), (0, 0)))
    taps = [xp[:, kh:kh + H, kw:kw + W, :] for kh in range(k) for kw in range(k)]
    fill = Kp - k * k * Cin
    if fill:
        taps.append(jnp.zeros((B, H, W, fill), jnp.bfloat16))
    patches = jnp.concatenate(taps, axis=-1).reshape(B * H * W, Kp)

    tm = _stem_row_tile(B * H, W, tm_max) * W
    out = matmul_bias_act(patches, w_mat, bias, relu=True,
                          out_dtype=jnp.bfloat16, tm=tm)
    return out.reshape(B, H, W, Np)


# ----------------------------------------------------------------------------
# Parameters (deterministic, PyTorch-style shapes; not a checkpoint load)
# ----------------------------------------------------------------------------
_LAYER_DEFS = {
    # name: (Cout, Cin, k, pad, dil)
    "red": (10, 3, 9, 4, 1),
    "green": (14, 3, 7, 3, 1),
    "blue": (16, 3, 5, 2, 1),
    "c0": (40, 40, 3, 2, 2),
    "c1": (60, 40, 3, 2, 2),
    "c2": (40, 60, 3, 2, 2),
    "c3": (20, 40, 3, 2, 2),
    "c4": (10, 20, 3, 2, 2),
    "output": (1, 10, 1, 0, 1),
}


def init_params(key):
    params = {}
    for name, (cout, cin, k, _, _) in _LAYER_DEFS.items():
        key, kw_, kb_ = jax.random.split(key, 3)
        bound = 1.0 / jnp.sqrt(cin * k * k)  # PyTorch default-ish uniform init
        w = jax.random.uniform(kw_, (cout, cin, k, k), jnp.float32, -bound, bound)
        b = jax.random.uniform(kb_, (cout,), jnp.float32, -bound, bound)
        params[name] = (w, b)
    return params


def _fused_stem_weights(params):
    """Fuse red(9x9,p4) / green(7x7,p3) / blue(5x5,p2) into one 9x9,p4 conv by
    zero-padding the smaller kernels (mathematically identical)."""
    wr, br = params["red"]
    wg, bg = params["green"]
    wb, bb = params["blue"]
    wg9 = jnp.zeros((wg.shape[0], wg.shape[1], 9, 9), wg.dtype).at[:, :, 1:8, 1:8].set(wg)
    wb9 = jnp.zeros((wb.shape[0], wb.shape[1], 9, 9), wb.dtype).at[:, :, 2:7, 2:7].set(wb)
    w = jnp.concatenate([wr, wg9, wb9], axis=0)   # (40, 3, 9, 9)
    b = jnp.concatenate([br, bg, bb], axis=0)     # (40,)
    return w, b


def prepare_params(params):
    """One-time weight prep (hoisted out of the forward): transpose to HWIO,
    pad channels to 128, cast to bf16; biases padded to 128 in f32."""
    prep = {}
    # Fused stem: (40,3,9,9) -> (9*9*3, 40) -> pad to (256, 128) bf16.
    w_stem, b_stem = _fused_stem_weights(params)
    w_mat = jnp.transpose(w_stem, (2, 3, 1, 0)).reshape(9 * 9 * 3, 40)
    w_mat = jnp.pad(w_mat, ((0, 256 - 243), (0, _CP - 40))).astype(jnp.bfloat16)
    b_mat = jnp.pad(b_stem, (0, _CP - 40)).astype(jnp.float32).reshape(1, _CP)
    prep["stem"] = (w_mat, b_mat)

    for name in ("c0", "c1", "c2", "c3", "c4"):
        w, b = params[name]
        cout, cin, k = w.shape[0], w.shape[1], w.shape[2]
        wt = jnp.transpose(w, (2, 3, 1, 0))                       # (k, k, Cin, Cout)
        wt = jnp.pad(wt, ((0, 0), (0, 0), (0, _CP - cin), (0, _CP - cout)))
        prep[name] = (wt.astype(jnp.bfloat16),
                      jnp.pad(b, (0, _CP - cout)).astype(jnp.float32).reshape(1, _CP))

    wo, bo = params["output"]
    w2 = jnp.transpose(wo, (2, 3, 1, 0)).reshape(wo.shape[1], wo.shape[0])  # (10, 1)
    w2 = jnp.pad(w2, ((0, _CP - w2.shape[0]), (0, _CP - w2.shape[1]))).astype(jnp.bfloat16)
    b2 = jnp.pad(bo, (0, _CP - bo.shape[0])).astype(jnp.float32).reshape(1, _CP)
    prep["head"] = (w2, b2)
    return prep


# ----------------------------------------------------------------------------
# Forward pass (mirrors BigTail11i.forward)
# ----------------------------------------------------------------------------
def bigtail11i_forward(x_nchw, prep):
    x = jnp.transpose(x_nchw, (0, 2, 3, 1)).astype(jnp.float32)   # -> NHWC
    # fused stem: one 9x9 conv emits the 40-channel concat(red, green, blue),
    # stored bf16 in padded-128 channel layout (kept through the whole net).
    x = stem_conv(x, *prep["stem"])
    x = pool2x2(x, "max")
    x = conv_dilated(x, *prep["c0"], dil=2)
    x = conv_dilated(x, *prep["c1"], dil=2)
    x = pool2x2(x, "avg")
    x = conv_dilated(x, *prep["c2"], dil=2)
    x = conv_dilated(x, *prep["c3"], dil=2)
    x = pool2x2(x, "avg")
    # c4 (ReLU) with the 1x1 `output` conv fused as an in-kernel epilogue.
    w2, b2 = prep["head"]
    x = conv_dilated(x, *prep["c4"], dil=2, out_dtype=jnp.float32,
                     head_w=w2, head_b=b2)
    x = x[..., :1]                                                # real output channel
    return jnp.transpose(x, (0, 3, 1, 2))                         # -> NCHW


# ----------------------------------------------------------------------------
# Pure-JAX reference (lax conv / reduce_window) mirroring the bf16-activation
# contract of the kernel path (bf16 MXU feeds, f32 accumulation, bf16 storage).
# ----------------------------------------------------------------------------
def _ref_forward(x_nchw, params):
    x = jnp.transpose(x_nchw, (0, 2, 3, 1)).astype(jnp.float32)
    rb = lambda t: t.astype(jnp.bfloat16).astype(jnp.float32)  # bf16 activation storage

    def conv(name, xin, relu=True):
        _, _, k, pad, dil = _LAYER_DEFS[name]
        w, b = params[name]
        y = lax.conv_general_dilated(
            xin.astype(jnp.bfloat16),
            jnp.transpose(w, (2, 3, 1, 0)).astype(jnp.bfloat16),
            window_strides=(1, 1),
            padding=((pad, pad), (pad, pad)),
            rhs_dilation=(dil, dil),
            dimension_numbers=("NHWC", "HWIO", "NHWC"),
            preferred_element_type=jnp.float32,
        ) + b.reshape(1, 1, 1, -1)
        return jnp.maximum(y, 0.0) if relu else y

    def maxpool(z):
        return lax.reduce_window(z, -jnp.inf, lax.max, (1, 2, 2, 1), (1, 2, 2, 1), "VALID")

    def avgpool(z):
        return lax.reduce_window(z, 0.0, lax.add, (1, 2, 2, 1), (1, 2, 2, 1), "VALID") * 0.25

    x = rb(jnp.concatenate([conv("red", x), conv("green", x), conv("blue", x)], axis=-1))
    x = rb(maxpool(x))
    x = rb(conv("c0", x))
    x = rb(conv("c1", x))
    x = rb(avgpool(x))
    x = rb(conv("c2", x))
    x = rb(conv("c3", x))
    x = rb(avgpool(x))
    x = rb(conv("c4", x))
    x = conv("output", x, relu=False)
    return jnp.transpose(x, (0, 3, 1, 2))


if __name__ == "__main__":
    key = jax.random.PRNGKey(0)
    kx, kp = jax.random.split(key)
    # NCHW input, as the PyTorch module expects: batch=2, 3 channels, 16x16
    x = jax.random.normal(kx, (2, 3, 16, 16), jnp.float32)
    params = init_params(kp)
    prep = prepare_params(params)   # hoisted one-time weight prep

    out = jax.block_until_ready(jax.jit(bigtail11i_forward)(x, prep))
    assert out.shape == (2, 1, 2, 2), out.shape

    ref = jax.block_until_ready(_ref_forward(x, params))
    max_err = float(jnp.max(jnp.abs(out - ref)))
    assert jnp.allclose(out, ref, rtol=3e-3, atol=3e-3), max_err

    print("KERNEL_OK")
</pallas_src>

<mosaic_0001>
module attributes {stable_mosaic.version = 11 : i64} {
  func.func @_mm_kernel(%arg0: i32, %arg1: memref<256x256xbf16, #tpu.memory_space<vmem>>, %arg2: memref<256x128xbf16, #tpu.memory_space<vmem>>, %arg3: memref<1x128xf32, #tpu.memory_space<vmem>>, %arg4: memref<256x128xbf16, #tpu.memory_space<vmem>>) attributes {dimension_semantics = [#tpu.dimension_semantics<parallel>], iteration_bounds = array<i64: 2>, scalar_prefetch = 0 : i64, scratch_operands = 0 : i64, tpu.core_type = #tpu.core_type<tc>, window_params = [{transform_indices = @transform_0, window_bounds = array<i64: 256, 256>}, {pipeline_mode = #tpu.pipeline_mode<synchronous>, transform_indices = @transform_1, window_bounds = array<i64: 256, 128>}, {pipeline_mode = #tpu.pipeline_mode<synchronous>, transform_indices = @transform_2, window_bounds = array<i64: 1, 128>}, {transform_indices = @transform_3, window_bounds = array<i64: 256, 128>}]} {
    %c0 = arith.constant 0 : index
    %c0_0 = arith.constant 0 : index
    %0 = vector.load %arg1[%c0, %c0_0] : memref<256x256xbf16, #tpu.memory_space<vmem>>, vector<256x256xbf16>
    %c0_1 = arith.constant 0 : index
    %c0_2 = arith.constant 0 : index
    %1 = vector.load %arg2[%c0_1, %c0_2] : memref<256x128xbf16, #tpu.memory_space<vmem>>, vector<256x128xbf16>
    %cst = arith.constant dense<0.000000e+00> : vector<256x128xf32>
    %2 = tpu.matmul %0, %1, %cst {dimension_numbers = #tpu.dot_dimension_numbers<[1], [0], [0], [1], [0, 0, 1, 1], [], []>} : vector<256x256xbf16>, vector<256x128xbf16>, vector<256x128xf32> -> vector<256x128xf32>
    %c0_3 = arith.constant 0 : index
    %c0_4 = arith.constant 0 : index
    %3 = vector.load %arg3[%c0_3, %c0_4] : memref<1x128xf32, #tpu.memory_space<vmem>>, vector<1x128xf32>
    %4 = vector.broadcast %3 : vector<1x128xf32> to vector<256x128xf32>
    %5 = arith.addf %2, %4 : vector<256x128xf32>
    %cst_5 = arith.constant 0.000000e+00 : f32
    %6 = vector.broadcast %cst_5 : f32 to vector<256x128xf32>
    %7 = arith.maximumf %5, %6 : vector<256x128xf32>
    %8 = arith.truncf %7 : vector<256x128xf32> to vector<256x128xbf16>
    %c0_6 = arith.constant 0 : index
    %c0_7 = arith.constant 0 : index
    %9 = vector.load %arg4[%c0_6, %c0_7] : memref<256x128xbf16, #tpu.memory_space<vmem>>, vector<256x128xbf16>
    tpu.vector_store %arg4[%c0_6, %c0_7], %8 {strides = array<i32>} : memref<256x128xbf16, #tpu.memory_space<vmem>>, vector<256x128xbf16>,
    return
  }
  func.func @transform_0(%arg0: i32) -> (i32, i32) {
    %c0_i32 = arith.constant 0 : i32
    %c0_i32_0 = arith.constant 0 : i32
    return %arg0, %c0_i32 : i32, i32
  }
  func.func @transform_1(%arg0: i32) -> (i32, i32) {
    %c0_i32 = arith.constant 0 : i32
    %c0_i32_0 = arith.constant 0 : i32
    %c0_i32_1 = arith.constant 0 : i32
    return %c0_i32, %c0_i32_0 : i32, i32
  }
  func.func @transform_2(%arg0: i32) -> (i32, i32) {
    %c0_i32 = arith.constant 0 : i32
    %c0_i32_0 = arith.constant 0 : i32
    %c0_i32_1 = arith.constant 0 : i32
    return %c0_i32, %c0_i32_0 : i32, i32
  }
  func.func @transform_3(%arg0: i32) -> (i32, i32) {
    %c0_i32 = arith.constant 0 : i32
    %c0_i32_0 = arith.constant 0 : i32
    return %arg0, %c0_i32 : i32, i32
  }
}

module attributes {stable_mosaic.version = 11 : i64} {
  func.func @_pool_kernel(%arg0: i32, %arg1: memref<8x2x8x256xbf16, #tpu.memory_space<vmem>>, %arg2: memref<8x8x128xbf16, #tpu.memory_space<vmem>>) attributes {dimension_semantics = [#tpu.dimension_semantics<parallel>], iteration_bounds = array<i64: 2>, scalar_prefetch = 0 : i64, scratch_operands = 0 : i64, tpu.core_type = #tpu.core_type<tc>, window_params = [{transform_indices = @transform_0, window_bounds = array<i64: 8, 2, 8, 256>}, {transform_indices = @transform_1, window_bounds = array<i64: 8, 8, 128>}]} {
    %c0 = arith.constant 0 : index
    %c0_0 = arith.constant 0 : index
    %c0_1 = arith.constant 0 : index
    %c0_2 = arith.constant 0 : index
    %0 = vector.load %arg1[%c0, %c0_0, %c0_1, %c0_2] : memref<8x2x8x256xbf16, #tpu.memory_space<vmem>>, vector<8x2x8x256xbf16>
    %1 = arith.extf %0 : vector<8x2x8x256xbf16> to vector<8x2x8x256xf32>
    %2 = vector.extract_strided_slice %1 {offsets = [0, 0, 0, 0], sizes = [8, 1, 8, 256], strides = [1, 1, 1, 1]} : vector<8x2x8x256xf32> to vector<8x1x8x256xf32>
    %3 = vector.shape_cast %2 : vector<8x1x8x256xf32> to vector<8x8x256xf32>
    %4 = vector.extract_strided_slice %1 {offsets = [0, 1, 0, 0], sizes = [8, 1, 8, 256], strides = [1, 1, 1, 1]} : vector<8x2x8x256xf32> to vector<8x1x8x256xf32>
    %5 = vector.shape_cast %4 : vector<8x1x8x256xf32> to vector<8x8x256xf32>
    %6 = arith.maximumf %3, %5 : vector<8x8x256xf32>
    %7 = vector.extract_strided_slice %6 {offsets = [0, 0, 0], sizes = [8, 8, 128], strides = [1, 1, 1]} : vector<8x8x256xf32> to vector<8x8x128xf32>
    %8 = vector.extract_strided_slice %6 {offsets = [0, 0, 128], sizes = [8, 8, 128], strides = [1, 1, 1]} : vector<8x8x256xf32> to vector<8x8x128xf32>
    %9 = arith.maximumf %7, %8 : vector<8x8x128xf32>
    %10 = arith.truncf %9 : vector<8x8x128xf32> to vector<8x8x128xbf16>
    %c0_3 = arith.constant 0 : index
    %c0_4 = arith.constant 0 : index
    %c0_5 = arith.constant 0 : index
    %11 = vector.load %arg2[%c0_3, %c0_4, %c0_5] : memref<8x8x128xbf16, #tpu.memory_space<vmem>>, vector<8x8x128xbf16>
    tpu.vector_store %arg2[%c0_3, %c0_4, %c0_5], %10 {strides = array<i32>} : memref<8x8x128xbf16, #tpu.memory_space<vmem>>, vector<8x8x128xbf16>,
    return
  }
  func.func @transform_0(%arg0: i32) -> (i32, i32, i32, i32) {
    %c0_i32 = arith.constant 0 : i32
    %c0_i32_0 = arith.constant 0 : i32
    %c0_i32_1 = arith.constant 0 : i32
    %c0_i32_2 = arith.constant 0 : i32
    return %arg0, %c0_i32, %c0_i32_0, %c0_i32_1 : i32, i32, i32, i32
  }
  func.func @transform_1(%arg0: i32) -> (i32, i32, i32) {
    %c0_i32 = arith.constant 0 : i32
    %c0_i32_0 = arith.constant 0 : i32
    %c0_i32_1 = arith.constant 0 : i32
    return %arg0, %c0_i32, %c0_i32_0 : i32, i32, i32
  }
}

module attributes {stable_mosaic.version = 11 : i64} {
  func.func @_conv_tap_kernel(%arg0: i32, %arg1: i32, %arg2: i32, %arg3: memref<1x8x12x128xbf16, #tpu.memory_space<vmem>>, %arg4: memref<1x3x128x128xbf16, #tpu.memory_space<vmem>>, %arg5: memref<1x128xf32, #tpu.memory_space<vmem>>, %arg6: memref<1x8x8x128xbf16, #tpu.memory_space<vmem>>, %arg7: memref<8x8x128xf32, #tpu.memory_space<vmem>>) attributes {dimension_semantics = [#tpu.dimension_semantics<parallel>, #tpu.dimension_semantics<parallel>, #tpu.dimension_semantics<arbitrary>], iteration_bounds = array<i64: 2, 1, 3>, scalar_prefetch = 0 : i64, scratch_operands = 1 : i64, tpu.core_type = #tpu.core_type<tc>, window_params = [{transform_indices = @transform_0, window_bounds = array<i64: 1, 8, 12, 128>}, {transform_indices = @transform_1, window_bounds = array<i64: 1, 3, 128, 128>}, {pipeline_mode = #tpu.pipeline_mode<synchronous>, transform_indices = @transform_2, window_bounds = array<i64: 1, 128>}, {transform_indices = @transform_3, window_bounds = array<i64: 1, 8, 8, 128>}]} {
    %c0_i32 = arith.constant 0 : i32
    %0 = arith.cmpi eq, %arg2, %c0_i32 : i32
    %1 = arith.extui %0 : i1 to i32
    %c0_i32_0 = arith.constant 0 : i32
    %2 = arith.cmpi ne, %1, %c0_i32_0 : i32
    scf.if %2 {
      %cst_257 = arith.constant 0.000000e+00 : f32
      %190 = vector.broadcast %cst_257 : f32 to vector<8x8x128xf32>
      %c0_258 = arith.constant 0 : index
      %c0_259 = arith.constant 0 : index
      %c0_260 = arith.constant 0 : index
      %191 = vector.load %arg7[%c0_258, %c0_259, %c0_260] : memref<8x8x128xf32, #tpu.memory_space<vmem>>, vector<8x8x128xf32>
      tpu.vector_store %arg7[%c0_258, %c0_259, %c0_260], %190 {strides = array<i32>} : memref<8x8x128xf32, #tpu.memory_space<vmem>>, vector<8x8x128xf32>,
    } else {
    }
    %c0 = arith.constant 0 : index
    %c0_1 = arith.constant 0 : index
    %c0_2 = arith.constant 0 : index
    %c0_3 = arith.constant 0 : index
    %3 = vector.load %arg3[%c0, %c0_1, %c0_2, %c0_3] : memref<1x8x12x128xbf16, #tpu.memory_space<vmem>>, vector<1x1x8x128xbf16>
    %4 = vector.shape_cast %3 : vector<1x1x8x128xbf16> to vector<8x128xbf16>
    %c0_4 = arith.constant 0 : index
    %c0_5 = arith.constant 0 : index
    %c0_6 = arith.constant 0 : index
    %c0_7 = arith.constant 0 : index
    %5 = vector.load %arg4[%c0_4, %c0_5, %c0_6, %c0_7] : memref<1x3x128x128xbf16, #tpu.memory_space<vmem>>, vector<1x1x128x128xbf16>
    %6 = vector.shape_cast %5 : vector<1x1x128x128xbf16> to vector<128x128xbf16>
    %cst = arith.constant dense<0.000000e+00> : vector<8x128xf32>
    %7 = tpu.matmul %4, %6, %cst {dimension_numbers = #tpu.dot_dimension_numbers<[1], [0], [0], [1], [0, 0, 1, 1], [], []>} : vector<8x128xbf16>, vector<128x128xbf16>, vector<8x128xf32> -> vector<8x128xf32>
    %c0_8 = arith.constant 0 : index
    %c0_9 = arith.constant 0 : index
    %c2 = arith.constant 2 : index
    %c0_10 = arith.constant 0 : index
    %8 = vector.load %arg3[%c0_8, %c0_9, %c2, %c0_10] : memref<1x8x12x128xbf16, #tpu.memory_space<vmem>>, vector<1x1x8x128xbf16>
    %9 = vector.shape_cast %8 : vector<1x1x8x128xbf16> to vector<8x128xbf16>
    %c0_11 = arith.constant 0 : index
    %c1 = arith.constant 1 : index
    %c0_12 = arith.constant 0 : index
    %c0_13 = arith.constant 0 : index
    %10 = vector.load %arg4[%c0_11, %c1, %c0_12, %c0_13] : memref<1x3x128x128xbf16, #tpu.memory_space<vmem>>, vector<1x1x128x128xbf16>
    %11 = vector.shape_cast %10 : vector<1x1x128x128xbf16> to vector<128x128xbf16>
    %cst_14 = arith.constant dense<0.000000e+00> : vector<8x128xf32>
    %12 = tpu.matmul %9, %11, %cst_14 {dimension_numbers = #tpu.dot_dimension_numbers<[1], [0], [0], [1], [0, 0, 1, 1], [], []>} : vector<8x128xbf16>, vector<128x128xbf16>, vector<8x128xf32> -> vector<8x128xf32>
    %13 = arith.addf %7, %12 : vector<8x128xf32>
    %c0_15 = arith.constant 0 : index
    %c0_16 = arith.constant 0 : index
    %c4 = arith.constant 4 : index
    %c0_17 = arith.constant 0 : index
    %14 = vector.load %arg3[%c0_15, %c0_16, %c4, %c0_17] : memref<1x8x12x128xbf16, #tpu.memory_space<vmem>>, vector<1x1x8x128xbf16>
    %15 = vector.shape_cast %14 : vector<1x1x8x128xbf16> to vector<8x128xbf16>
    %c0_18 = arith.constant 0 : index
    %c2_19 = arith.constant 2 : index
    %c0_20 = arith.constant 0 : index
    %c0_21 = arith.constant 0 : index
    %16 = vector.load %arg4[%c0_18, %c2_19, %c0_20, %c0_21] : memref<1x3x128x128xbf16, #tpu.memory_space<vmem>>, vector<1x1x128x128xbf16>
    %17 = vector.shape_cast %16 : vector<1x1x128x128xbf16> to vector<128x128xbf16>
    %cst_22 = arith.constant dense<0.000000e+00> : vector<8x128xf32>
    %18 = tpu.matmul %15, %17, %cst_22 {dimension_numbers = #tpu.dot_dimension_numbers<[1], [0], [0], [1], [0, 0, 1, 1], [], []>} : vector<8x128xbf16>, vector<128x128xbf16>, vector<8x128xf32> -> vector<8x128xf32>
    %19 = arith.addf %13, %18 : vector<8x128xf32>
    %c0_23 = arith.constant 0 : index
    %c0_24 = arith.constant 0 : index
    %c0_25 = arith.constant 0 : index
    %20 = vector.load %arg7[%c0_23, %c0_24, %c0_25] : memref<8x8x128xf32, #tpu.memory_space<vmem>>, vector<1x8x128xf32>
    %21 = vector.shape_cast %20 : vector<1x8x128xf32> to vector<8x128xf32>
    %22 = arith.addf %21, %19 : vector<8x128xf32>
    %c0_26 = arith.constant 0 : index
    %c0_27 = arith.constant 0 : index
    %c0_28 = arith.constant 0 : index
    %23 = vector.load %arg7[%c0_26, %c0_27, %c0_28] : memref<8x8x128xf32, #tpu.memory_space<vmem>>, vector<1x8x128xf32>
    %24 = vector.shape_cast %23 : vector<1x8x128xf32> to vector<8x128xf32>
    %25 = vector.shape_cast %22 : vector<8x128xf32> to vector<1x8x128xf32>
    tpu.vector_store %arg7[%c0_26, %c0_27, %c0_28], %25 {strides = array<i32>} : memref<8x8x128xf32, #tpu.memory_space<vmem>>, vector<1x8x128xf32>,
    %c0_29 = arith.constant 0 : index
    %c1_30 = arith.constant 1 : index
    %c0_31 = arith.constant 0 : index
    %c0_32 = arith.constant 0 : index
    %26 = vector.load %arg3[%c0_29, %c1_30, %c0_31, %c0_32] : memref<1x8x12x128xbf16, #tpu.memory_space<vmem>>, vector<1x1x8x128xbf16>
    %27 = vector.shape_cast %26 : vector<1x1x8x128xbf16> to vector<8x128xbf16>
    %c0_33 = arith.constant 0 : index
    %c0_34 = arith.constant 0 : index
    %c0_35 = arith.constant 0 : index
    %c0_36 = arith.constant 0 : index
    %28 = vector.load %arg4[%c0_33, %c0_34, %c0_35, %c0_36] : memref<1x3x128x128xbf16, #tpu.memory_space<vmem>>, vector<1x1x128x128xbf16>
    %29 = vector.shape_cast %28 : vector<1x1x128x128xbf16> to vector<128x128xbf16>
    %cst_37 = arith.constant dense<0.000000e+00> : vector<8x128xf32>
    %30 = tpu.matmul %27, %29, %cst_37 {dimension_numbers = #tpu.dot_dimension_numbers<[1], [0], [0], [1], [0, 0, 1, 1], [], []>} : vector<8x128xbf16>, vector<128x128xbf16>, vector<8x128xf32> -> vector<8x128xf32>
    %c0_38 = arith.constant 0 : index
    %c1_39 = arith.constant 1 : index
    %c2_40 = arith.constant 2 : index
    %c0_41 = arith.constant 0 : index
    %31 = vector.load %arg3[%c0_38, %c1_39, %c2_40, %c0_41] : memref<1x8x12x128xbf16, #tpu.memory_space<vmem>>, vector<1x1x8x128xbf16>
    %32 = vector.shape_cast %31 : vector<1x1x8x128xbf16> to vector<8x128xbf16>
    %c0_42 = arith.constant 0 : index
    %c1_43 = arith.constant 1 : index
    %c0_44 = arith.constant 0 : index
    %c0_45 = arith.constant 0 : index
    %33 = vector.load %arg4[%c0_42, %c1_43, %c0_44, %c0_45] : memref<1x3x128x128xbf16, #tpu.memory_space<vmem>>, vector<1x1x128x128xbf16>
    %34 = vector.shape_cast %33 : vector<1x1x128x128xbf16> to vector<128x128xbf16>
    %cst_46 = arith.constant dense<0.000000e+00> : vector<8x128xf32>
    %35 = tpu.matmul %32, %34, %cst_46 {dimension_numbers = #tpu.dot_dimension_numbers<[1], [0], [0], [1], [0, 0, 1, 1], [], []>} : vector<8x128xbf16>, vector<128x128xbf16>, vector<8x128xf32> -> vector<8x128xf32>
    %36 = arith.addf %30, %35 : vector<8x128xf32>
    %c0_47 = arith.constant 0 : index
    %c1_48 = arith.constant 1 : index
    %c4_49 = arith.constant 4 : index
    %c0_50 = arith.constant 0 : index
    %37 = vector.load %arg3[%c0_47, %c1_48, %c4_49, %c0_50] : memref<1x8x12x128xbf16, #tpu.memory_space<vmem>>, vector<1x1x8x128xbf16>
    %38 = vector.shape_cast %37 : vector<1x1x8x128xbf16> to vector<8x128xbf16>
    %c0_51 = arith.constant 0 : index
    %c2_52 = arith.constant 2 : index
    %c0_53 = arith.constant 0 : index
    %c0_54 = arith.constant 0 : index
    %39 = vector.load %arg4[%c0_51, %c2_52, %c0_53, %c0_54] : memref<1x3x128x128xbf16, #tpu.memory_space<vmem>>, vector<1x1x128x128xbf16>
    %40 = vector.shape_cast %39 : vector<1x1x128x128xbf16> to vector<128x128xbf16>
    %cst_55 = arith.constant dense<0.000000e+00> : vector<8x128xf32>
    %41 = tpu.matmul %38, %40, %cst_55 {dimension_numbers = #tpu.dot_dimension_numbers<[1], [0], [0], [1], [0, 0, 1, 1], [], []>} : vector<8x128xbf16>, vector<128x128xbf16>, vector<8x128xf32> -> vector<8x128xf32>
    %42 = arith.addf %36, %41 : vector<8x128xf32>
    %c1_56 = arith.constant 1 : index
    %c0_57 = arith.constant 0 : index
    %c0_58 = arith.constant 0 : index
    %43 = vector.load %arg7[%c1_56, %c0_57, %c0_58] : memref<8x8x128xf32, #tpu.memory_space<vmem>>, vector<1x8x128xf32>
    %44 = vector.shape_cast %43 : vector<1x8x128xf32> to vector<8x128xf32>
    %45 = arith.addf %44, %42 : vector<8x128xf32>
    %c1_59 = arith.constant 1 : index
    %c0_60 = arith.constant 0 : index
    %c0_61 = arith.constant 0 : index
    %46 = vector.load %arg7[%c1_59, %c0_60, %c0_61] : memref<8x8x128xf32, #tpu.memory_space<vmem>>, vector<1x8x128xf32>
    %47 = vector.shape_cast %46 : vector<1x8x128xf32> to vector<8x128xf32>
    %48 = vector.shape_cast %45 : vector<8x128xf32> to vector<1x8x128xf32>
    tpu.vector_store %arg7[%c1_59, %c0_60, %c0_61], %48 {strides = array<i32>} : memref<8x8x128xf32, #tpu.memory_space<vmem>>, vector<1x8x128xf32>,
    %c0_62 = arith.constant 0 : index
    %c2_63 = arith.constant 2 : index
    %c0_64 = arith.constant 0 : index
    %c0_65 = arith.constant 0 : index
    %49 = vector.load %arg3[%c0_62, %c2_63, %c0_64, %c0_65] : memref<1x8x12x128xbf16, #tpu.memory_space<vmem>>, vector<1x1x8x128xbf16>
    %50 = vector.shape_cast %49 : vector<1x1x8x128xbf16> to vector<8x128xbf16>
    %c0_66 = arith.constant 0 : index
    %c0_67 = arith.constant 0 : index
    %c0_68 = arith.constant 0 : index
    %c0_69 = arith.constant 0 : index
    %51 = vector.load %arg4[%c0_66, %c0_67, %c0_68, %c0_69] : memref<1x3x128x128xbf16, #tpu.memory_space<vmem>>, vector<1x1x128x128xbf16>
    %52 = vector.shape_cast %51 : vector<1x1x128x128xbf16> to vector<128x128xbf16>
    %cst_70 = arith.constant dense<0.000000e+00> : vector<8x128xf32>
    %53 = tpu.matmul %50, %52, %cst_70 {dimension_numbers = #tpu.dot_dimension_numbers<[1], [0], [0], [1], [0, 0, 1, 1], [], []>} : vector<8x128xbf16>, vector<128x128xbf16>, vector<8x128xf32> -> vector<8x128xf32>
    %c0_71 = arith.constant 0 : index
    %c2_72 = arith.constant 2 : index
    %c2_73 = arith.constant 2 : index
    %c0_74 = arith.constant 0 : index
    %54 = vector.load %arg3[%c0_71, %c2_72, %c2_73, %c0_74] : memref<1x8x12x128xbf16, #tpu.memory_space<vmem>>, vector<1x1x8x128xbf16>
    %55 = vector.shape_cast %54 : vector<1x1x8x128xbf16> to vector<8x128xbf16>
    %c0_75 = arith.constant 0 : index
    %c1_76 = arith.constant 1 : index
    %c0_77 = arith.constant 0 : index
    %c0_78 = arith.constant 0 : index
    %56 = vector.load %arg4[%c0_75, %c1_76, %c0_77, %c0_78] : memref<1x3x128x128xbf16, #tpu.memory_space<vmem>>, vector<1x1x128x128xbf16>
    %57 = vector.shape_cast %56 : vector<1x1x128x128xbf16> to vector<128x128xbf16>
    %cst_79 = arith.constant dense<0.000000e+00> : vector<8x128xf32>
    %58 = tpu.matmul %55, %57, %cst_79 {dimension_numbers = #tpu.dot_dimension_numbers<[1], [0], [0], [1], [0, 0, 1, 1], [], []>} : vector<8x128xbf16>, vector<128x128xbf16>, vector<8x128xf32> -> vector<8x128xf32>
    %59 = arith.addf %53, %58 : vector<8x128xf32>
    %c0_80 = arith.constant 0 : index
    %c2_81 = arith.constant 2 : index
    %c4_82 = arith.constant 4 : index
    %c0_83 = arith.constant 0 : index
    %60 = vector.load %arg3[%c0_80, %c2_81, %c4_82, %c0_83] : memref<1x8x12x128xbf16, #tpu.memory_space<vmem>>, vector<1x1x8x128xbf16>
    %61 = vector.shape_cast %60 : vector<1x1x8x128xbf16> to vector<8x128xbf16>
    %c0_84 = arith.constant 0 : index
    %c2_85 = arith.constant 2 : index
    %c0_86 = arith.constant 0 : index
    %c0_87 = arith.constant 0 : index
    %62 = vector.load %arg4[%c0_84, %c2_85, %c0_86, %c0_87] : memref<1x3x128x128xbf16, #tpu.memory_space<vmem>>, vector<1x1x128x128xbf16>
    %63 = vector.shape_cast %62 : vector<1x1x128x128xbf16> to vector<128x128xbf16>
    %cst_88 = arith.constant dense<0.000000e+00> : vector<8x128xf32>
    %64 = tpu.matmul %61, %63, %cst_88 {dimension_numbers = #tpu.dot_dimension_numbers<[1], [0], [0], [1], [0, 0, 1, 1], [], []>} : vector<8x128xbf16>, vector<128x128xbf16>, vector<8x128xf32> -> vector<8x128xf32>
    %65 = arith.addf %59, %64 : vector<8x128xf32>
    %c2_89 = arith.constant 2 : index
    %c0_90 = arith.constant 0 : index
    %c0_91 = arith.constant 0 : index
    %66 = vector.load %arg7[%c2_89, %c0_90, %c0_91] : memref<8x8x128xf32, #tpu.memory_space<vmem>>, vector<1x8x128xf32>
    %67 = vector.shape_cast %66 : vector<1x8x128xf32> to vector<8x128xf32>
    %68 = arith.addf %67, %65 : vector<8x128xf32>
    %c2_92 = arith.constant 2 : index
    %c0_93 = arith.constant 0 : index
    %c0_94 = arith.constant 0 : index
    %69 = vector.load %arg7[%c2_92, %c0_93, %c0_94] : memref<8x8x128xf32, #tpu.memory_space<vmem>>, vector<1x8x128xf32>
    %70 = vector.shape_cast %69 : vector<1x8x128xf32> to vector<8x128xf32>
    %71 = vector.shape_cast %68 : vector<8x128xf32> to vector<1x8x128xf32>
    tpu.vector_store %arg7[%c2_92, %c0_93, %c0_94], %71 {strides = array<i32>} : memref<8x8x128xf32, #tpu.memory_space<vmem>>, vector<1x8x128xf32>,
    %c0_95 = arith.constant 0 : index
    %c3 = arith.constant 3 : index
    %c0_96 = arith.constant 0 : index
    %c0_97 = arith.constant 0 : index
    %72 = vector.load %arg3[%c0_95, %c3, %c0_96, %c0_97] : memref<1x8x12x128xbf16, #tpu.memory_space<vmem>>, vector<1x1x8x128xbf16>
    %73 = vector.shape_cast %72 : vector<1x1x8x128xbf16> to vector<8x128xbf16>
    %c0_98 = arith.constant 0 : index
    %c0_99 = arith.constant 0 : index
    %c0_100 = arith.constant 0 : index
    %c0_101 = arith.constant 0 : index
    %74 = vector.load %arg4[%c0_98, %c0_99, %c0_100, %c0_101] : memref<1x3x128x128xbf16, #tpu.memory_space<vmem>>, vector<1x1x128x128xbf16>
    %75 = vector.shape_cast %74 : vector<1x1x128x128xbf16> to vector<128x128xbf16>
    %cst_102 = arith.constant dense<0.000000e+00> : vector<8x128xf32>
    %76 = tpu.matmul %73, %75, %cst_102 {dimension_numbers = #tpu.dot_dimension_numbers<[1], [0], [0], [1], [0, 0, 1, 1], [], []>} : vector<8x128xbf16>, vector<128x128xbf16>, vector<8x128xf32> -> vector<8x128xf32>
    %c0_103 = arith.constant 0 : index
    %c3_104 = arith.constant 3 : index
    %c2_105 = arith.constant 2 : index
    %c0_106 = arith.constant 0 : index
    %77 = vector.load %arg3[%c0_103, %c3_104, %c2_105, %c0_106] : memref<1x8x12x128xbf16, #tpu.memory_space<vmem>>, vector<1x1x8x128xbf16>
    %78 = vector.shape_cast %77 : vector<1x1x8x128xbf16> to vector<8x128xbf16>
    %c0_107 = arith.constant 0 : index
    %c1_108 = arith.constant 1 : index
    %c0_109 = arith.constant 0 : index
    %c0_110 = arith.constant 0 : index
    %79 = vector.load %arg4[%c0_107, %c1_108, %c0_109, %c0_110] : memref<1x3x128x128xbf16, #tpu.memory_space<vmem>>, vector<1x1x128x128xbf16>
    %80 = vector.shape_cast %79 : vector<1x1x128x128xbf16> to vector<128x128xbf16>
    %cst_111 = arith.constant dense<0.000000e+00> : vector<8x128xf32>
    %81 = tpu.matmul %78, %80, %cst_111 {dimension_numbers = #tpu.dot_dimension_numbers<[1], [0], [0], [1], [0, 0, 1, 1], [], []>} : vector<8x128xbf16>, vector<128x128xbf16>, vector<8x128xf32> -> vector<8x128xf32>
    %82 = arith.addf %76, %81 : vector<8x128xf32>
    %c0_112 = arith.constant 0 : index
    %c3_113 = arith.constant 3 : index
    %c4_114 = arith.constant 4 : index
    %c0_115 = arith.constant 0 : index
    %83 = vector.load %arg3[%c0_112, %c3_113, %c4_114, %c0_115] : memref<1x8x12x128xbf16, #tpu.memory_space<vmem>>, vector<1x1x8x128xbf16>
    %84 = vector.shape_cast %83 : vector<1x1x8x128xbf16> to vector<8x128xbf16>
    %c0_116 = arith.constant 0 : index
    %c2_117 = arith.constant 2 : index
    %c0_118 = arith.constant 0 : index
    %c0_119 = arith.constant 0 : index
    %85 = vector.load %arg4[%c0_116, %c2_117, %c0_118, %c0_119] : memref<1x3x128x128xbf16, #tpu.memory_space<vmem>>, vector<1x1x128x128xbf16>
    %86 = vector.shape_cast %85 : vector<1x1x128x128xbf16> to vector<128x128xbf16>
    %cst_120 = arith.constant dense<0.000000e+00> : vector<8x128xf32>
    %87 = tpu.matmul %84, %86, %cst_120 {dimension_numbers = #tpu.dot_dimension_numbers<[1], [0], [0], [1], [0, 0, 1, 1], [], []>} : vector<8x128xbf16>, vector<128x128xbf16>, vector<8x128xf32> -> vector<8x128xf32>
    %88 = arith.addf %82, %87 : vector<8x128xf32>
    %c3_121 = arith.constant 3 : index
    %c0_122 = arith.constant 0 : index
    %c0_123 = arith.constant 0 : index
    %89 = vector.load %arg7[%c3_121, %c0_122, %c0_123] : memref<8x8x128xf32, #tpu.memory_space<vmem>>, vector<1x8x128xf32>
    %90 = vector.shape_cast %89 : vector<1x8x128xf32> to vector<8x128xf32>
    %91 = arith.addf %90, %88 : vector<8x128xf32>
    %c3_124 = arith.constant 3 : index
    %c0_125 = arith.constant 0 : index
    %c0_126 = arith.constant 0 : index
    %92 = vector.load %arg7[%c3_124, %c0_125, %c0_126] : memref<8x8x128xf32, #tpu.memory_space<vmem>>, vector<1x8x128xf32>
    %93 = vector.shape_cast %92 : vector<1x8x128xf32> to vector<8x128xf32>
    %94 = vector.shape_cast %91 : vector<8x128xf32> to vector<1x8x128xf32>
    tpu.vector_store %arg7[%c3_124, %c0_125, %c0_126], %94 {strides = array<i32>} : memref<8x8x128xf32, #tpu.memory_space<vmem>>, vector<1x8x128xf32>,
    %c0_127 = arith.constant 0 : index
    %c4_128 = arith.constant 4 : index
    %c0_129 = arith.constant 0 : index
    %c0_130 = arith.constant 0 : index
    %95 = vector.load %arg3[%c0_127, %c4_128, %c0_129, %c0_130] : memref<1x8x12x128xbf16, #tpu.memory_space<vmem>>, vector<1x1x8x128xbf16>
    %96 = vector.shape_cast %95 : vector<1x1x8x128xbf16> to vector<8x128xbf16>
    %c0_131 = arith.constant 0 : index
    %c0_132 = arith.constant 0 : index
    %c0_133 = arith.constant 0 : index
    %c0_134 = arith.constant 0 : index
    %97 = vector.load %arg4[%c0_131, %c0_132, %c0_133, %c0_134] : memref<1x3x128x128xbf16, #tpu.memory_space<vmem>>, vector<1x1x128x128xbf16>
    %98 = vector.shape_cast %97 : vector<1x1x128x128xbf16> to vector<128x128xbf16>
    %cst_135 = arith.constant dense<0.000000e+00> : vector<8x128xf32>
    %99 = tpu.matmul %96, %98, %cst_135 {dimension_numbers = #tpu.dot_dimension_numbers<[1], [0], [0], [1], [0, 0, 1, 1], [], []>} : vector<8x128xbf16>, vector<128x128xbf16>, vector<8x128xf32> -> vector<8x128xf32>
    %c0_136 = arith.constant 0 : index
    %c4_137 = arith.constant 4 : index
    %c2_138 = arith.constant 2 : index
    %c0_139 = arith.constant 0 : index
    %100 = vector.load %arg3[%c0_136, %c4_137, %c2_138, %c0_139] : memref<1x8x12x128xbf16, #tpu.memory_space<vmem>>, vector<1x1x8x128xbf16>
    %101 = vector.shape_cast %100 : vector<1x1x8x128xbf16> to vector<8x128xbf16>
    %c0_140 = arith.constant 0 : index
    %c1_141 = arith.constant 1 : index
    %c0_142 = arith.constant 0 : index
    %c0_143 = arith.constant 0 : index
    %102 = vector.load %arg4[%c0_140, %c1_141, %c0_142, %c0_143] : memref<1x3x128x128xbf16, #tpu.memory_space<vmem>>, vector<1x1x128x128xbf16>
    %103 = vector.shape_cast %102 : vector<1x1x128x128xbf16> to vector<128x128xbf16>
    %cst_144 = arith.constant dense<0.000000e+00> : vector<8x128xf32>
    %104 = tpu.matmul %101, %103, %cst_144 {dimension_numbers = #tpu.dot_dimension_numbers<[1], [0], [0], [1], [0, 0, 1, 1], [], []>} : vector<8x128xbf16>, vector<128x128xbf16>, vector<8x128xf32> -> vector<8x128xf32>
    %105 = arith.addf %99, %104 : vector<8x128xf32>
    %c0_145 = arith.constant 0 : index
    %c4_146 = arith.constant 4 : index
    %c4_147 = arith.constant 4 : index
    %c0_148 = arith.constant 0 : index
    %106 = vector.load %arg3[%c0_145, %c4_146, %c4_147, %c0_148] : memref<1x8x12x128xbf16, #tpu.memory_space<vmem>>, vector<1x1x8x128xbf16>
    %107 = vector.shape_cast %106 : vector<1x1x8x128xbf16> to vector<8x128xbf16>
    %c0_149 = arith.constant 0 : index
    %c2_150 = arith.constant 2 : index
    %c0_151 = arith.constant 0 : index
    %c0_152 = arith.constant 0 : index
    %108 = vector.load %arg4[%c0_149, %c2_150, %c0_151, %c0_152] : memref<1x3x128x128xbf16, #tpu.memory_space<vmem>>, vector<1x1x128x128xbf16>
    %109 = vector.shape_cast %108 : vector<1x1x128x128xbf16> to vector<128x128xbf16>
    %cst_153 = arith.constant dense<0.000000e+00> : vector<8x128xf32>
    %110 = tpu.matmul %107, %109, %cst_153 {dimension_numbers = #tpu.dot_dimension_numbers<[1], [0], [0], [1], [0, 0, 1, 1], [], []>} : vector<8x128xbf16>, vector<128x128xbf16>, vector<8x128xf32> -> vector<8x128xf32>
    %111 = arith.addf %105, %110 : vector<8x128xf32>
    %c4_154 = arith.constant 4 : index
    %c0_155 = arith.constant 0 : index
    %c0_156 = arith.constant 0 : index
    %112 = vector.load %arg7[%c4_154, %c0_155, %c0_156] : memref<8x8x128xf32, #tpu.memory_space<vmem>>, vector<1x8x128xf32>
    %113 = vector.shape_cast %112 : vector<1x8x128xf32> to vector<8x128xf32>
    %114 = arith.addf %113, %111 : vector<8x128xf32>
    %c4_157 = arith.constant 4 : index
    %c0_158 = arith.constant 0 : index
    %c0_159 = arith.constant 0 : index
    %115 = vector.load %arg7[%c4_157, %c0_158, %c0_159] : memref<8x8x128xf32, #tpu.memory_space<vmem>>, vector<1x8x128xf32>
    %116 = vector.shape_cast %115 : vector<1x8x128xf32> to vector<8x128xf32>
    %117 = vector.shape_cast %114 : vector<8x128xf32> to vector<1x8x128xf32>
    tpu.vector_store %arg7[%c4_157, %c0_158, %c0_159], %117 {strides = array<i32>} : memref<8x8x128xf32, #tpu.memory_space<vmem>>, vector<1x8x128xf32>,
    %c0_160 = arith.constant 0 : index
    %c5 = arith.constant 5 : index
    %c0_161 = arith.constant 0 : index
    %c0_162 = arith.constant 0 : index
    %118 = vector.load %arg3[%c0_160, %c5, %c0_161, %c0_162] : memref<1x8x12x128xbf16, #tpu.memory_space<vmem>>, vector<1x1x8x128xbf16>
    %119 = vector.shape_cast %118 : vector<1x1x8x128xbf16> to vector<8x128xbf16>
    %c0_163 = arith.constant 0 : index
    %c0_164 = arith.constant 0 : index
    %c0_165 = arith.constant 0 : index
    %c0_166 = arith.constant 0 : index
    %120 = vector.load %arg4[%c0_163, %c0_164, %c0_165, %c0_166] : memref<1x3x128x128xbf16, #tpu.memory_space<vmem>>, vector<1x1x128x128xbf16>
    %121 = vector.shape_cast %120 : vector<1x1x128x128xbf16> to vector<128x128xbf16>
    %cst_167 = arith.constant dense<0.000000e+00> : vector<8x128xf32>
    %122 = tpu.matmul %119, %121, %cst_167 {dimension_numbers = #tpu.dot_dimension_numbers<[1], [0], [0], [1], [0, 0, 1, 1], [], []>} : vector<8x128xbf16>, vector<128x128xbf16>, vector<8x128xf32> -> vector<8x128xf32>
    %c0_168 = arith.constant 0 : index
    %c5_169 = arith.constant 5 : index
    %c2_170 = arith.constant 2 : index
    %c0_171 = arith.constant 0 : index
    %123 = vector.load %arg3[%c0_168, %c5_169, %c2_170, %c0_171] : memref<1x8x12x128xbf16, #tpu.memory_space<vmem>>, vector<1x1x8x128xbf16>
    %124 = vector.shape_cast %123 : vector<1x1x8x128xbf16> to vector<8x128xbf16>
    %c0_172 = arith.constant 0 : index
    %c1_173 = arith.constant 1 : index
    %c0_174 = arith.constant 0 : index
    %c0_175 = arith.constant 0 : index
    %125 = vector.load %arg4[%c0_172, %c1_173, %c0_174, %c0_175] : memref<1x3x128x128xbf16, #tpu.memory_space<vmem>>, vector<1x1x128x128xbf16>
    %126 = vector.shape_cast %125 : vector<1x1x128x128xbf16> to vector<128x128xbf16>
    %cst_176 = arith.constant dense<0.000000e+00> : vector<8x128xf32>
    %127 = tpu.matmul %124, %126, %cst_176 {dimension_numbers = #tpu.dot_dimension_numbers<[1], [0], [0], [1], [0, 0, 1, 1], [], []>} : vector<8x128xbf16>, vector<128x128xbf16>, vector<8x128xf32> -> vector<8x128xf32>
    %128 = arith.addf %122, %127 : vector<8x128xf32>
    %c0_177 = arith.constant 0 : index
    %c5_178 = arith.constant 5 : index
    %c4_179 = arith.constant 4 : index
    %c0_180 = arith.constant 0 : index
    %129 = vector.load %arg3[%c0_177, %c5_178, %c4_179, %c0_180] : memref<1x8x12x128xbf16, #tpu.memory_space<vmem>>, vector<1x1x8x128xbf16>
    %130 = vector.shape_cast %129 : vector<1x1x8x128xbf16> to vector<8x128xbf16>
    %c0_181 = arith.constant 0 : index
    %c2_182 = arith.constant 2 : index
    %c0_183 = arith.constant 0 : index
    %c0_184 = arith.constant 0 : index
    %131 = vector.load %arg4[%c0_181, %c2_182, %c0_183, %c0_184] : memref<1x3x128x128xbf16, #tpu.memory_space<vmem>>, vector<1x1x128x128xbf16>
    %132 = vector.shape_cast %131 : vector<1x1x128x128xbf16> to vector<128x128xbf16>
    %cst_185 = arith.constant dense<0.000000e+00> : vector<8x128xf32>
    %133 = tpu.matmul %130, %132, %cst_185 {dimension_numbers = #tpu.dot_dimension_numbers<[1], [0], [0], [1], [0, 0, 1, 1], [], []>} : vector<8x128xbf16>, vector<128x128xbf16>, vector<8x128xf32> -> vector<8x128xf32>
    %134 = arith.addf %128, %133 : vector<8x128xf32>
    %c5_186 = arith.constant 5 : index
    %c0_187 = arith.constant 0 : index
    %c0_188 = arith.constant 0 : index
    %135 = vector.load %arg7[%c5_186, %c0_187, %c0_188] : memref<8x8x128xf32, #tpu.memory_space<vmem>>, vector<1x8x128xf32>
    %136 = vector.shape_cast %135 : vector<1x8x128xf32> to vector<8x128xf32>
    %137 = arith.addf %136, %134 : vector<8x128xf32>
    %c5_189 = arith.constant 5 : index
    %c0_190 = arith.constant 0 : index
    %c0_191 = arith.constant 0 : index
    %138 = vector.load %arg7[%c5_189, %c0_190, %c0_191] : memref<8x8x128xf32, #tpu.memory_space<vmem>>, vector<1x8x128xf32>
    %139 = vector.shape_cast %138 : vector<1x8x128xf32> to vector<8x128xf32>
    %140 = vector.shape_cast %137 : vector<8x128xf32> to vector<1x8x128xf32>
    tpu.vector_store %arg7[%c5_189, %c0_190, %c0_191], %140 {strides = array<i32>} : memref<8x8x128xf32, #tpu.memory_space<vmem>>, vector<1x8x128xf32>,
    %c0_192 = arith.constant 0 : index
    %c6 = arith.constant 6 : index
    %c0_193 = arith.constant 0 : index
    %c0_194 = arith.constant 0 : index
    %141 = vector.load %arg3[%c0_192, %c6, %c0_193, %c0_194] : memref<1x8x12x128xbf16, #tpu.memory_space<vmem>>, vector<1x1x8x128xbf16>
    %142 = vector.shape_cast %141 : vector<1x1x8x128xbf16> to vector<8x128xbf16>
    %c0_195 = arith.constant 0 : index
    %c0_196 = arith.constant 0 : index
    %c0_197 = arith.constant 0 : index
    %c0_198 = arith.constant 0 : index
    %143 = vector.load %arg4[%c0_195, %c0_196, %c0_197, %c0_198] : memref<1x3x128x128xbf16, #tpu.memory_space<vmem>>, vector<1x1x128x128xbf16>
    %144 = vector.shape_cast %143 : vector<1x1x128x128xbf16> to vector<128x128xbf16>
    %cst_199 = arith.constant dense<0.000000e+00> : vector<8x128xf32>
    %145 = tpu.matmul %142, %144, %cst_199 {dimension_numbers = #tpu.dot_dimension_numbers<[1], [0], [0], [1], [0, 0, 1, 1], [], []>} : vector<8x128xbf16>, vector<128x128xbf16>, vector<8x128xf32> -> vector<8x128xf32>
    %c0_200 = arith.constant 0 : index
    %c6_201 = arith.constant 6 : index
    %c2_202 = arith.constant 2 : index
    %c0_203 = arith.constant 0 : index
    %146 = vector.load %arg3[%c0_200, %c6_201, %c2_202, %c0_203] : memref<1x8x12x128xbf16, #tpu.memory_space<vmem>>, vector<1x1x8x128xbf16>
    %147 = vector.shape_cast %146 : vector<1x1x8x128xbf16> to vector<8x128xbf16>
    %c0_204 = arith.constant 0 : index
    %c1_205 = arith.constant 1 : index
    %c0_206 = arith.constant 0 : index
    %c0_207 = arith.constant 0 : index
    %148 = vector.load %arg4[%c0_204, %c1_205, %c0_206, %c0_207] : memref<1x3x128x128xbf16, #tpu.memory_space<vmem>>, vector<1x1x128x128xbf16>
    %149 = vector.shape_cast %148 : vector<1x1x128x128xbf16> to vector<128x128xbf16>
    %cst_208 = arith.constant dense<0.000000e+00> : vector<8x128xf32>
    %150 = tpu.matmul %147, %149, %cst_208 {dimension_numbers = #tpu.dot_dimension_numbers<[1], [0], [0], [1], [0, 0, 1, 1], [], []>} : vector<8x128xbf16>, vector<128x128xbf16>, vector<8x128xf32> -> vector<8x128xf32>
    %151 = arith.addf %145, %150 : vector<8x128xf32>
    %c0_209 = arith.constant 0 : index
    %c6_210 = arith.constant 6 : index
    %c4_211 = arith.constant 4 : index
    %c0_212 = arith.constant 0 : index
    %152 = vector.load %arg3[%c0_209, %c6_210, %c4_211, %c0_212] : memref<1x8x12x128xbf16, #tpu.memory_space<vmem>>, vector<1x1x8x128xbf16>
    %153 = vector.shape_cast %152 : vector<1x1x8x128xbf16> to vector<8x128xbf16>
    %c0_213 = arith.constant 0 : index
    %c2_214 = arith.constant 2 : index
    %c0_215 = arith.constant 0 : index
    %c0_216 = arith.constant 0 : index
    %154 = vector.load %arg4[%c0_213, %c2_214, %c0_215, %c0_216] : memref<1x3x128x128xbf16, #tpu.memory_space<vmem>>, vector<1x1x128x128xbf16>
    %155 = vector.shape_cast %154 : vector<1x1x128x128xbf16> to vector<128x128xbf16>
    %cst_217 = arith.constant dense<0.000000e+00> : vector<8x128xf32>
    %156 = tpu.matmul %153, %155, %cst_217 {dimension_numbers = #tpu.dot_dimension_numbers<[1], [0], [0], [1], [0, 0, 1, 1], [], []>} : vector<8x128xbf16>, vector<128x128xbf16>, vector<8x128xf32> -> vector<8x128xf32>
    %157 = arith.addf %151, %156 : vector<8x128xf32>
    %c6_218 = arith.constant 6 : index
    %c0_219 = arith.constant 0 : index
    %c0_220 = arith.constant 0 : index
    %158 = vector.load %arg7[%c6_218, %c0_219, %c0_220] : memref<8x8x128xf32, #tpu.memory_space<vmem>>, vector<1x8x128xf32>
    %159 = vector.shape_cast %158 : vector<1x8x128xf32> to vector<8x128xf32>
    %160 = arith.addf %159, %157 : vector<8x128xf32>
    %c6_221 = arith.constant 6 : index
    %c0_222 = arith.constant 0 : index
    %c0_223 = arith.constant 0 : index
    %161 = vector.load %arg7[%c6_221, %c0_222, %c0_223] : memref<8x8x128xf32, #tpu.memory_space<vmem>>, vector<1x8x128xf32>
    %162 = vector.shape_cast %161 : vector<1x8x128xf32> to vector<8x128xf32>
    %163 = vector.shape_cast %160 : vector<8x128xf32> to vector<1x8x128xf32>
    tpu.vector_store %arg7[%c6_221, %c0_222, %c0_223], %163 {strides = array<i32>} : memref<8x8x128xf32, #tpu.memory_space<vmem>>, vector<1x8x128xf32>,
    %c0_224 = arith.constant 0 : index
    %c7 = arith.constant 7 : index
    %c0_225 = arith.constant 0 : index
    %c0_226 = arith.constant 0 : index
    %164 = vector.load %arg3[%c0_224, %c7, %c0_225, %c0_226] : memref<1x8x12x128xbf16, #tpu.memory_space<vmem>>, vector<1x1x8x128xbf16>
    %165 = vector.shape_cast %164 : vector<1x1x8x128xbf16> to vector<8x128xbf16>
    %c0_227 = arith.constant 0 : index
    %c0_228 = arith.constant 0 : index
    %c0_229 = arith.constant 0 : index
    %c0_230 = arith.constant 0 : index
    %166 = vector.load %arg4[%c0_227, %c0_228, %c0_229, %c0_230] : memref<1x3x128x128xbf16, #tpu.memory_space<vmem>>, vector<1x1x128x128xbf16>
    %167 = vector.shape_cast %166 : vector<1x1x128x128xbf16> to vector<128x128xbf16>
    %cst_231 = arith.constant dense<0.000000e+00> : vector<8x128xf32>
    %168 = tpu.matmul %165, %167, %cst_231 {dimension_numbers = #tpu.dot_dimension_numbers<[1], [0], [0], [1], [0, 0, 1, 1], [], []>} : vector<8x128xbf16>, vector<128x128xbf16>, vector<8x128xf32> -> vector<8x128xf32>
    %c0_232 = arith.constant 0 : index
    %c7_233 = arith.constant 7 : index
    %c2_234 = arith.constant 2 : index
    %c0_235 = arith.constant 0 : index
    %169 = vector.load %arg3[%c0_232, %c7_233, %c2_234, %c0_235] : memref<1x8x12x128xbf16, #tpu.memory_space<vmem>>, vector<1x1x8x128xbf16>
    %170 = vector.shape_cast %169 : vector<1x1x8x128xbf16> to vector<8x128xbf16>
    %c0_236 = arith.constant 0 : index
    %c1_237 = arith.constant 1 : index
    %c0_238 = arith.constant 0 : index
    %c0_239 = arith.constant 0 : index
    %171 = vector.load %arg4[%c0_236, %c1_237, %c0_238, %c0_239] : memref<1x3x128x128xbf16, #tpu.memory_space<vmem>>, vector<1x1x128x128xbf16>
    %172 = vector.shape_cast %171 : vector<1x1x128x128xbf16> to vector<128x128xbf16>
    %cst_240 = arith.constant dense<0.000000e+00> : vector<8x128xf32>
    %173 = tpu.matmul %170, %172, %cst_240 {dimension_numbers = #tpu.dot_dimension_numbers<[1], [0], [0], [1], [0, 0, 1, 1], [], []>} : vector<8x128xbf16>, vector<128x128xbf16>, vector<8x128xf32> -> vector<8x128xf32>
    %174 = arith.addf %168, %173 : vector<8x128xf32>
    %c0_241 = arith.constant 0 : index
    %c7_242 = arith.constant 7 : index
    %c4_243 = arith.constant 4 : index
    %c0_244 = arith.constant 0 : index
    %175 = vector.load %arg3[%c0_241, %c7_242, %c4_243, %c0_244] : memref<1x8x12x128xbf16, #tpu.memory_space<vmem>>, vector<1x1x8x128xbf16>
    %176 = vector.shape_cast %175 : vector<1x1x8x128xbf16> to vector<8x128xbf16>
    %c0_245 = arith.constant 0 : index
    %c2_246 = arith.constant 2 : index
    %c0_247 = arith.constant 0 : index
    %c0_248 = arith.constant 0 : index
    %177 = vector.load %arg4[%c0_245, %c2_246, %c0_247, %c0_248] : memref<1x3x128x128xbf16, #tpu.memory_space<vmem>>, vector<1x1x128x128xbf16>
    %178 = vector.shape_cast %177 : vector<1x1x128x128xbf16> to vector<128x128xbf16>
    %cst_249 = arith.constant dense<0.000000e+00> : vector<8x128xf32>
    %179 = tpu.matmul %176, %178, %cst_249 {dimension_numbers = #tpu.dot_dimension_numbers<[1], [0], [0], [1], [0, 0, 1, 1], [], []>} : vector<8x128xbf16>, vector<128x128xbf16>, vector<8x128xf32> -> vector<8x128xf32>
    %180 = arith.addf %174, %179 : vector<8x128xf32>
    %c7_250 = arith.constant 7 : index
    %c0_251 = arith.constant 0 : index
    %c0_252 = arith.constant 0 : index
    %181 = vector.load %arg7[%c7_250, %c0_251, %c0_252] : memref<8x8x128xf32, #tpu.memory_space<vmem>>, vector<1x8x128xf32>
    %182 = vector.shape_cast %181 : vector<1x8x128xf32> to vector<8x128xf32>
    %183 = arith.addf %182, %180 : vector<8x128xf32>
    %c7_253 = arith.constant 7 : index
    %c0_254 = arith.constant 0 : index
    %c0_255 = arith.constant 0 : index
    %184 = vector.load %arg7[%c7_253, %c0_254, %c0_255] : memref<8x8x128xf32, #tpu.memory_space<vmem>>, vector<1x8x128xf32>
    %185 = vector.shape_cast %184 : vector<1x8x128xf32> to vector<8x128xf32>
    %186 = vector.shape_cast %183 : vector<8x128xf32> to vector<1x8x128xf32>
    tpu.vector_store %arg7[%c7_253, %c0_254, %c0_255], %186 {strides = array<i32>} : memref<8x8x128xf32, #tpu.memory_space<vmem>>, vector<1x8x128xf32>,
    %c2_i32 = arith.constant 2 : i32
    %187 = arith.cmpi eq, %arg2, %c2_i32 : i32
    %188 = arith.extui %187 : i1 to i32
    %c0_i32_256 = arith.constant 0 : i32
    %189 = arith.cmpi ne, %188, %c0_i32_256 : i32
    scf.if %189 {
      %c0_257 = arith.constant 0 : index
      %c0_258 = arith.constant 0 : index
      %c0_259 = arith.constant 0 : index
      %190 = vector.load %arg7[%c0_257, %c0_258, %c0_259] : memref<8x8x128xf32, #tpu.memory_space<vmem>>, vector<8x8x128xf32>
      %c0_260 = arith.constant 0 : index
      %c0_261 = arith.constant 0 : index
      %191 = vector.load %arg5[%c0_260, %c0_261] : memref<1x128xf32, #tpu.memory_space<vmem>>, vector<1x128xf32>
      %192 = vector.shape_cast %191 : vector<1x128xf32> to vector<1x1x128xf32>
      %193 = vector.broadcast %192 : vector<1x1x128xf32> to vector<8x8x128xf32>
      %194 = arith.addf %190, %193 : vector<8x8x128xf32>
      %cst_262 = arith.constant 0.000000e+00 : f32
      %195 = vector.broadcast %cst_262 : f32 to vector<8x8x128xf32>
      %196 = arith.maximumf %194, %195 : vector<8x8x128xf32>
      %197 = arith.truncf %196 : vector<8x8x128xf32> to vector<8x8x128xbf16>
      %c0_263 = arith.constant 0 : index
      %c0_264 = arith.constant 0 : index
      %c0_265 = arith.constant 0 : index
      %c0_266 = arith.constant 0 : index
      %198 = vector.load %arg6[%c0_263, %c0_264, %c0_265, %c0_266] : memref<1x8x8x128xbf16, #tpu.memory_space<vmem>>, vector<1x8x8x128xbf16>
      %199 = vector.shape_cast %198 : vector<1x8x8x128xbf16> to vector<8x8x128xbf16>
      %200 = vector.shape_cast %197 : vector<8x8x128xbf16> to vector<1x8x8x128xbf16>
      tpu.vector_store %arg6[%c0_263, %c0_264, %c0_265, %c0_266], %200 {strides = array<i32>} : memref<1x8x8x128xbf16, #tpu.memory_space<vmem>>, vector<1x8x8x128xbf16>,
    } else {
    }
    return
  }
  func.func @transform_0(%arg0: i32, %arg1: i32, %arg2: i32) -> (i32, i32, i32, i32) {
    %c2_i32 = arith.constant 2 : i32
    %0 = arith.muli %arg2, %c2_i32 : i32
    %1 = arith.addi %0, %arg0 : i32
    %c0_i32 = arith.constant 0 : i32
    %c0_i32_0 = arith.constant 0 : i32
    %c0_i32_1 = arith.constant 0 : i32
    return %1, %arg1, %c0_i32, %c0_i32_0 : i32, i32, i32, i32
  }
  func.func @transform_1(%arg0: i32, %arg1: i32, %arg2: i32) -> (i32, i32, i32, i32) {
    %c0_i32 = arith.constant 0 : i32
    %c0_i32_0 = arith.constant 0 : i32
    %c0_i32_1 = arith.constant 0 : i32
    %c0_i32_2 = arith.constant 0 : i32
    return %arg2, %c0_i32, %c0_i32_0, %c0_i32_1 : i32, i32, i32, i32
  }
  func.func @transform_2(%arg0: i32, %arg1: i32, %arg2: i32) -> (i32, i32) {
    %c0_i32 = arith.constant 0 : i32
    %c0_i32_0 = arith.constant 0 : i32
    %c0_i32_1 = arith.constant 0 : i32
    return %c0_i32, %c0_i32_0 : i32, i32
  }
  func.func @transform_3(%arg0: i32, %arg1: i32, %arg2: i32) -> (i32, i32, i32, i32) {
    %c0_i32 = arith.constant 0 : i32
    %c0_i32_0 = arith.constant 0 : i32
    %c0_i32_1 = arith.constant 0 : i32
    return %arg0, %arg1, %c0_i32, %c0_i32_0 : i32, i32, i32, i32
  }
}

module attributes {stable_mosaic.version = 11 : i64} {
  func.func @_pool_kernel(%arg0: i32, %arg1: memref<4x2x4x256xbf16, #tpu.memory_space<vmem>>, %arg2: memref<4x4x128xbf16, #tpu.memory_space<vmem>>) attributes {dimension_semantics = [#tpu.dimension_semantics<parallel>], iteration_bounds = array<i64: 2>, scalar_prefetch = 0 : i64, scratch_operands = 0 : i64, tpu.core_type = #tpu.core_type<tc>, window_params = [{transform_indices = @transform_0, window_bounds = array<i64: 4, 2, 4, 256>}, {transform_indices = @transform_1, window_bounds = array<i64: 4, 4, 128>}]} {
    %c0 = arith.constant 0 : index
    %c0_0 = arith.constant 0 : index
    %c0_1 = arith.constant 0 : index
    %c0_2 = arith.constant 0 : index
    %0 = vector.load %arg1[%c0, %c0_0, %c0_1, %c0_2] : memref<4x2x4x256xbf16, #tpu.memory_space<vmem>>, vector<4x2x4x256xbf16>
    %1 = arith.extf %0 : vector<4x2x4x256xbf16> to vector<4x2x4x256xf32>
    %2 = vector.extract_strided_slice %1 {offsets = [0, 0, 0, 0], sizes = [4, 1, 4, 256], strides = [1, 1, 1, 1]} : vector<4x2x4x256xf32> to vector<4x1x4x256xf32>
    %3 = vector.shape_cast %2 : vector<4x1x4x256xf32> to vector<4x4x256xf32>
    %4 = vector.extract_strided_slice %1 {offsets = [0, 1, 0, 0], sizes = [4, 1, 4, 256], strides = [1, 1, 1, 1]} : vector<4x2x4x256xf32> to vector<4x1x4x256xf32>
    %5 = vector.shape_cast %4 : vector<4x1x4x256xf32> to vector<4x4x256xf32>
    %6 = arith.addf %3, %5 : vector<4x4x256xf32>
    %7 = vector.extract_strided_slice %6 {offsets = [0, 0, 0], sizes = [4, 4, 128], strides = [1, 1, 1]} : vector<4x4x256xf32> to vector<4x4x128xf32>
    %8 = vector.extract_strided_slice %6 {offsets = [0, 0, 128], sizes = [4, 4, 128], strides = [1, 1, 1]} : vector<4x4x256xf32> to vector<4x4x128xf32>
    %9 = arith.addf %7, %8 : vector<4x4x128xf32>
    %cst = arith.constant 2.500000e-01 : f32
    %10 = vector.broadcast %cst : f32 to vector<4x4x128xf32>
    %11 = arith.mulf %9, %10 : vector<4x4x128xf32>
    %12 = arith.truncf %11 : vector<4x4x128xf32> to vector<4x4x128xbf16>
    %c0_3 = arith.constant 0 : index
    %c0_4 = arith.constant 0 : index
    %c0_5 = arith.constant 0 : index
    %13 = vector.load %arg2[%c0_3, %c0_4, %c0_5] : memref<4x4x128xbf16, #tpu.memory_space<vmem>>, vector<4x4x128xbf16>
    tpu.vector_store %arg2[%c0_3, %c0_4, %c0_5], %12 {strides = array<i32>} : memref<4x4x128xbf16, #tpu.memory_space<vmem>>, vector<4x4x128xbf16>,
    return
  }
  func.func @transform_0(%arg0: i32) -> (i32, i32, i32, i32) {
    %c0_i32 = arith.constant 0 : i32
    %c0_i32_0 = arith.constant 0 : i32
    %c0_i32_1 = arith.constant 0 : i32
    %c0_i32_2 = arith.constant 0 : i32
    return %arg0, %c0_i32, %c0_i32_0, %c0_i32_1 : i32, i32, i32, i32
  }
  func.func @transform_1(%arg0: i32) -> (i32, i32, i32) {
    %c0_i32 = arith.constant 0 : i32
    %c0_i32_0 = arith.constant 0 : i32
    %c0_i32_1 = arith.constant 0 : i32
    return %arg0, %c0_i32, %c0_i32_0 : i32, i32, i32
  }
}

module attributes {stable_mosaic.version = 11 : i64} {
  func.func @_conv_tap_kernel(%arg0: i32, %arg1: i32, %arg2: i32, %arg3: memref<1x4x8x128xbf16, #tpu.memory_space<vmem>>, %arg4: memref<1x3x128x128xbf16, #tpu.memory_space<vmem>>, %arg5: memref<1x128xf32, #tpu.memory_space<vmem>>, %arg6: memref<1x4x4x128xbf16, #tpu.memory_space<vmem>>, %arg7: memref<4x4x128xf32, #tpu.memory_space<vmem>>) attributes {dimension_semantics = [#tpu.dimension_semantics<parallel>, #tpu.dimension_semantics<parallel>, #tpu.dimension_semantics<arbitrary>], iteration_bounds = array<i64: 2, 1, 3>, scalar_prefetch = 0 : i64, scratch_operands = 1 : i64, tpu.core_type = #tpu.core_type<tc>, window_params = [{transform_indices = @transform_0, window_bounds = array<i64: 1, 4, 8, 128>}, {transform_indices = @transform_1, window_bounds = array<i64: 1, 3, 128, 128>}, {pipeline_mode = #tpu.pipeline_mode<synchronous>, transform_indices = @transform_2, window_bounds = array<i64: 1, 128>}, {transform_indices = @transform_3, window_bounds = array<i64: 1, 4, 4, 128>}]} {
    %c0_i32 = arith.constant 0 : i32
    %0 = arith.cmpi eq, %arg2, %c0_i32 : i32
    %1 = arith.extui %0 : i1 to i32
    %c0_i32_0 = arith.constant 0 : i32
    %2 = arith.cmpi ne, %1, %c0_i32_0 : i32
    scf.if %2 {
      %cst_128 = arith.constant 0.000000e+00 : f32
      %98 = vector.broadcast %cst_128 : f32 to vector<4x4x128xf32>
      %c0_129 = arith.constant 0 : index
      %c0_130 = arith.constant 0 : index
      %c0_131 = arith.constant 0 : index
      %99 = vector.load %arg7[%c0_129, %c0_130, %c0_131] : memref<4x4x128xf32, #tpu.memory_space<vmem>>, vector<4x4x128xf32>
      tpu.vector_store %arg7[%c0_129, %c0_130, %c0_131], %98 {strides = array<i32>} : memref<4x4x128xf32, #tpu.memory_space<vmem>>, vector<4x4x128xf32>,
    } else {
    }
    %c0 = arith.constant 0 : index
    %c0_1 = arith.constant 0 : index
    %c0_2 = arith.constant 0 : index
    %c0_3 = arith.constant 0 : index
    %3 = vector.load %arg3[%c0, %c0_1, %c0_2, %c0_3] : memref<1x4x8x128xbf16, #tpu.memory_space<vmem>>, vector<1x1x4x128xbf16>
    %4 = vector.shape_cast %3 : vector<1x1x4x128xbf16> to vector<4x128xbf16>
    %c0_4 = arith.constant 0 : index
    %c0_5 = arith.constant 0 : index
    %c0_6 = arith.constant 0 : index
    %c0_7 = arith.constant 0 : index
    %5 = vector.load %arg4[%c0_4, %c0_5, %c0_6, %c0_7] : memref<1x3x128x128xbf16, #tpu.memory_space<vmem>>, vector<1x1x128x128xbf16>
    %6 = vector.shape_cast %5 : vector<1x1x128x128xbf16> to vector<128x128xbf16>
    %cst = arith.constant dense<0.000000e+00> : vector<4x128xf32>
    %7 = tpu.matmul %4, %6, %cst {dimension_numbers = #tpu.dot_dimension_numbers<[1], [0], [0], [1], [0, 0, 1, 1], [], []>} : vector<4x128xbf16>, vector<128x128xbf16>, vector<4x128xf32> -> vector<4x128xf32>
    %c0_8 = arith.constant 0 : index
    %c0_9 = arith.constant 0 : index
    %c2 = arith.constant 2 : index
    %c0_10 = arith.constant 0 : index
    %8 = vector.load %arg3[%c0_8, %c0_9, %c2, %c0_10] : memref<1x4x8x128xbf16, #tpu.memory_space<vmem>>, vector<1x1x4x128xbf16>
    %9 = vector.shape_cast %8 : vector<1x1x4x128xbf16> to vector<4x128xbf16>
    %c0_11 = arith.constant 0 : index
    %c1 = arith.constant 1 : index
    %c0_12 = arith.constant 0 : index
    %c0_13 = arith.constant 0 : index
    %10 = vector.load %arg4[%c0_11, %c1, %c0_12, %c0_13] : memref<1x3x128x128xbf16, #tpu.memory_space<vmem>>, vector<1x1x128x128xbf16>
    %11 = vector.shape_cast %10 : vector<1x1x128x128xbf16> to vector<128x128xbf16>
    %cst_14 = arith.constant dense<0.000000e+00> : vector<4x128xf32>
    %12 = tpu.matmul %9, %11, %cst_14 {dimension_numbers = #tpu.dot_dimension_numbers<[1], [0], [0], [1], [0, 0, 1, 1], [], []>} : vector<4x128xbf16>, vector<128x128xbf16>, vector<4x128xf32> -> vector<4x128xf32>
    %13 = arith.addf %7, %12 : vector<4x128xf32>
    %c0_15 = arith.constant 0 : index
    %c0_16 = arith.constant 0 : index
    %c4 = arith.constant 4 : index
    %c0_17 = arith.constant 0 : index
    %14 = vector.load %arg3[%c0_15, %c0_16, %c4, %c0_17] : memref<1x4x8x128xbf16, #tpu.memory_space<vmem>>, vector<1x1x4x128xbf16>
    %15 = vector.shape_cast %14 : vector<1x1x4x128xbf16> to vector<4x128xbf16>
    %c0_18 = arith.constant 0 : index
    %c2_19 = arith.constant 2 : index
    %c0_20 = arith.constant 0 : index
    %c0_21 = arith.constant 0 : index
    %16 = vector.load %arg4[%c0_18, %c2_19, %c0_20, %c0_21] : memref<1x3x128x128xbf16, #tpu.memory_space<vmem>>, vector<1x1x128x128xbf16>
    %17 = vector.shape_cast %16 : vector<1x1x128x128xbf16> to vector<128x128xbf16>
    %cst_22 = arith.constant dense<0.000000e+00> : vector<4x128xf32>
    %18 = tpu.matmul %15, %17, %cst_22 {dimension_numbers = #tpu.dot_dimension_numbers<[1], [0], [0], [1], [0, 0, 1, 1], [], []>} : vector<4x128xbf16>, vector<128x128xbf16>, vector<4x128xf32> -> vector<4x128xf32>
    %19 = arith.addf %13, %18 : vector<4x128xf32>
    %c0_23 = arith.constant 0 : index
    %c0_24 = arith.constant 0 : index
    %c0_25 = arith.constant 0 : index
    %20 = vector.load %arg7[%c0_23, %c0_24, %c0_25] : memref<4x4x128xf32, #tpu.memory_space<vmem>>, vector<1x4x128xf32>
    %21 = vector.shape_cast %20 : vector<1x4x128xf32> to vector<4x128xf32>
    %22 = arith.addf %21, %19 : vector<4x128xf32>
    %c0_26 = arith.constant 0 : index
    %c0_27 = arith.constant 0 : index
    %c0_28 = arith.constant 0 : index
    %23 = vector.load %arg7[%c0_26, %c0_27, %c0_28] : memref<4x4x128xf32, #tpu.memory_space<vmem>>, vector<1x4x128xf32>
    %24 = vector.shape_cast %23 : vector<1x4x128xf32> to vector<4x128xf32>
    %25 = vector.shape_cast %22 : vector<4x128xf32> to vector<1x4x128xf32>
    tpu.vector_store %arg7[%c0_26, %c0_27, %c0_28], %25 {strides = array<i32>} : memref<4x4x128xf32, #tpu.memory_space<vmem>>, vector<1x4x128xf32>,
    %c0_29 = arith.constant 0 : index
    %c1_30 = arith.constant 1 : index
    %c0_31 = arith.constant 0 : index
    %c0_32 = arith.constant 0 : index
    %26 = vector.load %arg3[%c0_29, %c1_30, %c0_31, %c0_32] : memref<1x4x8x128xbf16, #tpu.memory_space<vmem>>, vector<1x1x4x128xbf16>
    %27 = vector.shape_cast %26 : vector<1x1x4x128xbf16> to vector<4x128xbf16>
    %c0_33 = arith.constant 0 : index
    %c0_34 = arith.constant 0 : index
    %c0_35 = arith.constant 0 : index
    %c0_36 = arith.constant 0 : index
    %28 = vector.load %arg4[%c0_33, %c0_34, %c0_35, %c0_36] : memref<1x3x128x128xbf16, #tpu.memory_space<vmem>>, vector<1x1x128x128xbf16>
    %29 = vector.shape_cast %28 : vector<1x1x128x128xbf16> to vector<128x128xbf16>
    %cst_37 = arith.constant dense<0.000000e+00> : vector<4x128xf32>
    %30 = tpu.matmul %27, %29, %cst_37 {dimension_numbers = #tpu.dot_dimension_numbers<[1], [0], [0], [1], [0, 0, 1, 1], [], []>} : vector<4x128xbf16>, vector<128x128xbf16>, vector<4x128xf32> -> vector<4x128xf32>
    %c0_38 = arith.constant 0 : index
    %c1_39 = arith.constant 1 : index
    %c2_40 = arith.constant 2 : index
    %c0_41 = arith.constant 0 : index
    %31 = vector.load %arg3[%c0_38, %c1_39, %c2_40, %c0_41] : memref<1x4x8x128xbf16, #tpu.memory_space<vmem>>, vector<1x1x4x128xbf16>
    %32 = vector.shape_cast %31 : vector<1x1x4x128xbf16> to vector<4x128xbf16>
    %c0_42 = arith.constant 0 : index
    %c1_43 = arith.constant 1 : index
    %c0_44 = arith.constant 0 : index
    %c0_45 = arith.constant 0 : index
    %33 = vector.load %arg4[%c0_42, %c1_43, %c0_44, %c0_45] : memref<1x3x128x128xbf16, #tpu.memory_space<vmem>>, vector<1x1x128x128xbf16>
    %34 = vector.shape_cast %33 : vector<1x1x128x128xbf16> to vector<128x128xbf16>
    %cst_46 = arith.constant dense<0.000000e+00> : vector<4x128xf32>
    %35 = tpu.matmul %32, %34, %cst_46 {dimension_numbers = #tpu.dot_dimension_numbers<[1], [0], [0], [1], [0, 0, 1, 1], [], []>} : vector<4x128xbf16>, vector<128x128xbf16>, vector<4x128xf32> -> vector<4x128xf32>
    %36 = arith.addf %30, %35 : vector<4x128xf32>
    %c0_47 = arith.constant 0 : index
    %c1_48 = arith.constant 1 : index
    %c4_49 = arith.constant 4 : index
    %c0_50 = arith.constant 0 : index
    %37 = vector.load %arg3[%c0_47, %c1_48, %c4_49, %c0_50] : memref<1x4x8x128xbf16, #tpu.memory_space<vmem>>, vector<1x1x4x128xbf16>
    %38 = vector.shape_cast %37 : vector<1x1x4x128xbf16> to vector<4x128xbf16>
    %c0_51 = arith.constant 0 : index
    %c2_52 = arith.constant 2 : index
    %c0_53 = arith.constant 0 : index
    %c0_54 = arith.constant 0 : index
    %39 = vector.load %arg4[%c0_51, %c2_52, %c0_53, %c0_54] : memref<1x3x128x128xbf16, #tpu.memory_space<vmem>>, vector<1x1x128x128xbf16>
    %40 = vector.shape_cast %39 : vector<1x1x128x128xbf16> to vector<128x128xbf16>
    %cst_55 = arith.constant dense<0.000000e+00> : vector<4x128xf32>
    %41 = tpu.matmul %38, %40, %cst_55 {dimension_numbers = #tpu.dot_dimension_numbers<[1], [0], [0], [1], [0, 0, 1, 1], [], []>} : vector<4x128xbf16>, vector<128x128xbf16>, vector<4x128xf32> -> vector<4x128xf32>
    %42 = arith.addf %36, %41 : vector<4x128xf32>
    %c1_56 = arith.constant 1 : index
    %c0_57 = arith.constant 0 : index
    %c0_58 = arith.constant 0 : index
    %43 = vector.load %arg7[%c1_56, %c0_57, %c0_58] : memref<4x4x128xf32, #tpu.memory_space<vmem>>, vector<1x4x128xf32>
    %44 = vector.shape_cast %43 : vector<1x4x128xf32> to vector<4x128xf32>
    %45 = arith.addf %44, %42 : vector<4x128xf32>
    %c1_59 = arith.constant 1 : index
    %c0_60 = arith.constant 0 : index
    %c0_61 = arith.constant 0 : index
    %46 = vector.load %arg7[%c1_59, %c0_60, %c0_61] : memref<4x4x128xf32, #tpu.memory_space<vmem>>, vector<1x4x128xf32>
    %47 = vector.shape_cast %46 : vector<1x4x128xf32> to vector<4x128xf32>
    %48 = vector.shape_cast %45 : vector<4x128xf32> to vector<1x4x128xf32>
    tpu.vector_store %arg7[%c1_59, %c0_60, %c0_61], %48 {strides = array<i32>} : memref<4x4x128xf32, #tpu.memory_space<vmem>>, vector<1x4x128xf32>,
    %c0_62 = arith.constant 0 : index
    %c2_63 = arith.constant 2 : index
    %c0_64 = arith.constant 0 : index
    %c0_65 = arith.constant 0 : index
    %49 = vector.load %arg3[%c0_62, %c2_63, %c0_64, %c0_65] : memref<1x4x8x128xbf16, #tpu.memory_space<vmem>>, vector<1x1x4x128xbf16>
    %50 = vector.shape_cast %49 : vector<1x1x4x128xbf16> to vector<4x128xbf16>
    %c0_66 = arith.constant 0 : index
    %c0_67 = arith.constant 0 : index
    %c0_68 = arith.constant 0 : index
    %c0_69 = arith.constant 0 : index
    %51 = vector.load %arg4[%c0_66, %c0_67, %c0_68, %c0_69] : memref<1x3x128x128xbf16, #tpu.memory_space<vmem>>, vector<1x1x128x128xbf16>
    %52 = vector.shape_cast %51 : vector<1x1x128x128xbf16> to vector<128x128xbf16>
    %cst_70 = arith.constant dense<0.000000e+00> : vector<4x128xf32>
    %53 = tpu.matmul %50, %52, %cst_70 {dimension_numbers = #tpu.dot_dimension_numbers<[1], [0], [0], [1], [0, 0, 1, 1], [], []>} : vector<4x128xbf16>, vector<128x128xbf16>, vector<4x128xf32> -> vector<4x128xf32>
    %c0_71 = arith.constant 0 : index
    %c2_72 = arith.constant 2 : index
    %c2_73 = arith.constant 2 : index
    %c0_74 = arith.constant 0 : index
    %54 = vector.load %arg3[%c0_71, %c2_72, %c2_73, %c0_74] : memref<1x4x8x128xbf16, #tpu.memory_space<vmem>>, vector<1x1x4x128xbf16>
    %55 = vector.shape_cast %54 : vector<1x1x4x128xbf16> to vector<4x128xbf16>
    %c0_75 = arith.constant 0 : index
    %c1_76 = arith.constant 1 : index
    %c0_77 = arith.constant 0 : index
    %c0_78 = arith.constant 0 : index
    %56 = vector.load %arg4[%c0_75, %c1_76, %c0_77, %c0_78] : memref<1x3x128x128xbf16, #tpu.memory_space<vmem>>, vector<1x1x128x128xbf16>
    %57 = vector.shape_cast %56 : vector<1x1x128x128xbf16> to vector<128x128xbf16>
    %cst_79 = arith.constant dense<0.000000e+00> : vector<4x128xf32>
    %58 = tpu.matmul %55, %57, %cst_79 {dimension_numbers = #tpu.dot_dimension_numbers<[1], [0], [0], [1], [0, 0, 1, 1], [], []>} : vector<4x128xbf16>, vector<128x128xbf16>, vector<4x128xf32> -> vector<4x128xf32>
    %59 = arith.addf %53, %58 : vector<4x128xf32>
    %c0_80 = arith.constant 0 : index
    %c2_81 = arith.constant 2 : index
    %c4_82 = arith.constant 4 : index
    %c0_83 = arith.constant 0 : index
    %60 = vector.load %arg3[%c0_80, %c2_81, %c4_82, %c0_83] : memref<1x4x8x128xbf16, #tpu.memory_space<vmem>>, vector<1x1x4x128xbf16>
    %61 = vector.shape_cast %60 : vector<1x1x4x128xbf16> to vector<4x128xbf16>
    %c0_84 = arith.constant 0 : index
    %c2_85 = arith.constant 2 : index
    %c0_86 = arith.constant 0 : index
    %c0_87 = arith.constant 0 : index
    %62 = vector.load %arg4[%c0_84, %c2_85, %c0_86, %c0_87] : memref<1x3x128x128xbf16, #tpu.memory_space<vmem>>, vector<1x1x128x128xbf16>
    %63 = vector.shape_cast %62 : vector<1x1x128x128xbf16> to vector<128x128xbf16>
    %cst_88 = arith.constant dense<0.000000e+00> : vector<4x128xf32>
    %64 = tpu.matmul %61, %63, %cst_88 {dimension_numbers = #tpu.dot_dimension_numbers<[1], [0], [0], [1], [0, 0, 1, 1], [], []>} : vector<4x128xbf16>, vector<128x128xbf16>, vector<4x128xf32> -> vector<4x128xf32>
    %65 = arith.addf %59, %64 : vector<4x128xf32>
    %c2_89 = arith.constant 2 : index
    %c0_90 = arith.constant 0 : index
    %c0_91 = arith.constant 0 : index
    %66 = vector.load %arg7[%c2_89, %c0_90, %c0_91] : memref<4x4x128xf32, #tpu.memory_space<vmem>>, vector<1x4x128xf32>
    %67 = vector.shape_cast %66 : vector<1x4x128xf32> to vector<4x128xf32>
    %68 = arith.addf %67, %65 : vector<4x128xf32>
    %c2_92 = arith.constant 2 : index
    %c0_93 = arith.constant 0 : index
    %c0_94 = arith.constant 0 : index
    %69 = vector.load %arg7[%c2_92, %c0_93, %c0_94] : memref<4x4x128xf32, #tpu.memory_space<vmem>>, vector<1x4x128xf32>
    %70 = vector.shape_cast %69 : vector<1x4x128xf32> to vector<4x128xf32>
    %71 = vector.shape_cast %68 : vector<4x128xf32> to vector<1x4x128xf32>
    tpu.vector_store %arg7[%c2_92, %c0_93, %c0_94], %71 {strides = array<i32>} : memref<4x4x128xf32, #tpu.memory_space<vmem>>, vector<1x4x128xf32>,
    %c0_95 = arith.constant 0 : index
    %c3 = arith.constant 3 : index
    %c0_96 = arith.constant 0 : index
    %c0_97 = arith.constant 0 : index
    %72 = vector.load %arg3[%c0_95, %c3, %c0_96, %c0_97] : memref<1x4x8x128xbf16, #tpu.memory_space<vmem>>, vector<1x1x4x128xbf16>
    %73 = vector.shape_cast %72 : vector<1x1x4x128xbf16> to vector<4x128xbf16>
    %c0_98 = arith.constant 0 : index
    %c0_99 = arith.constant 0 : index
    %c0_100 = arith.constant 0 : index
    %c0_101 = arith.constant 0 : index
    %74 = vector.load %arg4[%c0_98, %c0_99, %c0_100, %c0_101] : memref<1x3x128x128xbf16, #tpu.memory_space<vmem>>, vector<1x1x128x128xbf16>
    %75 = vector.shape_cast %74 : vector<1x1x128x128xbf16> to vector<128x128xbf16>
    %cst_102 = arith.constant dense<0.000000e+00> : vector<4x128xf32>
    %76 = tpu.matmul %73, %75, %cst_102 {dimension_numbers = #tpu.dot_dimension_numbers<[1], [0], [0], [1], [0, 0, 1, 1], [], []>} : vector<4x128xbf16>, vector<128x128xbf16>, vector<4x128xf32> -> vector<4x128xf32>
    %c0_103 = arith.constant 0 : index
    %c3_104 = arith.constant 3 : index
    %c2_105 = arith.constant 2 : index
    %c0_106 = arith.constant 0 : index
    %77 = vector.load %arg3[%c0_103, %c3_104, %c2_105, %c0_106] : memref<1x4x8x128xbf16, #tpu.memory_space<vmem>>, vector<1x1x4x128xbf16>
    %78 = vector.shape_cast %77 : vector<1x1x4x128xbf16> to vector<4x128xbf16>
    %c0_107 = arith.constant 0 : index
    %c1_108 = arith.constant 1 : index
    %c0_109 = arith.constant 0 : index
    %c0_110 = arith.constant 0 : index
    %79 = vector.load %arg4[%c0_107, %c1_108, %c0_109, %c0_110] : memref<1x3x128x128xbf16, #tpu.memory_space<vmem>>, vector<1x1x128x128xbf16>
    %80 = vector.shape_cast %79 : vector<1x1x128x128xbf16> to vector<128x128xbf16>
    %cst_111 = arith.constant dense<0.000000e+00> : vector<4x128xf32>
    %81 = tpu.matmul %78, %80, %cst_111 {dimension_numbers = #tpu.dot_dimension_numbers<[1], [0], [0], [1], [0, 0, 1, 1], [], []>} : vector<4x128xbf16>, vector<128x128xbf16>, vector<4x128xf32> -> vector<4x128xf32>
    %82 = arith.addf %76, %81 : vector<4x128xf32>
    %c0_112 = arith.constant 0 : index
    %c3_113 = arith.constant 3 : index
    %c4_114 = arith.constant 4 : index
    %c0_115 = arith.constant 0 : index
    %83 = vector.load %arg3[%c0_112, %c3_113, %c4_114, %c0_115] : memref<1x4x8x128xbf16, #tpu.memory_space<vmem>>, vector<1x1x4x128xbf16>
    %84 = vector.shape_cast %83 : vector<1x1x4x128xbf16> to vector<4x128xbf16>
    %c0_116 = arith.constant 0 : index
    %c2_117 = arith.constant 2 : index
    %c0_118 = arith.constant 0 : index
    %c0_119 = arith.constant 0 : index
    %85 = vector.load %arg4[%c0_116, %c2_117, %c0_118, %c0_119] : memref<1x3x128x128xbf16, #tpu.memory_space<vmem>>, vector<1x1x128x128xbf16>
    %86 = vector.shape_cast %85 : vector<1x1x128x128xbf16> to vector<128x128xbf16>
    %cst_120 = arith.constant dense<0.000000e+00> : vector<4x128xf32>
    %87 = tpu.matmul %84, %86, %cst_120 {dimension_numbers = #tpu.dot_dimension_numbers<[1], [0], [0], [1], [0, 0, 1, 1], [], []>} : vector<4x128xbf16>, vector<128x128xbf16>, vector<4x128xf32> -> vector<4x128xf32>
    %88 = arith.addf %82, %87 : vector<4x128xf32>
    %c3_121 = arith.constant 3 : index
    %c0_122 = arith.constant 0 : index
    %c0_123 = arith.constant 0 : index
    %89 = vector.load %arg7[%c3_121, %c0_122, %c0_123] : memref<4x4x128xf32, #tpu.memory_space<vmem>>, vector<1x4x128xf32>
    %90 = vector.shape_cast %89 : vector<1x4x128xf32> to vector<4x128xf32>
    %91 = arith.addf %90, %88 : vector<4x128xf32>
    %c3_124 = arith.constant 3 : index
    %c0_125 = arith.constant 0 : index
    %c0_126 = arith.constant 0 : index
    %92 = vector.load %arg7[%c3_124, %c0_125, %c0_126] : memref<4x4x128xf32, #tpu.memory_space<vmem>>, vector<1x4x128xf32>
    %93 = vector.shape_cast %92 : vector<1x4x128xf32> to vector<4x128xf32>
    %94 = vector.shape_cast %91 : vector<4x128xf32> to vector<1x4x128xf32>
    tpu.vector_store %arg7[%c3_124, %c0_125, %c0_126], %94 {strides = array<i32>} : memref<4x4x128xf32, #tpu.memory_space<vmem>>, vector<1x4x128xf32>,
    %c2_i32 = arith.constant 2 : i32
    %95 = arith.cmpi eq, %arg2, %c2_i32 : i32
    %96 = arith.extui %95 : i1 to i32
    %c0_i32_127 = arith.constant 0 : i32
    %97 = arith.cmpi ne, %96, %c0_i32_127 : i32
    scf.if %97 {
      %c0_128 = arith.constant 0 : index
      %c0_129 = arith.constant 0 : index
      %c0_130 = arith.constant 0 : index
      %98 = vector.load %arg7[%c0_128, %c0_129, %c0_130] : memref<4x4x128xf32, #tpu.memory_space<vmem>>, vector<4x4x128xf32>
      %c0_131 = arith.constant 0 : index
      %c0_132 = arith.constant 0 : index
      %99 = vector.load %arg5[%c0_131, %c0_132] : memref<1x128xf32, #tpu.memory_space<vmem>>, vector<1x128xf32>
      %100 = vector.shape_cast %99 : vector<1x128xf32> to vector<1x1x128xf32>
      %101 = vector.broadcast %100 : vector<1x1x128xf32> to vector<4x4x128xf32>
      %102 = arith.addf %98, %101 : vector<4x4x128xf32>
      %cst_133 = arith.constant 0.000000e+00 : f32
      %103 = vector.broadcast %cst_133 : f32 to vector<4x4x128xf32>
      %104 = arith.maximumf %102, %103 : vector<4x4x128xf32>
      %105 = arith.truncf %104 : vector<4x4x128xf32> to vector<4x4x128xbf16>
      %c0_134 = arith.constant 0 : index
      %c0_135 = arith.constant 0 : index
      %c0_136 = arith.constant 0 : index
      %c0_137 = arith.constant 0 : index
      %106 = vector.load %arg6[%c0_134, %c0_135, %c0_136, %c0_137] : memref<1x4x4x128xbf16, #tpu.memory_space<vmem>>, vector<1x4x4x128xbf16>
      %107 = vector.shape_cast %106 : vector<1x4x4x128xbf16> to vector<4x4x128xbf16>
      %108 = vector.shape_cast %105 : vector<4x4x128xbf16> to vector<1x4x4x128xbf16>
      tpu.vector_store %arg6[%c0_134, %c0_135, %c0_136, %c0_137], %108 {strides = array<i32>} : memref<1x4x4x128xbf16, #tpu.memory_space<vmem>>, vector<1x4x4x128xbf16>,
    } else {
    }
    return
  }
  func.func @transform_0(%arg0: i32, %arg1: i32, %arg2: i32) -> (i32, i32, i32, i32) {
    %c2_i32 = arith.constant 2 : i32
    %0 = arith.muli %arg2, %c2_i32 : i32
    %1 = arith.addi %0, %arg0 : i32
    %c0_i32 = arith.constant 0 : i32
    %c0_i32_0 = arith.constant 0 : i32
    %c0_i32_1 = arith.constant 0 : i32
    return %1, %arg1, %c0_i32, %c0_i32_0 : i32, i32, i32, i32
  }
  func.func @transform_1(%arg0: i32, %arg1: i32, %arg2: i32) -> (i32, i32, i32, i32) {
    %c0_i32 = arith.constant 0 : i32
    %c0_i32_0 = arith.constant 0 : i32
    %c0_i32_1 = arith.constant 0 : i32
    %c0_i32_2 = arith.constant 0 : i32
    return %arg2, %c0_i32, %c0_i32_0, %c0_i32_1 : i32, i32, i32, i32
  }
  func.func @transform_2(%arg0: i32, %arg1: i32, %arg2: i32) -> (i32, i32) {
    %c0_i32 = arith.constant 0 : i32
    %c0_i32_0 = arith.constant 0 : i32
    %c0_i32_1 = arith.constant 0 : i32
    return %c0_i32, %c0_i32_0 : i32, i32
  }
  func.func @transform_3(%arg0: i32, %arg1: i32, %arg2: i32) -> (i32, i32, i32, i32) {
    %c0_i32 = arith.constant 0 : i32
    %c0_i32_0 = arith.constant 0 : i32
    %c0_i32_1 = arith.constant 0 : i32
    return %arg0, %arg1, %c0_i32, %c0_i32_0 : i32, i32, i32, i32
  }
}

module attributes {stable_mosaic.version = 11 : i64} {
  func.func @_pool_kernel(%arg0: i32, %arg1: memref<2x2x2x256xbf16, #tpu.memory_space<vmem>>, %arg2: memref<2x2x128xbf16, #tpu.memory_space<vmem>>) attributes {dimension_semantics = [#tpu.dimension_semantics<parallel>], iteration_bounds = array<i64: 2>, scalar_prefetch = 0 : i64, scratch_operands = 0 : i64, tpu.core_type = #tpu.core_type<tc>, window_params = [{transform_indices = @transform_0, window_bounds = array<i64: 2, 2, 2, 256>}, {transform_indices = @transform_1, window_bounds = array<i64: 2, 2, 128>}]} {
    %c0 = arith.constant 0 : index
    %c0_0 = arith.constant 0 : index
    %c0_1 = arith.constant 0 : index
    %c0_2 = arith.constant 0 : index
    %0 = vector.load %arg1[%c0, %c0_0, %c0_1, %c0_2] : memref<2x2x2x256xbf16, #tpu.memory_space<vmem>>, vector<2x2x2x256xbf16>
    %1 = arith.extf %0 : vector<2x2x2x256xbf16> to vector<2x2x2x256xf32>
    %2 = vector.extract_strided_slice %1 {offsets = [0, 0, 0, 0], sizes = [2, 1, 2, 256], strides = [1, 1, 1, 1]} : vector<2x2x2x256xf32> to vector<2x1x2x256xf32>
    %3 = vector.shape_cast %2 : vector<2x1x2x256xf32> to vector<2x2x256xf32>
    %4 = vector.extract_strided_slice %1 {offsets = [0, 1, 0, 0], sizes = [2, 1, 2, 256], strides = [1, 1, 1, 1]} : vector<2x2x2x256xf32> to vector<2x1x2x256xf32>
    %5 = vector.shape_cast %4 : vector<2x1x2x256xf32> to vector<2x2x256xf32>
    %6 = arith.addf %3, %5 : vector<2x2x256xf32>
    %7 = vector.extract_strided_slice %6 {offsets = [0, 0, 0], sizes = [2, 2, 128], strides = [1, 1, 1]} : vector<2x2x256xf32> to vector<2x2x128xf32>
    %8 = vector.extract_strided_slice %6 {offsets = [0, 0, 128], sizes = [2, 2, 128], strides = [1, 1, 1]} : vector<2x2x256xf32> to vector<2x2x128xf32>
    %9 = arith.addf %7, %8 : vector<2x2x128xf32>
    %cst = arith.constant 2.500000e-01 : f32
    %10 = vector.broadcast %cst : f32 to vector<2x2x128xf32>
    %11 = arith.mulf %9, %10 : vector<2x2x128xf32>
    %12 = arith.truncf %11 : vector<2x2x128xf32> to vector<2x2x128xbf16>
    %c0_3 = arith.constant 0 : index
    %c0_4 = arith.constant 0 : index
    %c0_5 = arith.constant 0 : index
    %13 = vector.load %arg2[%c0_3, %c0_4, %c0_5] : memref<2x2x128xbf16, #tpu.memory_space<vmem>>, vector<2x2x128xbf16>
    tpu.vector_store %arg2[%c0_3, %c0_4, %c0_5], %12 {strides = array<i32>} : memref<2x2x128xbf16, #tpu.memory_space<vmem>>, vector<2x2x128xbf16>,
    return
  }
  func.func @transform_0(%arg0: i32) -> (i32, i32, i32, i32) {
    %c0_i32 = arith.constant 0 : i32
    %c0_i32_0 = arith.constant 0 : i32
    %c0_i32_1 = arith.constant 0 : i32
    %c0_i32_2 = arith.constant 0 : i32
    return %arg0, %c0_i32, %c0_i32_0, %c0_i32_1 : i32, i32, i32, i32
  }
  func.func @transform_1(%arg0: i32) -> (i32, i32, i32) {
    %c0_i32 = arith.constant 0 : i32
    %c0_i32_0 = arith.constant 0 : i32
    %c0_i32_1 = arith.constant 0 : i32
    return %arg0, %c0_i32, %c0_i32_0 : i32, i32, i32
  }
}

module attributes {stable_mosaic.version = 11 : i64} {
  func.func @_conv_tap_head_kernel(%arg0: i32, %arg1: i32, %arg2: i32, %arg3: memref<1x2x6x128xbf16, #tpu.memory_space<vmem>>, %arg4: memref<1x3x128x128xbf16, #tpu.memory_space<vmem>>, %arg5: memref<1x128xf32, #tpu.memory_space<vmem>>, %arg6: memref<128x128xbf16, #tpu.memory_space<vmem>>, %arg7: memref<1x128xf32, #tpu.memory_space<vmem>>, %arg8: memref<1x2x2x128xf32, #tpu.memory_space<vmem>>, %arg9: memref<2x2x128xf32, #tpu.memory_space<vmem>>) attributes {dimension_semantics = [#tpu.dimension_semantics<parallel>, #tpu.dimension_semantics<parallel>, #tpu.dimension_semantics<arbitrary>], iteration_bounds = array<i64: 2, 1, 3>, scalar_prefetch = 0 : i64, scratch_operands = 1 : i64, tpu.core_type = #tpu.core_type<tc>, window_params = [{transform_indices = @transform_0, window_bounds = array<i64: 1, 2, 6, 128>}, {transform_indices = @transform_1, window_bounds = array<i64: 1, 3, 128, 128>}, {pipeline_mode = #tpu.pipeline_mode<synchronous>, transform_indices = @transform_2, window_bounds = array<i64: 1, 128>}, {pipeline_mode = #tpu.pipeline_mode<synchronous>, transform_indices = @transform_3, window_bounds = array<i64: 128, 128>}, {pipeline_mode = #tpu.pipeline_mode<synchronous>, transform_indices = @transform_4, window_bounds = array<i64: 1, 128>}, {transform_indices = @transform_5, window_bounds = array<i64: 1, 2, 2, 128>}]} {
    %c0_i32 = arith.constant 0 : i32
    %0 = arith.cmpi eq, %arg2, %c0_i32 : i32
    %1 = arith.extui %0 : i1 to i32
    %c0_i32_0 = arith.constant 0 : i32
    %2 = arith.cmpi ne, %1, %c0_i32_0 : i32
    scf.if %2 {
      %cst_63 = arith.constant 0.000000e+00 : f32
      %52 = vector.broadcast %cst_63 : f32 to vector<2x2x128xf32>
      %c0_64 = arith.constant 0 : index
      %c0_65 = arith.constant 0 : index
      %c0_66 = arith.constant 0 : index
      %53 = vector.load %arg9[%c0_64, %c0_65, %c0_66] : memref<2x2x128xf32, #tpu.memory_space<vmem>>, vector<2x2x128xf32>
      tpu.vector_store %arg9[%c0_64, %c0_65, %c0_66], %52 {strides = array<i32>} : memref<2x2x128xf32, #tpu.memory_space<vmem>>, vector<2x2x128xf32>,
    } else {
    }
    %c0 = arith.constant 0 : index
    %c0_1 = arith.constant 0 : index
    %c0_2 = arith.constant 0 : index
    %c0_3 = arith.constant 0 : index
    %3 = vector.load %arg3[%c0, %c0_1, %c0_2, %c0_3] : memref<1x2x6x128xbf16, #tpu.memory_space<vmem>>, vector<1x1x2x128xbf16>
    %4 = vector.shape_cast %3 : vector<1x1x2x128xbf16> to vector<2x128xbf16>
    %c0_4 = arith.constant 0 : index
    %c0_5 = arith.constant 0 : index
    %c0_6 = arith.constant 0 : index
    %c0_7 = arith.constant 0 : index
    %5 = vector.load %arg4[%c0_4, %c0_5, %c0_6, %c0_7] : memref<1x3x128x128xbf16, #tpu.memory_space<vmem>>, vector<1x1x128x128xbf16>
    %6 = vector.shape_cast %5 : vector<1x1x128x128xbf16> to vector<128x128xbf16>
    %cst = arith.constant dense<0.000000e+00> : vector<2x128xf32>
    %7 = tpu.matmul %4, %6, %cst {dimension_numbers = #tpu.dot_dimension_numbers<[1], [0], [0], [1], [0, 0, 1, 1], [], []>} : vector<2x128xbf16>, vector<128x128xbf16>, vector<2x128xf32> -> vector<2x128xf32>
    %c0_8 = arith.constant 0 : index
    %c0_9 = arith.constant 0 : index
    %c2 = arith.constant 2 : index
    %c0_10 = arith.constant 0 : index
    %8 = vector.load %arg3[%c0_8, %c0_9, %c2, %c0_10] : memref<1x2x6x128xbf16, #tpu.memory_space<vmem>>, vector<1x1x2x128xbf16>
    %9 = vector.shape_cast %8 : vector<1x1x2x128xbf16> to vector<2x128xbf16>
    %c0_11 = arith.constant 0 : index
    %c1 = arith.constant 1 : index
    %c0_12 = arith.constant 0 : index
    %c0_13 = arith.constant 0 : index
    %10 = vector.load %arg4[%c0_11, %c1, %c0_12, %c0_13] : memref<1x3x128x128xbf16, #tpu.memory_space<vmem>>, vector<1x1x128x128xbf16>
    %11 = vector.shape_cast %10 : vector<1x1x128x128xbf16> to vector<128x128xbf16>
    %cst_14 = arith.constant dense<0.000000e+00> : vector<2x128xf32>
    %12 = tpu.matmul %9, %11, %cst_14 {dimension_numbers = #tpu.dot_dimension_numbers<[1], [0], [0], [1], [0, 0, 1, 1], [], []>} : vector<2x128xbf16>, vector<128x128xbf16>, vector<2x128xf32> -> vector<2x128xf32>
    %13 = arith.addf %7, %12 : vector<2x128xf32>
    %c0_15 = arith.constant 0 : index
    %c0_16 = arith.constant 0 : index
    %c4 = arith.constant 4 : index
    %c0_17 = arith.constant 0 : index
    %14 = vector.load %arg3[%c0_15, %c0_16, %c4, %c0_17] : memref<1x2x6x128xbf16, #tpu.memory_space<vmem>>, vector<1x1x2x128xbf16>
    %15 = vector.shape_cast %14 : vector<1x1x2x128xbf16> to vector<2x128xbf16>
    %c0_18 = arith.constant 0 : index
    %c2_19 = arith.constant 2 : index
    %c0_20 = arith.constant 0 : index
    %c0_21 = arith.constant 0 : index
    %16 = vector.load %arg4[%c0_18, %c2_19, %c0_20, %c0_21] : memref<1x3x128x128xbf16, #tpu.memory_space<vmem>>, vector<1x1x128x128xbf16>
    %17 = vector.shape_cast %16 : vector<1x1x128x128xbf16> to vector<128x128xbf16>
    %cst_22 = arith.constant dense<0.000000e+00> : vector<2x128xf32>
    %18 = tpu.matmul %15, %17, %cst_22 {dimension_numbers = #tpu.dot_dimension_numbers<[1], [0], [0], [1], [0, 0, 1, 1], [], []>} : vector<2x128xbf16>, vector<128x128xbf16>, vector<2x128xf32> -> vector<2x128xf32>
    %19 = arith.addf %13, %18 : vector<2x128xf32>
    %c0_23 = arith.constant 0 : index
    %c0_24 = arith.constant 0 : index
    %c0_25 = arith.constant 0 : index
    %20 = vector.load %arg9[%c0_23, %c0_24, %c0_25] : memref<2x2x128xf32, #tpu.memory_space<vmem>>, vector<1x2x128xf32>
    %21 = vector.shape_cast %20 : vector<1x2x128xf32> to vector<2x128xf32>
    %22 = arith.addf %21, %19 : vector<2x128xf32>
    %c0_26 = arith.constant 0 : index
    %c0_27 = arith.constant 0 : index
    %c0_28 = arith.constant 0 : index
    %23 = vector.load %arg9[%c0_26, %c0_27, %c0_28] : memref<2x2x128xf32, #tpu.memory_space<vmem>>, vector<1x2x128xf32>
    %24 = vector.shape_cast %23 : vector<1x2x128xf32> to vector<2x128xf32>
    %25 = vector.shape_cast %22 : vector<2x128xf32> to vector<1x2x128xf32>
    tpu.vector_store %arg9[%c0_26, %c0_27, %c0_28], %25 {strides = array<i32>} : memref<2x2x128xf32, #tpu.memory_space<vmem>>, vector<1x2x128xf32>,
    %c0_29 = arith.constant 0 : index
    %c1_30 = arith.constant 1 : index
    %c0_31 = arith.constant 0 : index
    %c0_32 = arith.constant 0 : index
    %26 = vector.load %arg3[%c0_29, %c1_30, %c0_31, %c0_32] : memref<1x2x6x128xbf16, #tpu.memory_space<vmem>>, vector<1x1x2x128xbf16>
    %27 = vector.shape_cast %26 : vector<1x1x2x128xbf16> to vector<2x128xbf16>
    %c0_33 = arith.constant 0 : index
    %c0_34 = arith.constant 0 : index
    %c0_35 = arith.constant 0 : index
    %c0_36 = arith.constant 0 : index
    %28 = vector.load %arg4[%c0_33, %c0_34, %c0_35, %c0_36] : memref<1x3x128x128xbf16, #tpu.memory_space<vmem>>, vector<1x1x128x128xbf16>
    %29 = vector.shape_cast %28 : vector<1x1x128x128xbf16> to vector<128x128xbf16>
    %cst_37 = arith.constant dense<0.000000e+00> : vector<2x128xf32>
    %30 = tpu.matmul %27, %29, %cst_37 {dimension_numbers = #tpu.dot_dimension_numbers<[1], [0], [0], [1], [0, 0, 1, 1], [], []>} : vector<2x128xbf16>, vector<128x128xbf16>, vector<2x128xf32> -> vector<2x128xf32>
    %c0_38 = arith.constant 0 : index
    %c1_39 = arith.constant 1 : index
    %c2_40 = arith.constant 2 : index
    %c0_41 = arith.constant 0 : index
    %31 = vector.load %arg3[%c0_38, %c1_39, %c2_40, %c0_41] : memref<1x2x6x128xbf16, #tpu.memory_space<vmem>>, vector<1x1x2x128xbf16>
    %32 = vector.shape_cast %31 : vector<1x1x2x128xbf16> to vector<2x128xbf16>
    %c0_42 = arith.constant 0 : index
    %c1_43 = arith.constant 1 : index
    %c0_44 = arith.constant 0 : index
    %c0_45 = arith.constant 0 : index
    %33 = vector.load %arg4[%c0_42, %c1_43, %c0_44, %c0_45] : memref<1x3x128x128xbf16, #tpu.memory_space<vmem>>, vector<1x1x128x128xbf16>
    %34 = vector.shape_cast %33 : vector<1x1x128x128xbf16> to vector<128x128xbf16>
    %cst_46 = arith.constant dense<0.000000e+00> : vector<2x128xf32>
    %35 = tpu.matmul %32, %34, %cst_46 {dimension_numbers = #tpu.dot_dimension_numbers<[1], [0], [0], [1], [0, 0, 1, 1], [], []>} : vector<2x128xbf16>, vector<128x128xbf16>, vector<2x128xf32> -> vector<2x128xf32>
    %36 = arith.addf %30, %35 : vector<2x128xf32>
    %c0_47 = arith.constant 0 : index
    %c1_48 = arith.constant 1 : index
    %c4_49 = arith.constant 4 : index
    %c0_50 = arith.constant 0 : index
    %37 = vector.load %arg3[%c0_47, %c1_48, %c4_49, %c0_50] : memref<1x2x6x128xbf16, #tpu.memory_space<vmem>>, vector<1x1x2x128xbf16>
    %38 = vector.shape_cast %37 : vector<1x1x2x128xbf16> to vector<2x128xbf16>
    %c0_51 = arith.constant 0 : index
    %c2_52 = arith.constant 2 : index
    %c0_53 = arith.constant 0 : index
    %c0_54 = arith.constant 0 : index
    %39 = vector.load %arg4[%c0_51, %c2_52, %c0_53, %c0_54] : memref<1x3x128x128xbf16, #tpu.memory_space<vmem>>, vector<1x1x128x128xbf16>
    %40 = vector.shape_cast %39 : vector<1x1x128x128xbf16> to vector<128x128xbf16>
    %cst_55 = arith.constant dense<0.000000e+00> : vector<2x128xf32>
    %41 = tpu.matmul %38, %40, %cst_55 {dimension_numbers = #tpu.dot_dimension_numbers<[1], [0], [0], [1], [0, 0, 1, 1], [], []>} : vector<2x128xbf16>, vector<128x128xbf16>, vector<2x128xf32> -> vector<2x128xf32>
    %42 = arith.addf %36, %41 : vector<2x128xf32>
    %c1_56 = arith.constant 1 : index
    %c0_57 = arith.constant 0 : index
    %c0_58 = arith.constant 0 : index
    %43 = vector.load %arg9[%c1_56, %c0_57, %c0_58] : memref<2x2x128xf32, #tpu.memory_space<vmem>>, vector<1x2x128xf32>
    %44 = vector.shape_cast %43 : vector<1x2x128xf32> to vector<2x128xf32>
    %45 = arith.addf %44, %42 : vector<2x128xf32>
    %c1_59 = arith.constant 1 : index
    %c0_60 = arith.constant 0 : index
    %c0_61 = arith.constant 0 : index
    %46 = vector.load %arg9[%c1_59, %c0_60, %c0_61] : memref<2x2x128xf32, #tpu.memory_space<vmem>>, vector<1x2x128xf32>
    %47 = vector.shape_cast %46 : vector<1x2x128xf32> to vector<2x128xf32>
    %48 = vector.shape_cast %45 : vector<2x128xf32> to vector<1x2x128xf32>
    tpu.vector_store %arg9[%c1_59, %c0_60, %c0_61], %48 {strides = array<i32>} : memref<2x2x128xf32, #tpu.memory_space<vmem>>, vector<1x2x128xf32>,
    %c2_i32 = arith.constant 2 : i32
    %49 = arith.cmpi eq, %arg2, %c2_i32 : i32
    %50 = arith.extui %49 : i1 to i32
    %c0_i32_62 = arith.constant 0 : i32
    %51 = arith.cmpi ne, %50, %c0_i32_62 : i32
    scf.if %51 {
      %c0_63 = arith.constant 0 : index
      %c0_64 = arith.constant 0 : index
      %c0_65 = arith.constant 0 : index
      %52 = vector.load %arg9[%c0_63, %c0_64, %c0_65] : memref<2x2x128xf32, #tpu.memory_space<vmem>>, vector<1x2x128xf32>
      %53 = vector.shape_cast %52 : vector<1x2x128xf32> to vector<2x128xf32>
      %c0_66 = arith.constant 0 : index
      %c0_67 = arith.constant 0 : index
      %54 = vector.load %arg5[%c0_66, %c0_67] : memref<1x128xf32, #tpu.memory_space<vmem>>, vector<1x128xf32>
      %55 = vector.broadcast %54 : vector<1x128xf32> to vector<2x128xf32>
      %56 = arith.addf %53, %55 : vector<2x128xf32>
      %cst_68 = arith.constant 0.000000e+00 : f32
      %57 = vector.broadcast %cst_68 : f32 to vector<2x128xf32>
      %58 = arith.maximumf %56, %57 : vector<2x128xf32>
      %59 = arith.truncf %58 : vector<2x128xf32> to vector<2x128xbf16>
      %c0_69 = arith.constant 0 : index
      %c0_70 = arith.constant 0 : index
      %60 = vector.load %arg6[%c0_69, %c0_70] : memref<128x128xbf16, #tpu.memory_space<vmem>>, vector<128x128xbf16>
      %cst_71 = arith.constant dense<0.000000e+00> : vector<2x128xf32>
      %61 = tpu.matmul %59, %60, %cst_71 {dimension_numbers = #tpu.dot_dimension_numbers<[1], [0], [0], [1], [0, 0, 1, 1], [], []>} : vector<2x128xbf16>, vector<128x128xbf16>, vector<2x128xf32> -> vector<2x128xf32>
      %c0_72 = arith.constant 0 : index
      %c0_73 = arith.constant 0 : index
      %62 = vector.load %arg7[%c0_72, %c0_73] : memref<1x128xf32, #tpu.memory_space<vmem>>, vector<1x128xf32>
      %63 = vector.broadcast %62 : vector<1x128xf32> to vector<2x128xf32>
      %64 = arith.addf %61, %63 : vector<2x128xf32>
      %c0_74 = arith.constant 0 : index
      %c0_75 = arith.constant 0 : index
      %c0_76 = arith.constant 0 : index
      %c0_77 = arith.constant 0 : index
      %65 = vector.load %arg8[%c0_74, %c0_75, %c0_76, %c0_77] : memref<1x2x2x128xf32, #tpu.memory_space<vmem>>, vector<1x1x2x128xf32>
      %66 = vector.shape_cast %65 : vector<1x1x2x128xf32> to vector<2x128xf32>
      %67 = vector.shape_cast %64 : vector<2x128xf32> to vector<1x1x2x128xf32>
      tpu.vector_store %arg8[%c0_74, %c0_75, %c0_76, %c0_77], %67 {strides = array<i32>} : memref<1x2x2x128xf32, #tpu.memory_space<vmem>>, vector<1x1x2x128xf32>,
      %c1_78 = arith.constant 1 : index
      %c0_79 = arith.constant 0 : index
      %c0_80 = arith.constant 0 : index
      %68 = vector.load %arg9[%c1_78, %c0_79, %c0_80] : memref<2x2x128xf32, #tpu.memory_space<vmem>>, vector<1x2x128xf32>
      %69 = vector.shape_cast %68 : vector<1x2x128xf32> to vector<2x128xf32>
      %c0_81 = arith.constant 0 : index
      %c0_82 = arith.constant 0 : index
      %70 = vector.load %arg5[%c0_81, %c0_82] : memref<1x128xf32, #tpu.memory_space<vmem>>, vector<1x128xf32>
      %71 = vector.broadcast %70 : vector<1x128xf32> to vector<2x128xf32>
      %72 = arith.addf %69, %71 : vector<2x128xf32>
      %cst_83 = arith.constant 0.000000e+00 : f32
      %73 = vector.broadcast %cst_83 : f32 to vector<2x128xf32>
      %74 = arith.maximumf %72, %73 : vector<2x128xf32>
      %75 = arith.truncf %74 : vector<2x128xf32> to vector<2x128xbf16>
      %c0_84 = arith.constant 0 : index
      %c0_85 = arith.constant 0 : index
      %76 = vector.load %arg6[%c0_84, %c0_85] : memref<128x128xbf16, #tpu.memory_space<vmem>>, vector<128x128xbf16>
      %cst_86 = arith.constant dense<0.000000e+00> : vector<2x128xf32>
      %77 = tpu.matmul %75, %76, %cst_86 {dimension_numbers = #tpu.dot_dimension_numbers<[1], [0], [0], [1], [0, 0, 1, 1], [], []>} : vector<2x128xbf16>, vector<128x128xbf16>, vector<2x128xf32> -> vector<2x128xf32>
      %c0_87 = arith.constant 0 : index
      %c0_88 = arith.constant 0 : index
      %78 = vector.load %arg7[%c0_87, %c0_88] : memref<1x128xf32, #tpu.memory_space<vmem>>, vector<1x128xf32>
      %79 = vector.broadcast %78 : vector<1x128xf32> to vector<2x128xf32>
      %80 = arith.addf %77, %79 : vector<2x128xf32>
      %c0_89 = arith.constant 0 : index
      %c1_90 = arith.constant 1 : index
      %c0_91 = arith.constant 0 : index
      %c0_92 = arith.constant 0 : index
      %81 = vector.load %arg8[%c0_89, %c1_90, %c0_91, %c0_92] : memref<1x2x2x128xf32, #tpu.memory_space<vmem>>, vector<1x1x2x128xf32>
      %82 = vector.shape_cast %81 : vector<1x1x2x128xf32> to vector<2x128xf32>
      %83 = vector.shape_cast %80 : vector<2x128xf32> to vector<1x1x2x128xf32>
      tpu.vector_store %arg8[%c0_89, %c1_90, %c0_91, %c0_92], %83 {strides = array<i32>} : memref<1x2x2x128xf32, #tpu.memory_space<vmem>>, vector<1x1x2x128xf32>,
    } else {
    }
    return
  }
  func.func @transform_0(%arg0: i32, %arg1: i32, %arg2: i32) -> (i32, i32, i32, i32) {
    %c2_i32 = arith.constant 2 : i32
    %0 = arith.muli %arg2, %c2_i32 : i32
    %1 = arith.addi %0, %arg0 : i32
    %c0_i32 = arith.constant 0 : i32
    %c0_i32_0 = arith.constant 0 : i32
    %c0_i32_1 = arith.constant 0 : i32
    return %1, %arg1, %c0_i32, %c0_i32_0 : i32, i32, i32, i32
  }
  func.func @transform_1(%arg0: i32, %arg1: i32, %arg2: i32) -> (i32, i32, i32, i32) {
    %c0_i32 = arith.constant 0 : i32
    %c0_i32_0 = arith.constant 0 : i32
    %c0_i32_1 = arith.constant 0 : i32
    %c0_i32_2 = arith.constant 0 : i32
    return %arg2, %c0_i32, %c0_i32_0, %c0_i32_1 : i32, i32, i32, i32
  }
  func.func @transform_2(%arg0: i32, %arg1: i32, %arg2: i32) -> (i32, i32) {
    %c0_i32 = arith.constant 0 : i32
    %c0_i32_0 = arith.constant 0 : i32
    %c0_i32_1 = arith.constant 0 : i32
    return %c0_i32, %c0_i32_0 : i32, i32
  }
  func.func @transform_3(%arg0: i32, %arg1: i32, %arg2: i32) -> (i32, i32) {
    %c0_i32 = arith.constant 0 : i32
    %c0_i32_0 = arith.constant 0 : i32
    %c0_i32_1 = arith.constant 0 : i32
    return %c0_i32, %c0_i32_0 : i32, i32
  }
  func.func @transform_4(%arg0: i32, %arg1: i32, %arg2: i32) -> (i32, i32) {
    %c0_i32 = arith.constant 0 : i32
    %c0_i32_0 = arith.constant 0 : i32
    %c0_i32_1 = arith.constant 0 : i32
    return %c0_i32, %c0_i32_0 : i32, i32
  }
  func.func @transform_5(%arg0: i32, %arg1: i32, %arg2: i32) -> (i32, i32, i32, i32) {
    %c0_i32 = arith.constant 0 : i32
    %c0_i32_0 = arith.constant 0 : i32
    %c0_i32_1 = arith.constant 0 : i32
    return %arg0, %arg1, %c0_i32, %c0_i32_0 : i32, i32, i32, i32
  }
}

</mosaic_0001>

<bundles_post_ra>
// kernel: bigtail11i_forward.10
= control target key start
LH: loop header
LB: loop body
LE: loop exit
PB: predicated region body
PF: predicated region fallthrough
CT: control target
= control target key end

     0   :  { %s329_s6 = smov 0   ;;  %s374_s0 = inlined_call_operand.vmem [shape: bf16[16,2,8,256], index: 0, kind: input, shape index: {}]   ;;  %s375_s1 = inlined_call_operand.vmem [shape: bf16[16,8,128], index: 1, kind: output, shape index: {}]  }
   0x1 LB: > { %s267_s7 = sadd.s32 4294967295, %s317_s6   ;;  %p271_p0 = scmp.ge.s32.totalorder %s317_s6, 1  ;;  %s317_s6 = sphi %s329_s6, %s11_s6  }
   0x2   : > { %p89_p1 = scmp.lt.s32.totalorder %s317_s6, 3 }
   0x4   : > { %p90_p2 = pnand %p271_p0, %p89_p1 }
   0x5   : > { %s272_s8 = sshll.u32 (!%p90_p2), %s267_s7, 3 }
   0x6   : > { %93 = sbr.rel (%p90_p2) target bundleno = 38 (0x26), region = 24  ;;  %p111_p3 = scmp.lt.s32.totalorder (!%p90_p2), %s272_s8, 15 }
   0xd   : > { %s377_s8 = smov (!%p111_p3, %s272_s8), 15 }
   0xe   : > { %s279_s9 = sshll.u32 %s377_s8, 4  ;;  %s276_s13 = sshll.u32 %s377_s8, 2 }
   0xf   : > { %s343_s12 = scalar_lea.vmem %s374_s0, %s279_s9  ;;  %s361_s16 = scalar_lea.vmem %s375_s1, %s276_s13 }
  0x10   : > { %v123_v0 = vld [vmem:[%s343_s12] sm:$0xff]  ;;  %v124_v1 = vld [vmem:[%s343_s12 + $0x8] sm:$0xff]  ;;  %v125_v2 = vld [vmem:[%s343_s12 + $0x10] sm:$0xff] }
  0x11   : > { %v126_v3 = vld [vmem:[%s343_s12 + $0x18] sm:$0xff]  ;;  %v139_v4 = vunpack.c.l.bf16 %v123_v0  ;;  %v140_v5 = vunpack.c.h.bf16 %v123_v0  ;;  %v141_v6 = vunpack.c.l.bf16 %v124_v1  ;;  %v142_v7 = vunpack.c.h.bf16 %v124_v1  ;;  %v127_v8 = vld [vmem:[%s343_s12 + $0x20] sm:$0xff]  ;;  %v128_v9 = vld [vmem:[%s343_s12 + $0x28] sm:$0xff] }
  0x12   : > { %v143_v10 = vunpack.c.l.bf16 %v125_v2  ;;  %v144_v11 = vunpack.c.h.bf16 %v125_v2  ;;  %v145_v12 = vunpack.c.l.bf16 %v126_v3  ;;  %v146_v13 = vunpack.c.h.bf16 %v126_v3  ;;  %v129_v14 = vld [vmem:[%s343_s12 + $0x30] sm:$0xff]  ;;  %v130_v15 = vld [vmem:[%s343_s12 + $0x38] sm:$0xff]  ;;  %v131_v24 = vld [vmem:[%s343_s12 + $0x40] sm:$0xff] }
  0x13   : > { %v171_v16 = vmax.f32 %v139_v4, %v141_v6  ;;  %v172_v17 = vmax.f32 %v140_v5, %v142_v7  ;;  %v147_v18 = vunpack.c.l.bf16 %v127_v8  ;;  %v148_v19 = vunpack.c.h.bf16 %v127_v8  ;;  %v132_v25 = vld [vmem:[%s343_s12 + $0x48] sm:$0xff]  ;;  %v133_v34 = vld [vmem:[%s343_s12 + $0x50] sm:$0xff]  ;;  %v134_v35 = vld [vmem:[%s343_s12 + $0x58] sm:$0xff] }
  0x14   : > { %v173_v20 = vmax.f32 %v143_v10, %v145_v12  ;;  %v174_v21 = vmax.f32 %v144_v11, %v146_v13  ;;  %v149_v22 = vunpack.c.l.bf16 %v128_v9  ;;  %v150_v23 = vunpack.c.h.bf16 %v128_v9  ;;  %v135_v40 = vld [vmem:[%s343_s12 + $0x60] sm:$0xff]  ;;  %v136_v45 = vld [vmem:[%s343_s12 + $0x68] sm:$0xff]  ;;  %v137_v50 = vld [vmem:[%s343_s12 + $0x70] sm:$0xff] }
  0x15   : > { %v187_v26 = vmax.f32 %v171_v16, %v172_v17  ;;  %v151_v27 = vunpack.c.l.bf16 %v129_v14  ;;  %v152_v28 = vunpack.c.h.bf16 %v129_v14  ;;  %v153_v29 = vunpack.c.l.bf16 %v130_v15  ;;  %v138_v54 = vld [vmem:[%s343_s12 + $0x78] sm:$0xff] }
  0x16   : > { %v188_v30 = vmax.f32 %v173_v20, %v174_v21  ;;  %v154_v31 = vunpack.c.h.bf16 %v130_v15  ;;  %v175_v32 = vmax.f32 %v147_v18, %v149_v22  ;;  %v176_v33 = vmax.f32 %v148_v19, %v150_v23 }
  0x17   : > { %v177_v36 = vmax.f32 %v151_v27, %v153_v29  ;;  %v155_v37 = vunpack.c.l.bf16 %v131_v24  ;;  %v156_v38 = vunpack.c.h.bf16 %v131_v24  ;;  %v157_v39 = vunpack.c.l.bf16 %v132_v25 }
  0x18   : > { %v283_v41 = vpack.c.bf16 %v188_v30, %v187_v26  ;;  %v178_v42 = vmax.f32 %v152_v28, %v154_v31  ;;  %v189_v43 = vmax.f32 %v175_v32, %v176_v33  ;;  %v158_v44 = vunpack.c.h.bf16 %v132_v25 }
  0x19   : > { %v159_v46 = vunpack.c.l.bf16 %v133_v34  ;;  %v160_v47 = vunpack.c.h.bf16 %v133_v34  ;;  %v161_v48 = vunpack.c.l.bf16 %v134_v35  ;;  %v162_v49 = vunpack.c.h.bf16 %v134_v35 }
  0x1a   : > { %284 = vst [vmem:[%s361_s16] sm:$0xff] %v283_v41   ;;  %v190_v51 = vmax.f32 %v177_v36, %v178_v42  ;;  %v179_v52 = vmax.f32 %v155_v37, %v157_v39  ;;  %v180_v53 = vmax.f32 %v156_v38, %v158_v44  ;;  %v163_v55 = vunpack.c.l.bf16 %v135_v40 }
  0x1b   : > { %v181_v56 = vmax.f32 %v159_v46, %v161_v48  ;;  %v182_v57 = vmax.f32 %v160_v47, %v162_v49  ;;  %v164_v58 = vunpack.c.h.bf16 %v135_v40  ;;  %v165_v59 = vunpack.c.l.bf16 %v136_v45 }
  0x1c   : > { %v288_v60 = vpack.c.bf16 %v190_v51, %v189_v43  ;;  %v191_v61 = vmax.f32 %v179_v52, %v180_v53  ;;  %v166_v62 = vunpack.c.h.bf16 %v136_v45  ;;  %v167_v63 = vunpack.c.l.bf16 %v137_v50 }
  0x1d   : > { %v192_v0 = vmax.f32 %v181_v56, %v182_v57  ;;  %v168_v1 = vunpack.c.h.bf16 %v137_v50  ;;  %v169_v2 = vunpack.c.l.bf16 %v138_v54  ;;  %v170_v3 = vunpack.c.h.bf16 %v138_v54 }
  0x1e   : > { %300 = vst [vmem:[%s361_s16 + $0x8] sm:$0xff] %v288_v60   ;;  %v183_v4 = vmax.f32 %v163_v55, %v165_v59  ;;  %v184_v5 = vmax.f32 %v164_v58, %v166_v62 }
  0x1f   : > { %v293_v6 = vpack.c.bf16 %v192_v0, %v191_v61  ;;  %v185_v7 = vmax.f32 %v167_v63, %v169_v2  ;;  %v186_v8 = vmax.f32 %v168_v1, %v170_v3 }
  0x20   : > { %v193_v9 = vmax.f32 %v183_v4, %v184_v5 }
  0x21   : > { %301 = vst [vmem:[%s361_s16 + $0x10] sm:$0xff] %v293_v6   ;;  %v194_v10 = vmax.f32 %v185_v7, %v186_v8 }
  0x23   : > { %v298_v11 = vpack.c.bf16 %v194_v10, %v193_v9 }
  0x25   : > { %302 = vst [vmem:[%s361_s16 + $0x18] sm:$0xff] %v298_v11  }
  0x26 PF: > { %s11_s6 = sadd.s32 1, %s317_s6  }
  0x27   : > { %p8_p4 = scmp.ge.s32.totalorder %s11_s6, 4  }
  0x29   :  { %10 = sbr.rel (!%p8_p4) target bundleno = 1 (0x1), region = 54 }

// kernel: bigtail11i_forward.9
= control target key start
LH: loop header
LB: loop body
LE: loop exit
PB: predicated region body
PF: predicated region fallthrough
CT: control target
= control target key end

     0   :  { %s1363_s12 = smov 0   ;;  %s1521_s0 = inlined_call_operand.vmem [shape: bf16[512,256], index: 0, kind: input, shape index: {}]   ;;  %s1522_s1 = inlined_call_operand.vmem [shape: bf16[256,128], index: 1, kind: input, shape index: {}]   ;;  %s1523_s2 = inlined_call_operand.vmem [shape: f32[1,128], index: 2, kind: input, shape index: {}]   ;;  %s1524_s3 = inlined_call_operand.vmem [shape: bf16[512,128], index: 3, kind: output, shape index: {}]  }
   0x1 LB: > { %s914_s13 = sadd.s32 4294967295, %s1341_s12   ;;  %p918_p0 = scmp.ge.s32.totalorder %s1341_s12, 1  ;;  %s1341_s12 = sphi %s1363_s12, %s13_s12  }
   0x2   : > { %p139_p1 = scmp.lt.s32.totalorder %s1341_s12, 3 }
   0x4   : > { %p140_p2 = pnand %p918_p0, %p139_p1 }
   0x5   : > { %v1271_v0 = vld [vmem:[%s1522_s1 + $0x40] sm:$0xff] (!%p140_p2)   ;;  %s919_s16 = sshll.u32 (!%p140_p2), %s914_s13, 5  ;;  %v1273_v2 = vld [vmem:[%s1522_s1 + $0x48] sm:$0xff] (!%p140_p2)   ;;  %v1275_v4 = vld [vmem:[%s1522_s1 + $0x50] sm:$0xff] (!%p140_p2)  }
   0x6   : > { %143 = sbr.rel (%p140_p2) target bundleno = 319 (0x13f), region = 32  ;;  %v1272_v1 = vld [vmem:[%s1522_s1] sm:$0xff] (!%p140_p2)   ;;  %1135 = vmatprep.subr.bf16.mxu0 (!%p140_p2), %v1271_v0  ;;  %1247 = vmatprep.subr.bf16.mxu1 (!%p140_p2), %v1271_v0  ;;  %v1274_v3 = vld [vmem:[%s1522_s1 + $0x8] sm:$0xff] (!%p140_p2)   ;;  %p165_p3 = scmp.lt.s32.totalorder (!%p140_p2), %s919_s16, 63  ;;  %v1276_v5 = vld [vmem:[%s1522_s1 + $0x10] sm:$0xff] (!%p140_p2)  }
   0x7   : > { %1136 = vmatpush3.bf16.msra.mxu0 (!%p140_p2), %v1272_v1  ;;  %1255 = vmatpush3.bf16.msra.mxu1 (!%p140_p2), %v1272_v1  ;;  %v1277_v6 = vld [vmem:[%s1522_s1 + $0x58] sm:$0xff] (!%p140_p2)   ;;  %v1279_v8 = vld [vmem:[%s1522_s1 + $0x60] sm:$0xff] (!%p140_p2)   ;;  %v1281_v10 = vld [vmem:[%s1522_s1 + $0x68] sm:$0xff] (!%p140_p2)  }
   0x8   : > { %1137 = vmatprep.subr.bf16.mxu0 (!%p140_p2), %v1273_v2  ;;  %1248 = vmatprep.subr.bf16.mxu1 (!%p140_p2), %v1273_v2  ;;  %v1278_v7 = vld [vmem:[%s1522_s1 + $0x18] sm:$0xff] (!%p140_p2)   ;;  %v1280_v9 = vld [vmem:[%s1522_s1 + $0x20] sm:$0xff] (!%p140_p2)   ;;  %v1282_v13 = vld [vmem:[%s1522_s1 + $0x28] sm:$0xff] (!%p140_p2)  }
   0x9   : > { %v1283_v14 = vld [vmem:[%s1522_s1 + $0x70] sm:$0xff] (!%p140_p2)   ;;  %v1285_v16 = vld [vmem:[%s1522_s1 + $0x78] sm:$0xff] (!%p140_p2)   ;;  %v1462_v50 = vld [vmem:[%s1523_s2] ss:$0 sm:$0xff] (!%p140_p2) }
   0xa   : > { %v1284_v15 = vld [vmem:[%s1522_s1 + $0x30] sm:$0xff] (!%p140_p2)   ;;  %v1286_v17 = vld [vmem:[%s1522_s1 + $0x38] sm:$0xff] (!%p140_p2)  }
   0xb   : > { %1138 = vmatpush3.bf16.msra.mxu0 (!%p140_p2), %v1274_v3  ;;  %1256 = vmatpush3.bf16.msra.mxu1 (!%p140_p2), %v1274_v3 }
   0xc   : > { %1139 = vmatprep.subr.bf16.mxu0 (!%p140_p2), %v1275_v4  ;;  %1249 = vmatprep.subr.bf16.mxu1 (!%p140_p2), %v1275_v4 }
   0xd   : > { %s1526_s16 = smov (!%p165_p3, %s919_s16), 63 }
   0xe   : > { %s1007_s4 = sshll.u32 %s1526_s16, 3  ;;  %s923_s28 = sshll.u32 %s1526_s16, 2 }
   0xf   : > { %1140 = vmatpush3.bf16.msra.mxu0 %v1276_v5  ;;  %1257 = vmatpush3.bf16.msra.mxu1 %v1276_v5  ;;  %s1404_s9 = scalar_lea.vmem %s1521_s0, %s1007_s4  ;;  %s1472_s4 = scalar_lea.vmem %s1524_s3, %s923_s28 }
  0x10   : > { %1141 = vmatprep.subr.bf16.mxu0 %v1277_v6  ;;  %1250 = vmatprep.subr.bf16.mxu1 %v1277_v6  ;;  %v1289_v11 = vld [vmem:[%s1404_s9 + $0x4] ss:$8 sps:$4 sm:$0xff]   ;;  %v1287_v18 = vld [vmem:[%s1404_s9] ss:$8 sps:$4 sm:$0xff]   ;;  %v1293_v20 = vld [vmem:[%s1404_s9 + $0x14] ss:$8 sps:$4 sm:$0xff]  }
  0x11   : > { %v1292_v12 = vld [vmem:[%s1404_s9 + $0x84] ss:$8 sps:$4 sm:$0xff]   ;;  %537 = vmatprep.mubr.bf16.mxu0 %v1289_v11  ;;  %v1290_v19 = vld [vmem:[%s1404_s9 + $0x80] ss:$8 sps:$4 sm:$0xff]   ;;  %v1295_v21 = vld [vmem:[%s1404_s9 + $0x94] ss:$8 sps:$4 sm:$0xff]  }
  0x12   : > { %601 = vmatprep.mubr.bf16.mxu1 %v1292_v12  ;;  %v1297_v22 = vld [vmem:[%s1404_s9 + $0x10] ss:$8 sps:$4 sm:$0xff]   ;;  %v1299_v24 = vld [vmem:[%s1404_s9 + $0x24] ss:$8 sps:$4 sm:$0xff]   ;;  %v1303_v26 = vld [vmem:[%s1404_s9 + $0x20] ss:$8 sps:$4 sm:$0xff]  }
  0x13   : > { %1142 = vmatpush3.bf16.msra.mxu0 %v1278_v7  ;;  %1258 = vmatpush3.bf16.msra.mxu1 %v1278_v7  ;;  %v1298_v23 = vld [vmem:[%s1404_s9 + $0x90] ss:$8 sps:$4 sm:$0xff]   ;;  %v1301_v25 = vld [vmem:[%s1404_s9 + $0xa4] ss:$8 sps:$4 sm:$0xff]   ;;  %v1304_v27 = vld [vmem:[%s1404_s9 + $0xa0] ss:$8 sps:$4 sm:$0xff]  }
  0x14   : > { %1143 = vmatprep.subr.bf16.mxu0 %v1279_v8  ;;  %1251 = vmatprep.subr.bf16.mxu1 %v1279_v8  ;;  %v1305_v28 = vld [vmem:[%s1404_s9 + $0x34] ss:$8 sps:$4 sm:$0xff]   ;;  %v1309_v30 = vld [vmem:[%s1404_s9 + $0x30] ss:$8 sps:$4 sm:$0xff]   ;;  %v1311_v32 = vld [vmem:[%s1404_s9 + $0x44] ss:$8 sps:$4 sm:$0xff]  }
  0x15   : > { %v1307_v29 = vld [vmem:[%s1404_s9 + $0xb4] ss:$8 sps:$4 sm:$0xff]   ;;  %v1310_v31 = vld [vmem:[%s1404_s9 + $0xb0] ss:$8 sps:$4 sm:$0xff]   ;;  %v1313_v33 = vld [vmem:[%s1404_s9 + $0xc4] ss:$8 sps:$4 sm:$0xff]  }
  0x16   : > { %v1315_v34 = vld [vmem:[%s1404_s9 + $0x40] ss:$8 sps:$4 sm:$0xff]   ;;  %v1317_v36 = vld [vmem:[%s1404_s9 + $0x54] ss:$8 sps:$4 sm:$0xff]   ;;  %v1321_v38 = vld [vmem:[%s1404_s9 + $0x50] ss:$8 sps:$4 sm:$0xff]  }
  0x17   : > { %1144 = vmatpush3.bf16.msra.mxu0 %v1280_v9  ;;  %1259 = vmatpush3.bf16.msra.mxu1 %v1280_v9  ;;  %v1316_v35 = vld [vmem:[%s1404_s9 + $0xc0] ss:$8 sps:$4 sm:$0xff]   ;;  %v1319_v37 = vld [vmem:[%s1404_s9 + $0xd4] ss:$8 sps:$4 sm:$0xff]   ;;  %v1322_v39 = vld [vmem:[%s1404_s9 + $0xd0] ss:$8 sps:$4 sm:$0xff]  }
  0x18   : > { %1145 = vmatprep.subr.bf16.mxu0 %v1281_v10  ;;  %1252 = vmatprep.subr.bf16.mxu1 %v1281_v10  ;;  %v1323_v40 = vld [vmem:[%s1404_s9 + $0x64] ss:$8 sps:$4 sm:$0xff]   ;;  %v1327_v42 = vld [vmem:[%s1404_s9 + $0x60] ss:$8 sps:$4 sm:$0xff]   ;;  %v1329_v44 = vld [vmem:[%s1404_s9 + $0x74] ss:$8 sps:$4 sm:$0xff]  }
  0x19   : > { %v1325_v41 = vld [vmem:[%s1404_s9 + $0xe4] ss:$8 sps:$4 sm:$0xff]   ;;  %v1328_v43 = vld [vmem:[%s1404_s9 + $0xe0] ss:$8 sps:$4 sm:$0xff]   ;;  %v1331_v45 = vld [vmem:[%s1404_s9 + $0xf4] ss:$8 sps:$4 sm:$0xff]  }
  0x1a   : > { %v1333_v46 = vld [vmem:[%s1404_s9 + $0x70] ss:$8 sps:$4 sm:$0xff]  }
  0x1b   : > { %1146 = vmatpush3.bf16.msra.mxu0 %v1282_v13  ;;  %1260 = vmatpush3.bf16.msra.mxu1 %v1282_v13  ;;  %v1334_v47 = vld [vmem:[%s1404_s9 + $0xf0] ss:$8 sps:$4 sm:$0xff]  }
  0x1c   : > { %1147 = vmatprep.subr.bf16.mxu0 %v1283_v14  ;;  %1253 = vmatprep.subr.bf16.mxu1 %v1283_v14 }
  0x1f   : > { %1148 = vmatpush3.bf16.msra.mxu0 %v1284_v15  ;;  %1261 = vmatpush3.bf16.msra.mxu1 %v1284_v15 }
  0x20   : > { %1149 = vmatprep.subr.bf16.mxu0 %v1285_v16  ;;  %1254 = vmatprep.subr.bf16.mxu1 %v1285_v16 }
  0x23   : > { %1150 = vmatpush3.bf16.msra.mxu0 %v1286_v17  ;;  %1262 = vmatpush3.bf16.msra.mxu1 %v1286_v17 }
  0x26   : > { %538 = vmatmul.mubr.bf16.vlgmr.msra.gmra.mrb[0].mxu0 %v1287_v18  ;;  %602 = vmatmul.mubr.bf16.vlgmr.msra.gmra.mrb[0].mxu1 %v1290_v19 }
  0x27   : > { %545 = vmatprep.mubr.bf16.mxu0 %v1293_v20  ;;  %609 = vmatprep.mubr.bf16.mxu1 %v1295_v21 }
  0x2e   : > { %546 = vmatmul.mubr.bf16.gmra.mrb[4].mxu0 %v1297_v22  ;;  %610 = vmatmul.mubr.bf16.gmra.mrb[4].mxu1 %v1298_v23 }
  0x2f   : > { %553 = vmatprep.mubr.bf16.mxu0 %v1299_v24  ;;  %617 = vmatprep.mubr.bf16.mxu1 %v1301_v25 }
  0x36   : > { %554 = vmatmul.mubr.bf16.gmra.mrb[8].mxu0 %v1303_v26  ;;  %618 = vmatmul.mubr.bf16.gmra.mrb[8].mxu1 %v1304_v27 }
  0x37   : > { %561 = vmatprep.mubr.bf16.mxu0 %v1305_v28  ;;  %625 = vmatprep.mubr.bf16.mxu1 %v1307_v29 }
  0x3e   : > { %562 = vmatmul.mubr.bf16.gmra.mrb[12].mxu0 %v1309_v30  ;;  %626 = vmatmul.mubr.bf16.gmra.mrb[12].mxu1 %v1310_v31 }
  0x3f   : > { %569 = vmatprep.mubr.bf16.mxu0 %v1311_v32  ;;  %633 = vmatprep.mubr.bf16.mxu1 %v1313_v33 }
  0x46   : > { %570 = vmatmul.mubr.bf16.gmra.mrb[16].mxu0 %v1315_v34  ;;  %634 = vmatmul.mubr.bf16.gmra.mrb[16].mxu1 %v1316_v35 }
  0x47   : > { %577 = vmatprep.mubr.bf16.mxu0 %v1317_v36  ;;  %641 = vmatprep.mubr.bf16.mxu1 %v1319_v37 }
  0x4e   : > { %578 = vmatmul.mubr.bf16.gmra.mrb[20].mxu0 %v1321_v38  ;;  %642 = vmatmul.mubr.bf16.gmra.mrb[20].mxu1 %v1322_v39 }
  0x4f   : > { %585 = vmatprep.mubr.bf16.mxu0 %v1323_v40  ;;  %649 = vmatprep.mubr.bf16.mxu1 %v1325_v41 }
  0x56   : > { %586 = vmatmul.mubr.bf16.gmra.mrb[24].mxu0 %v1327_v42  ;;  %650 = vmatmul.mubr.bf16.gmra.mrb[24].mxu1 %v1328_v43 }
  0x57   : > { %593 = vmatprep.mubr.bf16.mxu0 %v1329_v44  ;;  %657 = vmatprep.mubr.bf16.mxu1 %v1331_v45 }
  0x5e   : > { %594 = vmatmul.mubr.bf16.gmra.mrb[28].mxu0 %v1333_v46  ;;  %658 = vmatmul.mubr.bf16.gmra.mrb[28].mxu1 %v1334_v47 }
  0xf9   : > { %v1151_v48 = vpop.f32.mrb[0].mxu0  ;;  %v1199_v49 = vpop.f32.mrb[0].mxu1 }
  0xfa   : > { %v1152_v51 = vpop.f32.mrb[1].mxu0  ;;  %v1200_v52 = vpop.f32.mrb[1].mxu1 }
  0xfb   : > { %v1153_v53 = vadd.f32 %v1152_v51, %v1151_v48  ;;  %v1201_v54 = vadd.f32 %v1200_v52, %v1199_v49  ;;  %v1154_v55 = vpop.f32.mrb[2].mxu0  ;;  %v1202_v56 = vpop.f32.mrb[2].mxu1 }
  0xfc   : > { %v1155_v57 = vpop.f32.mrb[3].mxu0  ;;  %v1203_v58 = vpop.f32.mrb[3].mxu1 }
  0xfd   : > { %v540_v59 = vadd.f32 %v1153_v53, %v1462_v50  ;;  %v604_v60 = vadd.f32 %v1201_v54, %v1462_v50  ;;  %v1156_v61 = vadd.f32 %v1155_v57, %v1154_v55  ;;  %v1204_v62 = vadd.f32 %v1203_v58, %v1202_v56 }
  0xff   : > { %v543_v63 = vadd.f32 %v1156_v61, %v1462_v50  ;;  %v607_v0 = vadd.f32 %v1204_v62, %v1462_v50  ;;  %v666_v1 = vmax.f32 %v540_v59, 0.0  ;;  %v682_v2 = vmax.f32 %v604_v60, 0.0 }
 0x101   : > { %v667_v3 = vmax.f32 %v543_v63, 0.0  ;;  %v683_v4 = vmax.f32 %v607_v0, 0.0  ;;  %v1157_v5 = vpop.f32.mrb[4].mxu0  ;;  %v1205_v6 = vpop.f32.mrb[4].mxu1 }
 0x102   : > { %v1158_v7 = vpop.f32.mrb[5].mxu0  ;;  %v1206_v8 = vpop.f32.mrb[5].mxu1 }
 0x103   : > { %v1043_v9 = vpack.c.bf16 %v667_v3, %v666_v1  ;;  %v1083_v10 = vpack.c.bf16 %v683_v4, %v682_v2  ;;  %v1159_v11 = vadd.f32 %v1158_v7, %v1157_v5  ;;  %v1207_v12 = vadd.f32 %v1206_v8, %v1205_v6  ;;  %v1160_v13 = vpop.f32.mrb[6].mxu0  ;;  %v1208_v14 = vpop.f32.mrb[6].mxu1 }
 0x104   : > { %v1161_v15 = vpop.f32.mrb[7].mxu0  ;;  %v1209_v16 = vpop.f32.mrb[7].mxu1 }
 0x105   : > { %1044 = vst [vmem:[%s1472_s4] sm:$0xff] %v1043_v9   ;;  %1127 = vst [vmem:[%s1472_s4 + $0x40] sm:$0xff] %v1083_v10   ;;  %v548_v17 = vadd.f32 %v1159_v11, %v1462_v50  ;;  %v612_v18 = vadd.f32 %v1207_v12, %v1462_v50  ;;  %v1162_v19 = vadd.f32 %v1161_v15, %v1160_v13 }
 0x106   : > { %v1210_v20 = vadd.f32 %v1209_v16, %v1208_v14 }
 0x107   : > { %v551_v21 = vadd.f32 %v1162_v19, %v1462_v50  ;;  %v668_v23 = vmax.f32 %v548_v17, 0.0  ;;  %v684_v24 = vmax.f32 %v612_v18, 0.0 }
 0x108   : > { %v615_v22 = vadd.f32 %v1210_v20, %v1462_v50 }
 0x109   : > { %v669_v25 = vmax.f32 %v551_v21, 0.0  ;;  %v1163_v27 = vpop.f32.mrb[8].mxu0  ;;  %v1211_v28 = vpop.f32.mrb[8].mxu1 }
 0x10a   : > { %v685_v26 = vmax.f32 %v615_v22, 0.0  ;;  %v1164_v29 = vpop.f32.mrb[9].mxu0  ;;  %v1212_v30 = vpop.f32.mrb[9].mxu1 }
 0x10b   : > { %v1048_v31 = vpack.c.bf16 %v669_v25, %v668_v23  ;;  %v1165_v33 = vadd.f32 %v1164_v29, %v1163_v27  ;;  %v1213_v34 = vadd.f32 %v1212_v30, %v1211_v28  ;;  %v1166_v35 = vpop.f32.mrb[10].mxu0  ;;  %v1214_v36 = vpop.f32.mrb[10].mxu1 }
 0x10c   : > { %v1088_v32 = vpack.c.bf16 %v685_v26, %v684_v24  ;;  %v1167_v37 = vpop.f32.mrb[11].mxu0  ;;  %v1215_v38 = vpop.f32.mrb[11].mxu1 }
 0x10d   : > { %1120 = vst [vmem:[%s1472_s4 + $0x8] sm:$0xff] %v1048_v31   ;;  %v556_v39 = vadd.f32 %v1165_v33, %v1462_v50  ;;  %v620_v40 = vadd.f32 %v1213_v34, %v1462_v50  ;;  %v1168_v41 = vadd.f32 %v1167_v37, %v1166_v35  ;;  %v1216_v42 = vadd.f32 %v1215_v38, %v1214_v36 }
 0x10e   : > { %1128 = vst [vmem:[%s1472_s4 + $0x48] sm:$0xff] %v1088_v32  }
 0x10f   : > { %v559_v43 = vadd.f32 %v1168_v41, %v1462_v50  ;;  %v623_v44 = vadd.f32 %v1216_v42, %v1462_v50  ;;  %v670_v45 = vmax.f32 %v556_v39, 0.0  ;;  %v686_v46 = vmax.f32 %v620_v40, 0.0 }
 0x111   : > { %v671_v47 = vmax.f32 %v559_v43, 0.0  ;;  %v687_v48 = vmax.f32 %v623_v44, 0.0  ;;  %v1169_v49 = vpop.f32.mrb[12].mxu0  ;;  %v1217_v51 = vpop.f32.mrb[12].mxu1 }
 0x112   : > { %v1170_v52 = vpop.f32.mrb[13].mxu0  ;;  %v1218_v53 = vpop.f32.mrb[13].mxu1 }
 0x113   : > { %v1053_v54 = vpack.c.bf16 %v671_v47, %v670_v45  ;;  %v1093_v55 = vpack.c.bf16 %v687_v48, %v686_v46  ;;  %v1171_v56 = vadd.f32 %v1170_v52, %v1169_v49  ;;  %v1219_v57 = vadd.f32 %v1218_v53, %v1217_v51  ;;  %v1172_v58 = vpop.f32.mrb[14].mxu0  ;;  %v1220_v59 = vpop.f32.mrb[14].mxu1 }
 0x114   : > { %v1173_v60 = vpop.f32.mrb[15].mxu0  ;;  %v1221_v61 = vpop.f32.mrb[15].mxu1 }
 0x115   : > { %1121 = vst [vmem:[%s1472_s4 + $0x10] sm:$0xff] %v1053_v54   ;;  %1129 = vst [vmem:[%s1472_s4 + $0x50] sm:$0xff] %v1093_v55   ;;  %v564_v62 = vadd.f32 %v1171_v56, %v1462_v50  ;;  %v628_v63 = vadd.f32 %v1219_v57, %v1462_v50  ;;  %v1174_v0 = vadd.f32 %v1173_v60, %v1172_v58 }
 0x116   : > { %v1222_v1 = vadd.f32 %v1221_v61, %v1220_v59 }
 0x117   : > { %v567_v2 = vadd.f32 %v1174_v0, %v1462_v50  ;;  %v672_v4 = vmax.f32 %v564_v62, 0.0  ;;  %v688_v5 = vmax.f32 %v628_v63, 0.0 }
 0x118   : > { %v631_v3 = vadd.f32 %v1222_v1, %v1462_v50 }
 0x119   : > { %v673_v6 = vmax.f32 %v567_v2, 0.0  ;;  %v1175_v8 = vpop.f32.mrb[16].mxu0  ;;  %v1223_v9 = vpop.f32.mrb[16].mxu1 }
 0x11a   : > { %v689_v7 = vmax.f32 %v631_v3, 0.0  ;;  %v1176_v10 = vpop.f32.mrb[17].mxu0  ;;  %v1224_v11 = vpop.f32.mrb[17].mxu1 }
 0x11b   : > { %v1058_v12 = vpack.c.bf16 %v673_v6, %v672_v4  ;;  %v1177_v14 = vadd.f32 %v1176_v10, %v1175_v8  ;;  %v1225_v15 = vadd.f32 %v1224_v11, %v1223_v9  ;;  %v1178_v16 = vpop.f32.mrb[18].mxu0  ;;  %v1226_v17 = vpop.f32.mrb[18].mxu1 }
 0x11c   : > { %v1098_v13 = vpack.c.bf16 %v689_v7, %v688_v5  ;;  %v1179_v18 = vpop.f32.mrb[19].mxu0  ;;  %v1227_v19 = vpop.f32.mrb[19].mxu1 }
 0x11d   : > { %1122 = vst [vmem:[%s1472_s4 + $0x18] sm:$0xff] %v1058_v12   ;;  %v572_v20 = vadd.f32 %v1177_v14, %v1462_v50  ;;  %v636_v21 = vadd.f32 %v1225_v15, %v1462_v50  ;;  %v1180_v22 = vadd.f32 %v1179_v18, %v1178_v16  ;;  %v1228_v23 = vadd.f32 %v1227_v19, %v1226_v17 }
 0x11e   : > { %1130 = vst [vmem:[%s1472_s4 + $0x58] sm:$0xff] %v1098_v13  }
 0x11f   : > { %v575_v24 = vadd.f32 %v1180_v22, %v1462_v50  ;;  %v639_v25 = vadd.f32 %v1228_v23, %v1462_v50  ;;  %v674_v26 = vmax.f32 %v572_v20, 0.0  ;;  %v690_v27 = vmax.f32 %v636_v21, 0.0 }
 0x121   : > { %v675_v28 = vmax.f32 %v575_v24, 0.0  ;;  %v691_v29 = vmax.f32 %v639_v25, 0.0  ;;  %v1181_v30 = vpop.f32.mrb[20].mxu0  ;;  %v1229_v31 = vpop.f32.mrb[20].mxu1 }
 0x122   : > { %v1182_v32 = vpop.f32.mrb[21].mxu0  ;;  %v1230_v33 = vpop.f32.mrb[21].mxu1 }
 0x123   : > { %v1063_v34 = vpack.c.bf16 %v675_v28, %v674_v26  ;;  %v1103_v35 = vpack.c.bf16 %v691_v29, %v690_v27  ;;  %v1183_v36 = vadd.f32 %v1182_v32, %v1181_v30  ;;  %v1231_v37 = vadd.f32 %v1230_v33, %v1229_v31  ;;  %v1184_v38 = vpop.f32.mrb[22].mxu0  ;;  %v1232_v39 = vpop.f32.mrb[22].mxu1 }
 0x124   : > { %v1185_v40 = vpop.f32.mrb[23].mxu0  ;;  %v1233_v41 = vpop.f32.mrb[23].mxu1 }
 0x125   : > { %1123 = vst [vmem:[%s1472_s4 + $0x20] sm:$0xff] %v1063_v34   ;;  %1131 = vst [vmem:[%s1472_s4 + $0x60] sm:$0xff] %v1103_v35   ;;  %v580_v42 = vadd.f32 %v1183_v36, %v1462_v50  ;;  %v644_v43 = vadd.f32 %v1231_v37, %v1462_v50  ;;  %v1186_v44 = vadd.f32 %v1185_v40, %v1184_v38 }
 0x126   : > { %v1234_v45 = vadd.f32 %v1233_v41, %v1232_v39 }
 0x127   : > { %v583_v46 = vadd.f32 %v1186_v44, %v1462_v50  ;;  %v676_v48 = vmax.f32 %v580_v42, 0.0  ;;  %v692_v49 = vmax.f32 %v644_v43, 0.0 }
 0x128   : > { %v647_v47 = vadd.f32 %v1234_v45, %v1462_v50 }
 0x129   : > { %v677_v51 = vmax.f32 %v583_v46, 0.0  ;;  %v1187_v53 = vpop.f32.mrb[24].mxu0  ;;  %v1235_v54 = vpop.f32.mrb[24].mxu1 }
 0x12a   : > { %v693_v52 = vmax.f32 %v647_v47, 0.0  ;;  %v1188_v55 = vpop.f32.mrb[25].mxu0  ;;  %v1236_v56 = vpop.f32.mrb[25].mxu1 }
 0x12b   : > { %v1068_v57 = vpack.c.bf16 %v677_v51, %v676_v48  ;;  %v1189_v59 = vadd.f32 %v1188_v55, %v1187_v53  ;;  %v1237_v60 = vadd.f32 %v1236_v56, %v1235_v54  ;;  %v1190_v61 = vpop.f32.mrb[26].mxu0  ;;  %v1238_v62 = vpop.f32.mrb[26].mxu1 }
 0x12c   : > { %v1108_v58 = vpack.c.bf16 %v693_v52, %v692_v49  ;;  %v1191_v63 = vpop.f32.mrb[27].mxu0  ;;  %v1239_v0 = vpop.f32.mrb[27].mxu1 }
 0x12d   : > { %1124 = vst [vmem:[%s1472_s4 + $0x28] sm:$0xff] %v1068_v57   ;;  %v588_v1 = vadd.f32 %v1189_v59, %v1462_v50  ;;  %v652_v2 = vadd.f32 %v1237_v60, %v1462_v50  ;;  %v1192_v3 = vadd.f32 %v1191_v63, %v1190_v61  ;;  %v1240_v4 = vadd.f32 %v1239_v0, %v1238_v62 }
 0x12e   : > { %1132 = vst [vmem:[%s1472_s4 + $0x68] sm:$0xff] %v1108_v58  }
 0x12f   : > { %v591_v5 = vadd.f32 %v1192_v3, %v1462_v50  ;;  %v655_v6 = vadd.f32 %v1240_v4, %v1462_v50  ;;  %v678_v7 = vmax.f32 %v588_v1, 0.0  ;;  %v694_v8 = vmax.f32 %v652_v2, 0.0 }
 0x131   : > { %v679_v9 = vmax.f32 %v591_v5, 0.0  ;;  %v695_v10 = vmax.f32 %v655_v6, 0.0  ;;  %v1193_v11 = vpop.f32.mrb[28].mxu0  ;;  %v1241_v12 = vpop.f32.mrb[28].mxu1 }
 0x132   : > { %v1194_v13 = vpop.f32.mrb[29].mxu0  ;;  %v1242_v14 = vpop.f32.mrb[29].mxu1 }
 0x133   : > { %v1073_v15 = vpack.c.bf16 %v679_v9, %v678_v7  ;;  %v1113_v16 = vpack.c.bf16 %v695_v10, %v694_v8  ;;  %v1195_v17 = vadd.f32 %v1194_v13, %v1193_v11  ;;  %v1243_v18 = vadd.f32 %v1242_v14, %v1241_v12  ;;  %v1196_v19 = vpop.f32.mrb[30].mxu0  ;;  %v1244_v20 = vpop.f32.mrb[30].mxu1 }
 0x134   : > { %v1197_v21 = vpop.f32.mrb[31].mxu0  ;;  %v1245_v22 = vpop.f32.mrb[31].mxu1 }
 0x135   : > { %1125 = vst [vmem:[%s1472_s4 + $0x30] sm:$0xff] %v1073_v15   ;;  %1133 = vst [vmem:[%s1472_s4 + $0x70] sm:$0xff] %v1113_v16   ;;  %v596_v23 = vadd.f32 %v1195_v17, %v1462_v50  ;;  %v660_v24 = vadd.f32 %v1243_v18, %v1462_v50  ;;  %v1198_v25 = vadd.f32 %v1197_v21, %v1196_v19 }
 0x136   : > { %v1246_v26 = vadd.f32 %v1245_v22, %v1244_v20 }
 0x137   : > { %v599_v27 = vadd.f32 %v1198_v25, %v1462_v50  ;;  %v680_v29 = vmax.f32 %v596_v23, 0.0  ;;  %v696_v30 = vmax.f32 %v660_v24, 0.0 }
 0x138   : > { %v663_v28 = vadd.f32 %v1246_v26, %v1462_v50 }
 0x139   : > { %v681_v31 = vmax.f32 %v599_v27, 0.0 }
 0x13a   : > { %v697_v32 = vmax.f32 %v663_v28, 0.0 }
 0x13b   : > { %v1078_v33 = vpack.c.bf16 %v681_v31, %v680_v29 }
 0x13c   : > { %v1118_v34 = vpack.c.bf16 %v697_v32, %v696_v30 }
 0x13d   : > { %1126 = vst [vmem:[%s1472_s4 + $0x38] sm:$0xff] %v1078_v33  }
 0x13e   : > { %1134 = vst [vmem:[%s1472_s4 + $0x78] sm:$0xff] %v1118_v34  }
 0x13f PF: > { %s13_s12 = sadd.s32 1, %s1341_s12  }
 0x140   : > { %p10_p4 = scmp.ge.s32.totalorder %s13_s12, 4  }
 0x142   :  { %12 = sbr.rel (!%p10_p4) target bundleno = 1 (0x1), region = 62 }

// kernel: bigtail11i_forward.13
= control target key start
LH: loop header
LB: loop body
LE: loop exit
PB: predicated region body
PF: predicated region fallthrough
CT: control target
= control target key end

     0   :  { %s285_s6 = smov 0   ;;  %s306_s0 = inlined_call_operand.vmem [shape: bf16[8,2,4,256], index: 0, kind: input, shape index: {}]   ;;  %s307_s1 = inlined_call_operand.vmem [shape: bf16[8,4,128], index: 1, kind: output, shape index: {}]  }
   0x1 LB: > { %s227_s7 = sadd.s32 4294967295, %s273_s6   ;;  %p231_p0 = scmp.ge.s32.totalorder %s273_s6, 1  ;;  %s273_s6 = sphi %s285_s6, %s11_s6  }
   0x2   : > { %p89_p1 = scmp.lt.s32.totalorder %s273_s6, 3 }
   0x4   : > { %p90_p2 = pnand %p231_p0, %p89_p1 }
   0x5   : > { %s232_s8 = sshll.u32 (!%p90_p2), %s227_s7, 2 }
   0x6   : > { %93 = sbr.rel (%p90_p2) target bundleno = 31 (0x1f), region = 24  ;;  %p111_p3 = scmp.lt.s32.totalorder (!%p90_p2), %s232_s8, 7 }
   0xd   : > { %s309_s8 = smov (!%p111_p3, %s232_s8), 7 }
   0xe   : > { %s239_s9 = sshll.u32 %s309_s8, 3  ;;  %s236_s13 = sshll.u32 %s309_s8, 1 }
   0xf   : > { %s115_s12 = scalar_lea.vmem %s306_s0, %s239_s9  ;;  %s121_s16 = scalar_lea.vmem %s307_s1, %s236_s13 }
  0x10   : > { %v241_v0 = vld [vmem:[%s115_s12] sm:$0xff]   ;;  %v256_v1 = vld [vmem:[%s115_s12 + $0x8] sm:$0xff]   ;;  %v257_v2 = vld [vmem:[%s115_s12 + $0x10] sm:$0xff]  }
  0x11   : > { %v242_v3 = vunpack.c.l.bf16 %v241_v0  ;;  %v243_v4 = vunpack.c.h.bf16 %v241_v0  ;;  %v246_v5 = vunpack.c.l.bf16 %v256_v1  ;;  %v247_v6 = vunpack.c.h.bf16 %v256_v1  ;;  %v258_v7 = vld [vmem:[%s115_s12 + $0x18] sm:$0xff]  }
  0x12   : > { %v250_v8 = vunpack.c.l.bf16 %v257_v2  ;;  %v251_v9 = vunpack.c.h.bf16 %v257_v2  ;;  %v254_v10 = vunpack.c.l.bf16 %v258_v7  ;;  %v255_v11 = vunpack.c.h.bf16 %v258_v7 }
  0x13   : > { %v139_v12 = vadd.f32 %v243_v4, %v242_v3  ;;  %v140_v13 = vadd.f32 %v247_v6, %v246_v5 }
  0x14   : > { %v141_v14 = vadd.f32 %v251_v9, %v250_v8  ;;  %v142_v15 = vadd.f32 %v255_v11, %v254_v10 }
  0x15   : > { %v147_v16 = vrot.slane %v139_v12, 4  ;;  %v148_v17 = vrot.slane %v140_v13, 4 }
  0x16   : > { %v149_v18 = vrot.slane %v141_v14, 4  ;;  %v150_v19 = vrot.slane %v142_v15, 4 }
  0x17   : > { %v155_v20 = vadd.f32 %v147_v16, %v139_v12  ;;  %v156_v21 = vadd.f32 %v148_v17, %v140_v13 }
  0x18   : > { %v157_v22 = vadd.f32 %v149_v18, %v141_v14  ;;  %v158_v23 = vadd.f32 %v150_v19, %v142_v15 }
  0x19   : > { %v159_v24 = vmul.f32 0.25, %v155_v20  ;;  %v160_v25 = vmul.f32 0.25, %v156_v21 }
  0x1a   : > { %v161_v26 = vmul.f32 0.25, %v157_v22  ;;  %v162_v27 = vmul.f32 0.25, %v158_v23 }
  0x1b   : > { %v163_v28 = vpack.c.bf16 %v159_v24, %v159_v24  ;;  %v164_v29 = vpack.c.bf16 %v160_v25, %v160_v25 }
  0x1c   : > { %v165_v30 = vpack.c.bf16 %v161_v26, %v161_v26  ;;  %v166_v31 = vpack.c.bf16 %v162_v27, %v162_v27 }
  0x1d   : > { %167 = vst [vmem:[%s121_s16] sm:$0x3] %v163_v28  ;;  %168 = vst [vmem:[%s121_s16 + $0x2] sm:$0x3] %v164_v29 }
  0x1e   : > { %169 = vst [vmem:[%s121_s16 + $0x4] sm:$0x3] %v165_v30  ;;  %170 = vst [vmem:[%s121_s16 + $0x6] sm:$0x3] %v166_v31 }
  0x1f PF: > { %s11_s6 = sadd.s32 1, %s273_s6  }
  0x20   : > { %p8_p4 = scmp.ge.s32.totalorder %s11_s6, 4  }
  0x22   :  { %10 = sbr.rel (!%p8_p4) target bundleno = 1 (0x1), region = 54 }

// kernel: bigtail11i_forward.16
= control target key start
LH: loop header
LB: loop body
LE: loop exit
PB: predicated region body
PF: predicated region fallthrough
CT: control target
= control target key end

     0   :  { %s228_s6 = smov 0   ;;  %s245_s0 = inlined_call_operand.vmem [shape: bf16[4,2,2,256], index: 0, kind: input, shape index: {}]   ;;  %s246_s1 = inlined_call_operand.vmem [shape: bf16[4,2,128], index: 1, kind: output, shape index: {}]  }
   0x1 LB: > { %s192_s7 = sadd.s32 4294967295, %s216_s6   ;;  %p196_p0 = scmp.ge.s32.totalorder %s216_s6, 1  ;;  %s216_s6 = sphi %s228_s6, %s11_s6  }
   0x2   : > { %p88_p1 = scmp.lt.s32.totalorder %s216_s6, 3 }
   0x4   : > { %p89_p2 = pnand %p196_p0, %p88_p1 }
   0x5   : > { %s197_s8 = sshll.u32 (!%p89_p2), %s192_s7, 1 }
   0x6   : > { %92 = sbr.rel (%p89_p2) target bundleno = 31 (0x1f), region = 24  ;;  %p108_p3 = scmp.lt.s32.totalorder (!%p89_p2), %s197_s8, 3 }
   0xd   : > { %s248_s8 = smov (!%p108_p3, %s197_s8), 3 }
   0xe   : > { %s198_s9 = sshll.u32 %s248_s8, 2  ;;  %s116_s15 = scalar_lea.vmem %s246_s1, %s248_s8 }
   0xf   : > { %s111_s12 = scalar_lea.vmem %s245_s0, %s198_s9 }
  0x10   : > { %v118_v0 = vld [vmem:[%s111_s12] sm:$0x3]  ;;  %v119_v1 = vld [vmem:[%s111_s12 + $0x2] sm:$0x3]  ;;  %v120_v2 = vld [vmem:[%s111_s12 + $0x4] sm:$0x3] }
  0x11   : > { %v121_v3 = vld [vmem:[%s111_s12 + $0x6] sm:$0x3]  ;;  %v122_v4 = vunpack.c.l.bf16 %v118_v0  ;;  %v123_v5 = vunpack.c.l.bf16 %v119_v1  ;;  %v124_v6 = vunpack.c.l.bf16 %v120_v2 }
  0x12   : > { %v125_v7 = vunpack.c.l.bf16 %v121_v3 }
  0x13   : > { %v126_v8 = vadd.f32 %v123_v5, %v122_v4 }
  0x14   : > { %v127_v9 = vadd.f32 %v125_v7, %v124_v6 }
  0x15   : > { %v130_v10 = vrot.slane %v126_v8, 2 }
  0x16   : > { %v131_v11 = vrot.slane %v127_v9, 2 }
  0x17   : > { %v134_v12 = vadd.f32 %v130_v10, %v126_v8 }
  0x18   : > { %v135_v13 = vadd.f32 %v131_v11, %v127_v9 }
  0x19   : > { %v136_v14 = vmul.f32 0.25, %v134_v12 }
  0x1a   : > { %v137_v15 = vmul.f32 0.25, %v135_v13 }
  0x1b   : > { %v138_v16 = vpack.c.bf16 %v136_v14, %v136_v14 }
  0x1c   : > { %v139_v17 = vpack.c.bf16 %v137_v15, %v137_v15 }
  0x1d   : > { %140 = vst [vmem:[%s116_s15] sm:$0x1] %v138_v16 }
  0x1e   : > { %141 = vst [vmem:[%s116_s15 + $0x1] sm:$0x1] %v139_v17 }
  0x1f PF: > { %s11_s6 = sadd.s32 1, %s216_s6  }
  0x20   : > { %p8_p4 = scmp.ge.s32.totalorder %s11_s6, 4  }
  0x22   :  { %10 = sbr.rel (!%p8_p4) target bundleno = 1 (0x1), region = 54 }

// kernel: bigtail11i_forward.14
= control target key start
LH: loop header
LB: loop body
LE: loop exit
PB: predicated region body
PF: predicated region fallthrough
CT: control target
= control target key end

     0   :  { %s2540_s12 = smov 0   ;;  %s2542_s13 = smov 0   ;;  %s2842_s0 = inlined_call_operand.vmem [shape: bf16[6,4,8,128], index: 0, kind: input, shape index: {}]   ;;  %s2843_s1 = inlined_call_operand.vmem [shape: bf16[3,3,128,128], index: 1, kind: input, shape index: {}]   ;;  %s2844_s2 = inlined_call_operand.vmem [shape: f32[1,128], index: 2, kind: input, shape index: {}]   ;;  %s2845_s3 = inlined_call_operand.vmem [shape: bf16[2,4,4,128], index: 3, kind: output, shape index: {}]  }
   0x1   :  { %s2544_s14 = smov 0   ;;  %s2546_s15 = smov 0  }
   0x2   :  { %s2548_s16 = smov 0  }
   0x3 LB: > { %s25_s17 = sadd.s32 1, %s2507_s14  ;;  %s32_s18 = sadd.s32 1, %s2511_s15  ;;  %s2515_s16 = sphi %s2548_s16, %s13_s16   ;;  %s2511_s15 = sphi %s2546_s15, %s2849_s15   ;;  %s2507_s14 = sphi %s2544_s14, %s2848_s14   ;;  %s2503_s13 = sphi %s2542_s13, %s2847_s13   ;;  %s2499_s12 = sphi %s2540_s12, %s2846_s12  }
   0x4   : > { %p26_p0 = scmp.ge.s32.totalorder %s25_s17, 3  ;;  %p1726_p1 = scmp.ge.s32.totalorder %s2515_s16, 1 }
   0x5   : > { %p183_p2 = scmp.lt.s32.totalorder %s2515_s16, 7 }
   0x6   : > { %s2851_s17 = smov (%p26_p0, %s25_s17), 0  ;;  %s2853_s18 = smov (!%p26_p0, %s32_s18), %s2511_s15 }
   0x7   : > { %p184_p3 = pnand %p1726_p1, %p183_p2  ;;  %p34_p4 = scmp.ge.s32.totalorder %s2853_s18, 2 }
   0x8   : > { %s1727_s19 = sshll.u32 (!%p184_p3), %s2499_s12, 1  ;;  %p236_p5 = scmp.lt.s32.totalorder (!%p184_p3), %s2499_s12, 2 }
   0x9   : > { %s2855_s18 = smov (%p34_p4, %s2853_s18), 0  ;;  %187 = sbr.rel (%p184_p3) target bundleno = 454 (0x1c6), region = 32 }
   0xa   : > { %s223_s20 = sadd.s32 (!%p184_p3), %s2503_s13, %s1727_s19  ;;  %p242_p7 = scmp.lt.s32.totalorder (!%p184_p3), %s2503_s13, 1 }
   0xb   : > { %p225_p6 = scmp.lt.s32.totalorder (!%p184_p3), %s223_s20, 5  ;;  %p1733_p8 = scmp.ne.s32.totalorder (!%p184_p3), %s2499_s12, 0 }
  0x10   : > { %s237_s21 = scalar_select %p236_p5, %s2499_s12, 2 }
  0x11   : > { %s2857_s20 = smov (!%p225_p6, %s223_s20), 5  ;;  %s2859_s13 = smov (!%p242_p7, %s2503_s13), 1 }
  0x12   : > { %s2329_s22 = smul.u32 192, %s237_s21  ;;  %s1979_s23 = sshll.u32 %s2857_s20, 4  ;;  %v2517_v0 = vmov (!%p1733_p8), 0.0  }
  0x13   : > { %s2578_s26 = scalar_lea.vmem %s2842_s0, %s1979_s23  ;;  %s1980_s30 = sshll.u32 %s2859_s13, 3  ;;  %256 = vst [vmem:[#allocation2] sm:$0xf] (!%p1733_p8), %v2517_v0  ;;  %257 = vst [vmem:[#allocation2 + $0x4] sm:$0xf] (!%p1733_p8), %v2517_v0 }
  0x14   : > { %s2583_s29 = scalar_lea.vmem %s2843_s1, %s2329_s22  ;;  %s2588_s6 = scalar_lea.vmem %s2845_s3, %s1980_s30  ;;  %258 = vst [vmem:[#allocation2 + $0x8] sm:$0xf] (!%p1733_p8), %v2517_v0  ;;  %259 = vst [vmem:[#allocation2 + $0xc] sm:$0xf] (!%p1733_p8), %v2517_v0 }
  0x15   : > { %255 = sbr.rel (%p1733_p8) target bundleno = 28 (0x1c), region = 36 }
  0x1c PF: > { %v2373_v1 = vld [vmem:[%s2583_s29 + $0x40] sm:$0xff]   ;;  %v2518_v2 = vmov 0.0   ;;  %v2375_v4 = vld [vmem:[%s2583_s29 + $0x48] sm:$0xff]   ;;  %vm2519_vm0 = vmmov 0   ;;  %v2377_v6 = vld [vmem:[%s2583_s29 + $0x50] sm:$0xff]   ;;  %p1975_p9 = scmp.ne.s32.totalorder %s2499_s12, 2 }
  0x1d   : > { %2089 = vmatprep.subr.bf16.mxu0 %v2518_v2  ;;  %2109 = vmatprep.subr.bf16.mxu1 %v2518_v2  ;;  %v2374_v3 = vld [vmem:[%s2583_s29] sm:$0xff]   ;;  %v2376_v5 = vld [vmem:[%s2583_s29 + $0x8] sm:$0xff]   ;;  %v2378_v7 = vld [vmem:[%s2583_s29 + $0x10] sm:$0xff]  }
  0x1e   : > { %2090 = vmatpush3.bf16.msra.mxu0 %v2373_v1  ;;  %2105 = vmatprep.mubr.msk.bf16.mxu0 %vm2519_vm0, %v2518_v2  ;;  %v2379_v8 = vld [vmem:[%s2583_s29 + $0x58] sm:$0xff]   ;;  %v2381_v10 = vld [vmem:[%s2583_s29 + $0x60] sm:$0xff]   ;;  %v2383_v12 = vld [vmem:[%s2583_s29 + $0x68] sm:$0xff]  }
  0x1f   : > { %2110 = vmatpush3.bf16.msra.mxu1 %v2374_v3  ;;  %2091 = vmatprep.subr.bf16.mxu0 %v2518_v2  ;;  %v2380_v9 = vld [vmem:[%s2583_s29 + $0x18] sm:$0xff]   ;;  %v2382_v11 = vld [vmem:[%s2583_s29 + $0x20] sm:$0xff]   ;;  %v2384_v13 = vld [vmem:[%s2583_s29 + $0x28] sm:$0xff]  }
  0x20   : > { %2111 = vmatprep.subr.bf16.mxu1 %v2518_v2  ;;  %2125 = vmatprep.mubr.msk.bf16.mxu1 %vm2519_vm0, %v2518_v2  ;;  %v2385_v14 = vld [vmem:[%s2583_s29 + $0x70] sm:$0xff]   ;;  %v2389_v16 = vld [vmem:[%s2578_s26] ss:$0 sps:$4 sm:$0x66]   ;;  %v2387_v17 = vld [vmem:[%s2583_s29 + $0x78] sm:$0xff]  }
  0x21   : > { %v2386_v15 = vld [vmem:[%s2583_s29 + $0x30] sm:$0xff]   ;;  %v2388_v18 = vld [vmem:[%s2583_s29 + $0x38] sm:$0xff]   ;;  %v298_v19 = vrot.slane %v2389_v16, 1  ;;  %v2390_v20 = vld [vmem:[%s2583_s29 + $0x80] sm:$0xff]  }
  0x22   : > { %2092 = vmatpush3.bf16.msra.mxu0 %v2375_v4  ;;  %v260_v21 = vld [vmem:[%s2578_s26] sm:$0x3]  ;;  %v2392_v23 = vld [vmem:[%s2583_s29 + $0x88] sm:$0xff]   ;;  %v2394_v25 = vld [vmem:[%s2583_s29 + $0x90] sm:$0xff]  }
  0x23   : > { %2112 = vmatpush3.bf16.msra.mxu1 %v2376_v5  ;;  %2093 = vmatprep.subr.bf16.mxu0 %v2518_v2  ;;  %v2391_v22 = vld [vmem:[%s2583_s29 + $0x40] sm:$0xff]   ;;  %v2393_v24 = vld [vmem:[%s2583_s29 + $0x48] sm:$0xff]   ;;  %v2395_v26 = vld [vmem:[%s2583_s29 + $0x50] sm:$0xff]  }
  0x24   : > { %2113 = vmatprep.subr.bf16.mxu1 %v2518_v2  ;;  %v2396_v27 = vld [vmem:[%s2583_s29 + $0x98] sm:$0xff]   ;;  %v2398_v29 = vld [vmem:[%s2583_s29 + $0xa0] sm:$0xff]   ;;  %v2400_v31 = vld [vmem:[%s2583_s29 + $0xa8] sm:$0xff]  }
  0x25   : > { %v2397_v28 = vld [vmem:[%s2583_s29 + $0x58] sm:$0xff]   ;;  %v2399_v30 = vld [vmem:[%s2583_s29 + $0x60] sm:$0xff]   ;;  %v2401_v32 = vld [vmem:[%s2583_s29 + $0x68] sm:$0xff]  }
  0x26   : > { %2094 = vmatpush3.bf16.msra.mxu0 %v2377_v6  ;;  %v2402_v33 = vld [vmem:[%s2583_s29 + $0xb0] sm:$0xff]   ;;  %v2406_v35 = vld [vmem:[%s2578_s26] ss:$0 sps:$4 sm:$0xcc]   ;;  %v2404_v37 = vld [vmem:[%s2583_s29 + $0xb8] sm:$0xff]  }
  0x27   : > { %2114 = vmatpush3.bf16.msra.mxu1 %v2378_v7  ;;  %2095 = vmatprep.subr.bf16.mxu0 %v2518_v2  ;;  %v2403_v34 = vld [vmem:[%s2583_s29 + $0x70] sm:$0xff]   ;;  %v2407_v36 = vld [vmem:[%s2578_s26 + $0x4] ss:$0 sps:$4 sm:$0x66]   ;;  %v2405_v38 = vld [vmem:[%s2583_s29 + $0x78] sm:$0xff]   ;;  %v497_v39 = vrot.slane %v2406_v35, 2 }
  0x28   : > { %2115 = vmatprep.subr.bf16.mxu1 %v2518_v2  ;;  %v629_v40 = vrot.slane %v2407_v36, 1  ;;  %v2408_v41 = vld [vmem:[%s2583_s29] sm:$0xff]   ;;  %v2410_v43 = vld [vmem:[%s2583_s29 + $0x8] sm:$0xff]   ;;  %v2412_v45 = vld [vmem:[%s2583_s29 + $0x10] sm:$0xff]  }
  0x29   : > { %v2409_v42 = vld [vmem:[%s2583_s29 + $0x80] sm:$0xff]   ;;  %v2411_v44 = vld [vmem:[%s2583_s29 + $0x88] sm:$0xff]   ;;  %v2413_v46 = vld [vmem:[%s2583_s29 + $0x90] sm:$0xff]  }
  0x2a   : > { %2096 = vmatpush3.bf16.msra.mxu0 %v2379_v8  ;;  %v2414_v47 = vld [vmem:[%s2583_s29 + $0x18] sm:$0xff]   ;;  %v2416_v49 = vld [vmem:[%s2583_s29 + $0x20] sm:$0xff]   ;;  %v2418_v51 = vld [vmem:[%s2583_s29 + $0x28] sm:$0xff]  }
  0x2b   : > { %2116 = vmatpush3.bf16.msra.mxu1 %v2380_v9  ;;  %2097 = vmatprep.subr.bf16.mxu0 %v2518_v2  ;;  %v2415_v48 = vld [vmem:[%s2583_s29 + $0x98] sm:$0xff]   ;;  %v2417_v50 = vld [vmem:[%s2583_s29 + $0xa0] sm:$0xff]   ;;  %v2419_v52 = vld [vmem:[%s2583_s29 + $0xa8] sm:$0xff]  }
  0x2c   : > { %2117 = vmatprep.subr.bf16.mxu1 %v2518_v2  ;;  %v2420_v53 = vld [vmem:[%s2583_s29 + $0x30] sm:$0xff]   ;;  %v2424_v55 = vld [vmem:[%s2578_s26 + $0x4] ss:$0 sps:$4 sm:$0xcc]   ;;  %v2422_v56 = vld [vmem:[%s2583_s29 + $0x38] sm:$0xff]  }
  0x2d   : > { %v2421_v54 = vld [vmem:[%s2583_s29 + $0xb0] sm:$0xff]   ;;  %v2423_v57 = vld [vmem:[%s2583_s29 + $0xb8] sm:$0xff]   ;;  %v1792_v58 = vld [vmem:[%s2578_s26 + $0x4] sm:$0x3]  ;;  %v827_v59 = vrot.slane %v2424_v55, 2 }
  0x2e   : > { %2098 = vmatpush3.bf16.msra.mxu0 %v2381_v10  ;;  %v2425_v60 = vld [vmem:[%s2583_s29 + $0x40] sm:$0xff]   ;;  %v2427_v62 = vld [vmem:[%s2583_s29 + $0x48] sm:$0xff]   ;;  %v2429_v0 = vld [vmem:[%s2583_s29 + $0x50] sm:$0xff]  }
  0x2f   : > { %2118 = vmatpush3.bf16.msra.mxu1 %v2382_v11  ;;  %2099 = vmatprep.subr.bf16.mxu0 %v2518_v2  ;;  %v2426_v61 = vld [vmem:[%s2583_s29] sm:$0xff]   ;;  %v2428_v63 = vld [vmem:[%s2583_s29 + $0x8] sm:$0xff]   ;;  %v2430_v1 = vld [vmem:[%s2583_s29 + $0x10] sm:$0xff]  }
  0x30   : > { %2119 = vmatprep.subr.bf16.mxu1 %v2518_v2  ;;  %v2431_v3 = vld [vmem:[%s2583_s29 + $0x58] sm:$0xff]   ;;  %v2433_v5 = vld [vmem:[%s2583_s29 + $0x60] sm:$0xff]   ;;  %v2435_v7 = vld [vmem:[%s2583_s29 + $0x68] sm:$0xff]  }
  0x31   : > { %v2432_v4 = vld [vmem:[%s2583_s29 + $0x18] sm:$0xff]   ;;  %v2434_v6 = vld [vmem:[%s2583_s29 + $0x20] sm:$0xff]   ;;  %v2436_v8 = vld [vmem:[%s2583_s29 + $0x28] sm:$0xff]  }
  0x32   : > { %2100 = vmatpush3.bf16.msra.mxu0 %v2383_v12  ;;  %v2437_v9 = vld [vmem:[%s2583_s29 + $0x70] sm:$0xff]   ;;  %v2441_v11 = vld [vmem:[%s2578_s26 + $0x8] ss:$0 sps:$4 sm:$0x66]   ;;  %v2439_v12 = vld [vmem:[%s2583_s29 + $0x78] sm:$0xff]  }
  0x33   : > { %2120 = vmatpush3.bf16.msra.mxu1 %v2384_v13  ;;  %2101 = vmatprep.subr.bf16.mxu0 %v2518_v2  ;;  %v2438_v10 = vld [vmem:[%s2583_s29 + $0x30] sm:$0xff]   ;;  %v2440_v13 = vld [vmem:[%s2583_s29 + $0x38] sm:$0xff]   ;;  %v1853_v16 = vld [vmem:[%s2578_s26 + $0x8] sm:$0x3] }
  0x34   : > { %2121 = vmatprep.subr.bf16.mxu1 %v2518_v2  ;;  %v2460_v36 = vld [vmem:[%s2583_s29] sm:$0xff]  }
  0x36   : > { %2102 = vmatpush3.bf16.msra.mxu0 %v2385_v14  ;;  %v960_v14 = vrot.slane %v2441_v11, 1 }
  0x37   : > { %2122 = vmatpush3.bf16.msra.mxu1 %v2386_v15  ;;  %2103 = vmatprep.subr.bf16.mxu0 %v2518_v2  ;;  %v2442_v15 = vld [vmem:[%s2583_s29 + $0x80] sm:$0xff]  }
  0x38   : > { %2123 = vmatprep.subr.bf16.mxu1 %v2518_v2 }
  0x3a   : > { %2104 = vmatpush3.bf16.msra.mxu0 %v2387_v17  ;;  %v2443_v17 = vld [vmem:[%s2583_s29 + $0x40] sm:$0xff]  }
  0x3b   : > { %2124 = vmatpush3.bf16.msra.mxu1 %v2388_v18  ;;  %2129 = vmatprep.subr.bf16.mxu0 %v2518_v2  ;;  %v2444_v18 = vld [vmem:[%s2583_s29 + $0x88] sm:$0xff]  }
  0x3c   : > { %2149 = vmatprep.subr.bf16.mxu1 %v2518_v2 }
  0x3d   : > { %2106 = vmatmul.mubr.bf16.vlgmr.msra.gmra.mrb[0].mxu0 %v298_v19  ;;  %v2445_v19 = vld [vmem:[%s2583_s29 + $0x48] sm:$0xff]  }
  0x3e   : > { %2126 = vmatmul.mubr.bf16.vlgmr.msra.gmra.mrb[0].mxu1 %v260_v21  ;;  %2130 = vmatpush3.bf16.msra.mxu0 %v2390_v20  ;;  %v2446_v20 = vld [vmem:[%s2583_s29 + $0x90] sm:$0xff]  }
  0x3f   : > { %2150 = vmatpush3.bf16.msra.mxu1 %v2391_v22  ;;  %2131 = vmatprep.subr.bf16.mxu0 %v2518_v2  ;;  %v2447_v21 = vld [vmem:[%s2583_s29 + $0x50] sm:$0xff]   ;;  %v2448_v22 = vld [vmem:[%s2583_s29 + $0x98] sm:$0xff]  }
  0x40   : > { %2151 = vmatprep.subr.bf16.mxu1 %v2518_v2  ;;  %2145 = vmatprep.mubr.msk.bf16.mxu0 %vm2519_vm0, %v2518_v2 }
  0x41   : > { %2165 = vmatprep.mubr.msk.bf16.mxu1 %vm2519_vm0, %v2518_v2 }
  0x42   : > { %2132 = vmatpush3.bf16.msra.mxu0 %v2392_v23  ;;  %v2449_v23 = vld [vmem:[%s2583_s29 + $0x58] sm:$0xff]  }
  0x43   : > { %2152 = vmatpush3.bf16.msra.mxu1 %v2393_v24  ;;  %2133 = vmatprep.subr.bf16.mxu0 %v2518_v2  ;;  %v2450_v24 = vld [vmem:[%s2583_s29 + $0xa0] sm:$0xff]  }
  0x44   : > { %2153 = vmatprep.subr.bf16.mxu1 %v2518_v2 }
  0x46   : > { %2134 = vmatpush3.bf16.msra.mxu0 %v2394_v25  ;;  %v2451_v25 = vld [vmem:[%s2583_s29 + $0x60] sm:$0xff]  }
  0x47   : > { %2154 = vmatpush3.bf16.msra.mxu1 %v2395_v26  ;;  %2135 = vmatprep.subr.bf16.mxu0 %v2518_v2  ;;  %v2452_v26 = vld [vmem:[%s2583_s29 + $0xa8] sm:$0xff]  }
  0x48   : > { %2155 = vmatprep.subr.bf16.mxu1 %v2518_v2 }
  0x4a   : > { %2136 = vmatpush3.bf16.msra.mxu0 %v2396_v27  ;;  %v2453_v27 = vld [vmem:[%s2583_s29 + $0x68] sm:$0xff]  }
  0x4b   : > { %2156 = vmatpush3.bf16.msra.mxu1 %v2397_v28  ;;  %2137 = vmatprep.subr.bf16.mxu0 %v2518_v2  ;;  %v2454_v28 = vld [vmem:[%s2583_s29 + $0xb0] sm:$0xff]  }
  0x4c   : > { %2157 = vmatprep.subr.bf16.mxu1 %v2518_v2 }
  0x4e   : > { %2138 = vmatpush3.bf16.msra.mxu0 %v2398_v29  ;;  %v2455_v29 = vld [vmem:[%s2583_s29 + $0x70] sm:$0xff]  }
  0x4f   : > { %2158 = vmatpush3.bf16.msra.mxu1 %v2399_v30  ;;  %2139 = vmatprep.subr.bf16.mxu0 %v2518_v2  ;;  %v2458_v30 = vld [vmem:[%s2578_s26 + $0x8] ss:$0 sps:$4 sm:$0xcc]  }
  0x50   : > { %2159 = vmatprep.subr.bf16.mxu1 %v2518_v2 }
  0x52   : > { %2140 = vmatpush3.bf16.msra.mxu0 %v2400_v31  ;;  %v2456_v31 = vld [vmem:[%s2583_s29 + $0xb8] sm:$0xff]  }
  0x53   : > { %2160 = vmatpush3.bf16.msra.mxu1 %v2401_v32  ;;  %2141 = vmatprep.subr.bf16.mxu0 %v2518_v2  ;;  %v2459_v32 = vld [vmem:[%s2578_s26 + $0xc] ss:$0 sps:$4 sm:$0x66]  }
  0x54   : > { %2161 = vmatprep.subr.bf16.mxu1 %v2518_v2  ;;  %v1291_v35 = vrot.slane %v2459_v32, 1 }
  0x56   : > { %2142 = vmatpush3.bf16.msra.mxu0 %v2402_v33  ;;  %v2457_v33 = vld [vmem:[%s2583_s29 + $0x78] sm:$0xff]  }
  0x57   : > { %2162 = vmatpush3.bf16.msra.mxu1 %v2403_v34  ;;  %2143 = vmatprep.subr.bf16.mxu0 %v2518_v2  ;;  %v1158_v34 = vrot.slane %v2458_v30, 2 }
  0x58   : > { %2163 = vmatprep.subr.bf16.mxu1 %v2518_v2 }
  0x5a   : > { %2144 = vmatpush3.bf16.msra.mxu0 %v2404_v37  ;;  %v2461_v37 = vld [vmem:[%s2583_s29 + $0x80] sm:$0xff]  }
  0x5b   : > { %2164 = vmatpush3.bf16.msra.mxu1 %v2405_v38  ;;  %2169 = vmatprep.subr.bf16.mxu0 %v2518_v2  ;;  %v2462_v38 = vld [vmem:[%s2583_s29 + $0x8] sm:$0xff]  }
  0x5c   : > { %2189 = vmatprep.subr.bf16.mxu1 %v2518_v2 }
  0x5d   : > { %2146 = vmatmul.mubr.bf16.vlgmr.msra.gmra.mrb[4].mxu0 %v497_v39  ;;  %v2463_v39 = vld [vmem:[%s2583_s29 + $0x88] sm:$0xff]  }
  0x5e   : > { %2166 = vmatmul.mubr.bf16.vlgmr.msra.gmra.mrb[4].mxu1 %v629_v40  ;;  %2170 = vmatpush3.bf16.msra.mxu0 %v2408_v41  ;;  %v2464_v40 = vld [vmem:[%s2583_s29 + $0x10] sm:$0xff]  }
  0x5f   : > { %2190 = vmatpush3.bf16.msra.mxu1 %v2409_v42  ;;  %2171 = vmatprep.subr.bf16.mxu0 %v2518_v2  ;;  %v2465_v41 = vld [vmem:[%s2583_s29 + $0x90] sm:$0xff]   ;;  %v2466_v42 = vld [vmem:[%s2583_s29 + $0x18] sm:$0xff]  }
  0x60   : > { %2191 = vmatprep.subr.bf16.mxu1 %v2518_v2  ;;  %2185 = vmatprep.mubr.msk.bf16.mxu0 %vm2519_vm0, %v2518_v2 }
  0x61   : > { %2205 = vmatprep.mubr.msk.bf16.mxu1 %vm2519_vm0, %v2518_v2 }
  0x62   : > { %2172 = vmatpush3.bf16.msra.mxu0 %v2410_v43  ;;  %v2467_v43 = vld [vmem:[%s2583_s29 + $0x98] sm:$0xff]  }
  0x63   : > { %2192 = vmatpush3.bf16.msra.mxu1 %v2411_v44  ;;  %2173 = vmatprep.subr.bf16.mxu0 %v2518_v2  ;;  %v2468_v44 = vld [vmem:[%s2583_s29 + $0x20] sm:$0xff]  }
  0x64   : > { %2193 = vmatprep.subr.bf16.mxu1 %v2518_v2 }
  0x66   : > { %2174 = vmatpush3.bf16.msra.mxu0 %v2412_v45  ;;  %v2469_v45 = vld [vmem:[%s2583_s29 + $0xa0] sm:$0xff]  }
  0x67   : > { %2194 = vmatpush3.bf16.msra.mxu1 %v2413_v46  ;;  %2175 = vmatprep.subr.bf16.mxu0 %v2518_v2  ;;  %v2470_v46 = vld [vmem:[%s2583_s29 + $0x28] sm:$0xff]  }
  0x68   : > { %2195 = vmatprep.subr.bf16.mxu1 %v2518_v2 }
  0x6a   : > { %2176 = vmatpush3.bf16.msra.mxu0 %v2414_v47  ;;  %v2471_v47 = vld [vmem:[%s2583_s29 + $0xa8] sm:$0xff]  }
  0x6b   : > { %2196 = vmatpush3.bf16.msra.mxu1 %v2415_v48  ;;  %2177 = vmatprep.subr.bf16.mxu0 %v2518_v2  ;;  %v2472_v48 = vld [vmem:[%s2583_s29 + $0x30] sm:$0xff]  }
  0x6c   : > { %2197 = vmatprep.subr.bf16.mxu1 %v2518_v2 }
  0x6e   : > { %2178 = vmatpush3.bf16.msra.mxu0 %v2416_v49  ;;  %v2473_v49 = vld [vmem:[%s2583_s29 + $0xb0] sm:$0xff]  }
  0x6f   : > { %2198 = vmatpush3.bf16.msra.mxu1 %v2417_v50  ;;  %2179 = vmatprep.subr.bf16.mxu0 %v2518_v2  ;;  %v2474_v50 = vld [vmem:[%s2583_s29 + $0x38] sm:$0xff]  }
  0x70   : > { %2199 = vmatprep.subr.bf16.mxu1 %v2518_v2 }
  0x72   : > { %2180 = vmatpush3.bf16.msra.mxu0 %v2418_v51  ;;  %v2476_v51 = vld [vmem:[%s2578_s26 + $0xc] ss:$0 sps:$4 sm:$0xcc]  }
  0x73   : > { %2200 = vmatpush3.bf16.msra.mxu1 %v2419_v52  ;;  %2181 = vmatprep.subr.bf16.mxu0 %v2518_v2  ;;  %v2475_v52 = vld [vmem:[%s2583_s29 + $0xb8] sm:$0xff]  }
  0x74   : > { %2201 = vmatprep.subr.bf16.mxu1 %v2518_v2 }
  0x76   : > { %2182 = vmatpush3.bf16.msra.mxu0 %v2420_v53  ;;  %v1914_v53 = vld [vmem:[%s2578_s26 + $0xc] sm:$0x3] }
  0x77   : > { %2202 = vmatpush3.bf16.msra.mxu1 %v2421_v54  ;;  %2183 = vmatprep.subr.bf16.mxu0 %v2518_v2  ;;  %v1489_v54 = vrot.slane %v2476_v51, 2 }
  0x78   : > { %2203 = vmatprep.subr.bf16.mxu1 %v2518_v2 }
  0x7a   : > { %2184 = vmatpush3.bf16.msra.mxu0 %v2422_v56 }
  0x7b   : > { %2204 = vmatpush3.bf16.msra.mxu1 %v2423_v57  ;;  %2209 = vmatprep.subr.bf16.mxu0 %v2518_v2 }
  0x7c   : > { %2229 = vmatprep.subr.bf16.mxu1 %v2518_v2 }
  0x7d   : > { %2186 = vmatmul.mubr.bf16.vlgmr.msra.gmra.mrb[8].mxu0 %v1792_v58 }
  0x7e   : > { %2206 = vmatmul.mubr.bf16.vlgmr.msra.gmra.mrb[8].mxu1 %v827_v59  ;;  %2210 = vmatpush3.bf16.msra.mxu0 %v2425_v60 }
  0x7f   : > { %2230 = vmatpush3.bf16.msra.mxu1 %v2426_v61  ;;  %2211 = vmatprep.subr.bf16.mxu0 %v2518_v2 }
  0x80   : > { %2231 = vmatprep.subr.bf16.mxu1 %v2518_v2  ;;  %2225 = vmatprep.mubr.msk.bf16.mxu0 %vm2519_vm0, %v2518_v2 }
  0x81   : > { %2245 = vmatprep.mubr.msk.bf16.mxu1 %vm2519_vm0, %v2518_v2 }
  0x82   : > { %2212 = vmatpush3.bf16.msra.mxu0 %v2427_v62 }
  0x83   : > { %2232 = vmatpush3.bf16.msra.mxu1 %v2428_v63  ;;  %2213 = vmatprep.subr.bf16.mxu0 %v2518_v2 }
  0x84   : > { %2233 = vmatprep.subr.bf16.mxu1 %v2518_v2 }
  0x86   : > { %2214 = vmatpush3.bf16.msra.mxu0 %v2429_v0 }
  0x87   : > { %2234 = vmatpush3.bf16.msra.mxu1 %v2430_v1  ;;  %2215 = vmatprep.subr.bf16.mxu0 %v2518_v2  ;;  %v588_v1 = vld [vmem:[#allocation2] sm:$0xf] }
  0x88   : > { %2235 = vmatprep.subr.bf16.mxu1 %v2518_v2 }
  0x8a   : > { %2216 = vmatpush3.bf16.msra.mxu0 %v2431_v3 }
  0x8b   : > { %2236 = vmatpush3.bf16.msra.mxu1 %v2432_v4  ;;  %2217 = vmatprep.subr.bf16.mxu0 %v2518_v2 }
  0x8c   : > { %2237 = vmatprep.subr.bf16.mxu1 %v2518_v2 }
  0x8e   : > { %2218 = vmatpush3.bf16.msra.mxu0 %v2433_v5 }
  0x8f   : > { %2238 = vmatpush3.bf16.msra.mxu1 %v2434_v6  ;;  %2219 = vmatprep.subr.bf16.mxu0 %v2518_v2 }
  0x90   : > { %2239 = vmatprep.subr.bf16.mxu1 %v2518_v2 }
  0x92   : > { %2220 = vmatpush3.bf16.msra.mxu0 %v2435_v7 }
  0x93   : > { %2240 = vmatpush3.bf16.msra.mxu1 %v2436_v8  ;;  %2221 = vmatprep.subr.bf16.mxu0 %v2518_v2 }
  0x94   : > { %2241 = vmatprep.subr.bf16.mxu1 %v2518_v2 }
  0x96   : > { %2222 = vmatpush3.bf16.msra.mxu0 %v2437_v9 }
  0x97   : > { %2242 = vmatpush3.bf16.msra.mxu1 %v2438_v10  ;;  %2223 = vmatprep.subr.bf16.mxu0 %v2518_v2 }
  0x98   : > { %2243 = vmatprep.subr.bf16.mxu1 %v2518_v2 }
  0x9a   : > { %2224 = vmatpush3.bf16.msra.mxu0 %v2439_v12 }
  0x9b   : > { %2244 = vmatpush3.bf16.msra.mxu1 %v2440_v13  ;;  %2249 = vmatprep.subr.bf16.mxu0 %v2518_v2 }
  0x9c   : > { %2269 = vmatprep.subr.bf16.mxu1 %v2518_v2 }
  0x9d   : > { %2226 = vmatmul.mubr.bf16.vlgmr.msra.gmra.mrb[12].mxu0 %v960_v14 }
  0x9e   : > { %2246 = vmatmul.mubr.bf16.vlgmr.msra.gmra.mrb[12].mxu1 %v1853_v16  ;;  %2250 = vmatpush3.bf16.msra.mxu0 %v2442_v15  ;;  %v919_v15 = vld [vmem:[#allocation2 + $0x4] sm:$0xf] }
  0x9f   : > { %2270 = vmatpush3.bf16.msra.mxu1 %v2443_v17  ;;  %2251 = vmatprep.subr.bf16.mxu0 %v2518_v2 }
  0xa0   : > { %2271 = vmatprep.subr.bf16.mxu1 %v2518_v2  ;;  %2265 = vmatprep.mubr.msk.bf16.mxu0 %vm2519_vm0, %v2518_v2 }
  0xa1   : > { %2285 = vmatprep.mubr.msk.bf16.mxu1 %vm2519_vm0, %v2518_v2 }
  0xa2   : > { %2252 = vmatpush3.bf16.msra.mxu0 %v2444_v18 }
  0xa3   : > { %2272 = vmatpush3.bf16.msra.mxu1 %v2445_v19  ;;  %2253 = vmatprep.subr.bf16.mxu0 %v2518_v2 }
  0xa4   : > { %2273 = vmatprep.subr.bf16.mxu1 %v2518_v2 }
  0xa6   : > { %2254 = vmatpush3.bf16.msra.mxu0 %v2446_v20 }
  0xa7   : > { %2274 = vmatpush3.bf16.msra.mxu1 %v2447_v21  ;;  %2255 = vmatprep.subr.bf16.mxu0 %v2518_v2 }
  0xa8   : > { %2275 = vmatprep.subr.bf16.mxu1 %v2518_v2 }
  0xaa   : > { %2256 = vmatpush3.bf16.msra.mxu0 %v2448_v22 }
  0xab   : > { %2276 = vmatpush3.bf16.msra.mxu1 %v2449_v23  ;;  %2257 = vmatprep.subr.bf16.mxu0 %v2518_v2 }
  0xac   : > { %2277 = vmatprep.subr.bf16.mxu1 %v2518_v2 }
  0xae   : > { %2258 = vmatpush3.bf16.msra.mxu0 %v2450_v24 }
  0xaf   : > { %2278 = vmatpush3.bf16.msra.mxu1 %v2451_v25  ;;  %2259 = vmatprep.subr.bf16.mxu0 %v2518_v2 }
  0xb0   : > { %2279 = vmatprep.subr.bf16.mxu1 %v2518_v2 }
  0xb2   : > { %2260 = vmatpush3.bf16.msra.mxu0 %v2452_v26 }
  0xb3   : > { %2280 = vmatpush3.bf16.msra.mxu1 %v2453_v27  ;;  %2261 = vmatprep.subr.bf16.mxu0 %v2518_v2 }
  0xb4   : > { %2281 = vmatprep.subr.bf16.mxu1 %v2518_v2 }
  0xb6   : > { %2262 = vmatpush3.bf16.msra.mxu0 %v2454_v28 }
  0xb7   : > { %2282 = vmatpush3.bf16.msra.mxu1 %v2455_v29  ;;  %2263 = vmatprep.subr.bf16.mxu0 %v2518_v2 }
  0xb8   : > { %2283 = vmatprep.subr.bf16.mxu1 %v2518_v2 }
  0xba   : > { %2264 = vmatpush3.bf16.msra.mxu0 %v2456_v31 }
  0xbb   : > { %2284 = vmatpush3.bf16.msra.mxu1 %v2457_v33  ;;  %2289 = vmatprep.subr.bf16.mxu0 %v2518_v2  ;;  %v1250_v33 = vld [vmem:[#allocation2 + $0x8] sm:$0xf] }
  0xbc   : > { %2309 = vmatprep.subr.bf16.mxu1 %v2518_v2 }
  0xbd   : > { %2266 = vmatmul.mubr.bf16.vlgmr.msra.gmra.mrb[16].mxu0 %v1158_v34 }
  0xbe   : > { %2286 = vmatmul.mubr.bf16.vlgmr.msra.gmra.mrb[16].mxu1 %v1291_v35  ;;  %2290 = vmatpush3.bf16.msra.mxu0 %v2460_v36 }
  0xbf   : > { %2310 = vmatpush3.bf16.msra.mxu1 %v2461_v37  ;;  %2291 = vmatprep.subr.bf16.mxu0 %v2518_v2 }
  0xc0   : > { %2311 = vmatprep.subr.bf16.mxu1 %v2518_v2  ;;  %2305 = vmatprep.mubr.msk.bf16.mxu0 %vm2519_vm0, %v2518_v2 }
  0xc1   : > { %2325 = vmatprep.mubr.msk.bf16.mxu1 %vm2519_vm0, %v2518_v2 }
  0xc2   : > { %2292 = vmatpush3.bf16.msra.mxu0 %v2462_v38 }
  0xc3   : > { %2312 = vmatpush3.bf16.msra.mxu1 %v2463_v39  ;;  %2293 = vmatprep.subr.bf16.mxu0 %v2518_v2 }
  0xc4   : > { %2313 = vmatprep.subr.bf16.mxu1 %v2518_v2 }
  0xc6   : > { %2294 = vmatpush3.bf16.msra.mxu0 %v2464_v40 }
  0xc7   : > { %2314 = vmatpush3.bf16.msra.mxu1 %v2465_v41  ;;  %2295 = vmatprep.subr.bf16.mxu0 %v2518_v2 }
  0xc8   : > { %2315 = vmatprep.subr.bf16.mxu1 %v2518_v2 }
  0xca   : > { %2296 = vmatpush3.bf16.msra.mxu0 %v2466_v42 }
  0xcb   : > { %2316 = vmatpush3.bf16.msra.mxu1 %v2467_v43  ;;  %2297 = vmatprep.subr.bf16.mxu0 %v2518_v2 }
  0xcc   : > { %2317 = vmatprep.subr.bf16.mxu1 %v2518_v2 }
  0xce   : > { %2298 = vmatpush3.bf16.msra.mxu0 %v2468_v44 }
  0xcf   : > { %2318 = vmatpush3.bf16.msra.mxu1 %v2469_v45  ;;  %2299 = vmatprep.subr.bf16.mxu0 %v2518_v2 }
  0xd0   : > { %2319 = vmatprep.subr.bf16.mxu1 %v2518_v2 }
  0xd2   : > { %2300 = vmatpush3.bf16.msra.mxu0 %v2470_v46 }
  0xd3   : > { %2320 = vmatpush3.bf16.msra.mxu1 %v2471_v47  ;;  %2301 = vmatprep.subr.bf16.mxu0 %v2518_v2  ;;  %v1581_v47 = vld [vmem:[#allocation2 + $0xc] sm:$0xf] }
  0xd4   : > { %2321 = vmatprep.subr.bf16.mxu1 %v2518_v2 }
  0xd6   : > { %2302 = vmatpush3.bf16.msra.mxu0 %v2472_v48 }
  0xd7   : > { %2322 = vmatpush3.bf16.msra.mxu1 %v2473_v49  ;;  %2303 = vmatprep.subr.bf16.mxu0 %v2518_v2 }
  0xd8   : > { %2323 = vmatprep.subr.bf16.mxu1 %v2518_v2 }
  0xda   : > { %2304 = vmatpush3.bf16.msra.mxu0 %v2474_v50 }
  0xdb   : > { %2324 = vmatpush3.bf16.msra.mxu1 %v2475_v52 }
  0xdd   : > { %2306 = vmatmul.mubr.bf16.vlgmr.msra.gmra.mrb[20].mxu0 %v1914_v53 }
  0xde   : > { %2326 = vmatmul.mubr.bf16.vlgmr.msra.gmra.mrb[20].mxu1 %v1489_v54 }
 0x110   : > { %v382_v55 = vpop.f32.mrb[0].mxu0 }
 0x111   : > { %v470_v56 = vpop.f32.mrb[0].mxu1  ;;  %v2107_v57 = vpop.f32.mrb[1].mxu0 }
 0x112   : > { %v471_v58 = vadd.f32 %v470_v56, %v382_v55  ;;  %v2127_v59 = vpop.f32.mrb[1].mxu1  ;;  %v385_v60 = vpop.f32.mrb[2].mxu0  ;;  %v1976_v56 = vld [vmem:[%s2844_s2] ss:$0 sm:$0xff] (!%p1975_p9) }
 0x113   : > { %v473_v61 = vpop.f32.mrb[2].mxu1  ;;  %v2108_v62 = vpop.f32.mrb[3].mxu0 }
 0x114   : > { %v2128_v63 = vpop.f32.mrb[3].mxu1 }
 0x130   : > { %v581_v0 = vpop.f32.mrb[4].mxu0 }
 0x131   : > { %v587_v3 = vadd.f32 %v581_v0, %v471_v58  ;;  %v713_v4 = vpop.f32.mrb[4].mxu1  ;;  %v2147_v2 = vpop.f32.mrb[5].mxu0 }
 0x132   : > { %v2167_v5 = vpop.f32.mrb[5].mxu1  ;;  %v584_v6 = vpop.f32.mrb[6].mxu0 }
 0x133   : > { %v589_v7 = vadd.f32 %v588_v1, %v587_v3  ;;  %v716_v8 = vpop.f32.mrb[6].mxu1  ;;  %v2148_v9 = vpop.f32.mrb[7].mxu0 }
 0x134   : > { %v2168_v10 = vpop.f32.mrb[7].mxu1 }
 0x135   : > { %590 = vst [vmem:[#allocation2] sm:$0xf] %v589_v7 }
 0x13c   : > { %v1588_v55 = vld [vmem:[#allocation2] sm:$0xf] (!%p1975_p9) }
 0x13d   : > { %v1599_v58 = vadd.f32 (!%p1975_p9), %v1976_v56, %v1588_v55 }
 0x13f   : > { %v1603_v0 = vmax.f32 (!%p1975_p9), %v1599_v58, 0.0 }
 0x141   : > { %v1607_v2 = vpack.c.bf16 (!%p1975_p9), %v1603_v0, %v1603_v0 }
 0x143   : > { %1611 = vst [vmem:[%s2588_s6] sm:$0x3] (!%p1975_p9), %v1607_v2 }
 0x150   : > { %v801_v11 = vpop.f32.mrb[8].mxu0 }
 0x151   : > { %v802_v12 = vadd.f32 %v801_v11, %v713_v4  ;;  %v911_v13 = vpop.f32.mrb[8].mxu1  ;;  %v2187_v14 = vpop.f32.mrb[9].mxu0 }
 0x152   : > { %v2207_v16 = vpop.f32.mrb[9].mxu1  ;;  %v804_v17 = vpop.f32.mrb[10].mxu0 }
 0x153   : > { %v917_v18 = vadd.f32 %v911_v13, %v802_v12  ;;  %v914_v19 = vpop.f32.mrb[10].mxu1  ;;  %v2188_v20 = vpop.f32.mrb[11].mxu0 }
 0x154   : > { %v2208_v21 = vpop.f32.mrb[11].mxu1 }
 0x155   : > { %v920_v22 = vadd.f32 %v919_v15, %v917_v18 }
 0x157   : > { %921 = vst [vmem:[#allocation2 + $0x4] sm:$0xf] %v920_v22 }
 0x15e   : > { %v1589_v57 = vld [vmem:[#allocation2 + $0x4] sm:$0xf] (!%p1975_p9) }
 0x15f   : > { %v1600_v59 = vadd.f32 (!%p1975_p9), %v1976_v56, %v1589_v57 }
 0x161   : > { %v1604_v1 = vmax.f32 (!%p1975_p9), %v1600_v59, 0.0 }
 0x163   : > { %v1608_v5 = vpack.c.bf16 (!%p1975_p9), %v1604_v1, %v1604_v1 }
 0x165   : > { %1612 = vst [vmem:[%s2588_s6 + $0x2] sm:$0x3] (!%p1975_p9), %v1608_v5 }
 0x170   : > { %v1044_v23 = vpop.f32.mrb[12].mxu0 }
 0x171   : > { %v1132_v24 = vpop.f32.mrb[12].mxu1  ;;  %v2227_v25 = vpop.f32.mrb[13].mxu0 }
 0x172   : > { %v1133_v26 = vadd.f32 %v1132_v24, %v1044_v23  ;;  %v2247_v27 = vpop.f32.mrb[13].mxu1  ;;  %v1047_v28 = vpop.f32.mrb[14].mxu0 }
 0x173   : > { %v1135_v29 = vpop.f32.mrb[14].mxu1  ;;  %v2228_v30 = vpop.f32.mrb[15].mxu0 }
 0x174   : > { %v2248_v31 = vpop.f32.mrb[15].mxu1 }
 0x190   : > { %v1242_v32 = vpop.f32.mrb[16].mxu0 }
 0x191   : > { %v1248_v34 = vadd.f32 %v1242_v32, %v1133_v26  ;;  %v1375_v35 = vpop.f32.mrb[16].mxu1  ;;  %v2267_v36 = vpop.f32.mrb[17].mxu0 }
 0x192   : > { %v2287_v37 = vpop.f32.mrb[17].mxu1  ;;  %v1245_v38 = vpop.f32.mrb[18].mxu0 }
 0x193   : > { %v1251_v39 = vadd.f32 %v1250_v33, %v1248_v34  ;;  %v1378_v40 = vpop.f32.mrb[18].mxu1  ;;  %v2268_v41 = vpop.f32.mrb[19].mxu0 }
 0x194   : > { %v2288_v42 = vpop.f32.mrb[19].mxu1 }
 0x195   : > { %1252 = vst [vmem:[#allocation2 + $0x8] sm:$0xf] %v1251_v39 }
 0x19c   : > { %v1590_v60 = vld [vmem:[#allocation2 + $0x8] sm:$0xf] (!%p1975_p9) }
 0x19d   : > { %v1601_v62 = vadd.f32 (!%p1975_p9), %v1976_v56, %v1590_v60 }
 0x19f   : > { %v1605_v3 = vmax.f32 (!%p1975_p9), %v1601_v62, 0.0 }
 0x1a1   : > { %v1609_v6 = vpack.c.bf16 (!%p1975_p9), %v1605_v3, %v1605_v3 }
 0x1a3   : > { %1613 = vst [vmem:[%s2588_s6 + $0x4] sm:$0x3] (!%p1975_p9), %v1609_v6 }
 0x1b0   : > { %v1463_v43 = vpop.f32.mrb[20].mxu0 }
 0x1b1   : > { %v1464_v44 = vadd.f32 %v1463_v43, %v1375_v35  ;;  %v1573_v45 = vpop.f32.mrb[20].mxu1  ;;  %v2307_v46 = vpop.f32.mrb[21].mxu0  ;;  %1587 = sbr.rel (%p1975_p9) target bundleno = 454 (0x1c6), region = 40 }
 0x1b2   : > { %v2327_v48 = vpop.f32.mrb[21].mxu1  ;;  %v1466_v49 = vpop.f32.mrb[22].mxu0 }
 0x1b3   : > { %v1579_v50 = vadd.f32 %v1573_v45, %v1464_v44  ;;  %v1576_v51 = vpop.f32.mrb[22].mxu1  ;;  %v2308_v52 = vpop.f32.mrb[23].mxu0 }
 0x1b4   : > { %v2328_v53 = vpop.f32.mrb[23].mxu1 }
 0x1b5   : > { %v1582_v54 = vadd.f32 %v1581_v47, %v1579_v50 }
 0x1b7   : > { %1583 = vst [vmem:[#allocation2 + $0xc] sm:$0xf] %v1582_v54 }
 0x1be   : > { %v1591_v61 = vld [vmem:[#allocation2 + $0xc] sm:$0xf] }
 0x1bf   : > { %v1602_v63 = vadd.f32 %v1976_v56, %v1591_v61 }
 0x1c1   : > { %v1606_v4 = vmax.f32 %v1602_v63, 0.0 }
 0x1c3   : > { %v1610_v7 = vpack.c.bf16 %v1606_v4, %v1606_v4 }
 0x1c5   : > { %1614 = vst [vmem:[%s2588_s6 + $0x6] sm:$0x3] %v1610_v7 }
 0x1c6 PF: > { %s13_s16 = sadd.s32 1, %s2515_s16   ;;  %s2846_s12 = smov %s2507_s14 }
 0x1c7   : > { %p10_p10 = scmp.ge.s32.totalorder %s13_s16, 8   ;;  %s2847_s13 = smov %s2511_s15 }
 0x1c8   : > { %s2848_s14 = smov %s2851_s17  ;;  %s2849_s15 = smov %s2855_s18 }
 0x1c9   :  { %12 = sbr.rel (!%p10_p10) target bundleno = 3 (0x3), region = 81 }

// kernel: bigtail11i_forward.17
= control target key start
LH: loop header
LB: loop body
LE: loop exit
PB: predicated region body
PF: predicated region fallthrough
CT: control target
= control target key end

     0   :  { %s1910_s18 = smov 0   ;;  %s1912_s19 = smov 0   ;;  %s2147_s0 = inlined_call_operand.vmem [shape: bf16[6,2,6,128], index: 0, kind: input, shape index: {}]   ;;  %s2148_s1 = inlined_call_operand.vmem [shape: bf16[3,3,128,128], index: 1, kind: input, shape index: {}]   ;;  %s2149_s2 = inlined_call_operand.vmem [shape: f32[1,128], index: 2, kind: input, shape index: {}]   ;;  %s2150_s3 = inlined_call_operand.vmem [shape: bf16[128,128], index: 3, kind: input, shape index: {}]   ;;  %s2151_s4 = inlined_call_operand.vmem [shape: f32[1,128], index: 4, kind: input, shape index: {}]   ;;  %s2152_s5 = inlined_call_operand.vmem [shape: f32[2,2,2,128], index: 5, kind: output, shape index: {}]  }
   0x1   :  { %s1914_s20 = smov 0   ;;  %s1916_s21 = smov 0  }
   0x2   :  { %s1918_s22 = smov 0  }
   0x3 LB: > { %s27_s23 = sadd.s32 1, %s1865_s20  ;;  %s34_s24 = sadd.s32 1, %s1869_s21  ;;  %s1873_s22 = sphi %s1918_s22, %s15_s22   ;;  %s1869_s21 = sphi %s1916_s21, %s2156_s21   ;;  %s1865_s20 = sphi %s1914_s20, %s2155_s20   ;;  %s1861_s19 = sphi %s1912_s19, %s2154_s19   ;;  %s1857_s18 = sphi %s1910_s18, %s2153_s18  }
   0x4   : > { %p28_p0 = scmp.ge.s32.totalorder %s27_s23, 3  ;;  %p1336_p1 = scmp.ge.s32.totalorder %s1873_s22, 1 }
   0x5   : > { %p233_p2 = scmp.lt.s32.totalorder %s1873_s22, 7 }
   0x6   : > { %s2158_s23 = smov (%p28_p0, %s27_s23), 0  ;;  %s2160_s24 = smov (!%p28_p0, %s34_s24), %s1869_s21 }
   0x7   : > { %p234_p3 = pnand %p1336_p1, %p233_p2  ;;  %p36_p4 = scmp.ge.s32.totalorder %s2160_s24, 2 }
   0x8   : > { %s1337_s25 = sshll.u32 (!%p234_p3), %s1857_s18, 1  ;;  %p290_p5 = scmp.lt.s32.totalorder (!%p234_p3), %s1857_s18, 2 }
   0x9   : > { %s2162_s24 = smov (%p36_p4, %s2160_s24), 0  ;;  %237 = sbr.rel (%p234_p3) target bundleno = 572 (0x23c), region = 40 }
   0xa   : > { %s277_s26 = sadd.s32 (!%p234_p3), %s1861_s19, %s1337_s25  ;;  %p296_p7 = scmp.lt.s32.totalorder (!%p234_p3), %s1861_s19, 1 }
   0xb   : > { %p279_p6 = scmp.lt.s32.totalorder (!%p234_p3), %s277_s26, 5  ;;  %p1343_p8 = scmp.ne.s32.totalorder (!%p234_p3), %s1857_s18, 0 }
  0x10   : > { %s291_s27 = scalar_select %p290_p5, %s1857_s18, 2 }
  0x11   : > { %s2164_s26 = smov (!%p279_p6, %s277_s26), 5  ;;  %s2166_s19 = smov (!%p296_p7, %s1861_s19), 1 }
  0x12   : > { %s1721_s28 = smul.u32 192, %s291_s27  ;;  %s1487_s29 = sshll.u32 %s2164_s26, 3  ;;  %v1875_v0 = vmov (!%p1343_p8), 0.0  }
  0x13   : > { %s1948_s7 = scalar_lea.vmem %s2147_s0, %s1487_s29  ;;  %s1488_s11 = sshll.u32 %s2166_s19, 2  ;;  %310 = vst [vmem:[#allocation2] sm:$0x3] (!%p1343_p8), %v1875_v0  ;;  %311 = vst [vmem:[#allocation2 + $0x2] sm:$0x3] (!%p1343_p8), %v1875_v0 }
  0x14   : > { %s1953_s10 = scalar_lea.vmem %s2148_s1, %s1721_s28  ;;  %s1958_s14 = scalar_lea.vmem %s2152_s5, %s1488_s11 }
  0x15   : > { %309 = sbr.rel (%p1343_p8) target bundleno = 28 (0x1c), region = 44 }
  0x1c PF: > { %v1767_v1 = vld [vmem:[%s1953_s10 + $0x40] sm:$0xff]   ;;  %v1876_v2 = vmov 0.0   ;;  %v1769_v4 = vld [vmem:[%s1953_s10 + $0x48] sm:$0xff]   ;;  %vm1877_vm0 = vmmov 0   ;;  %v1771_v6 = vld [vmem:[%s1953_s10 + $0x50] sm:$0xff]   ;;  %p1463_p9 = scmp.ne.s32.totalorder %s1857_s18, 2 }
  0x1d   : > { %1561 = vmatprep.subr.bf16.mxu0 %v1876_v2  ;;  %1581 = vmatprep.subr.bf16.mxu1 %v1876_v2  ;;  %v1768_v3 = vld [vmem:[%s1953_s10] sm:$0xff]   ;;  %v1770_v5 = vld [vmem:[%s1953_s10 + $0x8] sm:$0xff]   ;;  %v1772_v7 = vld [vmem:[%s1953_s10 + $0x10] sm:$0xff]   ;;  %vm1879_vm1 = vmmov (!%p1463_p9), 0  }
  0x1e   : > { %1562 = vmatpush3.bf16.msra.mxu0 %v1767_v1  ;;  %1577 = vmatprep.mubr.msk.bf16.mxu0 %vm1877_vm0, %v1876_v2  ;;  %v1773_v8 = vld [vmem:[%s1953_s10 + $0x58] sm:$0xff]   ;;  %v1775_v10 = vld [vmem:[%s1953_s10 + $0x60] sm:$0xff]   ;;  %v1777_v12 = vld [vmem:[%s1953_s10 + $0x68] sm:$0xff]  }
  0x1f   : > { %1582 = vmatpush3.bf16.msra.mxu1 %v1768_v3  ;;  %1563 = vmatprep.subr.bf16.mxu0 %v1876_v2  ;;  %v1774_v9 = vld [vmem:[%s1953_s10 + $0x18] sm:$0xff]   ;;  %v1776_v11 = vld [vmem:[%s1953_s10 + $0x20] sm:$0xff]   ;;  %v1778_v13 = vld [vmem:[%s1953_s10 + $0x28] sm:$0xff]  }
  0x20   : > { %1583 = vmatprep.subr.bf16.mxu1 %v1876_v2  ;;  %1597 = vmatprep.mubr.msk.bf16.mxu1 %vm1877_vm0, %v1876_v2  ;;  %v1779_v14 = vld [vmem:[%s1953_s10 + $0x70] sm:$0xff]   ;;  %v1783_v16 = vld [vmem:[%s1948_s7] ss:$0 sps:$4 sm:$0x22]   ;;  %v1781_v17 = vld [vmem:[%s1953_s10 + $0x78] sm:$0xff]  }
  0x21   : > { %v1780_v15 = vld [vmem:[%s1953_s10 + $0x30] sm:$0xff]   ;;  %v1782_v18 = vld [vmem:[%s1953_s10 + $0x38] sm:$0xff]   ;;  %v350_v19 = vrot.slane %v1783_v16, 1  ;;  %v1784_v20 = vld [vmem:[%s1953_s10 + $0x80] sm:$0xff]  }
  0x22   : > { %1564 = vmatpush3.bf16.msra.mxu0 %v1769_v4  ;;  %v312_v21 = vld [vmem:[%s1948_s7] sm:$0x1]  ;;  %v1786_v23 = vld [vmem:[%s1953_s10 + $0x88] sm:$0xff]   ;;  %v1788_v25 = vld [vmem:[%s1953_s10 + $0x90] sm:$0xff]  }
  0x23   : > { %1584 = vmatpush3.bf16.msra.mxu1 %v1770_v5  ;;  %1565 = vmatprep.subr.bf16.mxu0 %v1876_v2  ;;  %v1785_v22 = vld [vmem:[%s1953_s10 + $0x40] sm:$0xff]   ;;  %v1787_v24 = vld [vmem:[%s1953_s10 + $0x48] sm:$0xff]   ;;  %v1789_v26 = vld [vmem:[%s1953_s10 + $0x50] sm:$0xff]  }
  0x24   : > { %1585 = vmatprep.subr.bf16.mxu1 %v1876_v2  ;;  %v1790_v27 = vld [vmem:[%s1953_s10 + $0x98] sm:$0xff]   ;;  %v1792_v29 = vld [vmem:[%s1953_s10 + $0xa0] sm:$0xff]   ;;  %v1794_v31 = vld [vmem:[%s1953_s10 + $0xa8] sm:$0xff]  }
  0x25   : > { %v1791_v28 = vld [vmem:[%s1953_s10 + $0x58] sm:$0xff]   ;;  %v1793_v30 = vld [vmem:[%s1953_s10 + $0x60] sm:$0xff]   ;;  %v1795_v32 = vld [vmem:[%s1953_s10 + $0x68] sm:$0xff]  }
  0x26   : > { %1566 = vmatpush3.bf16.msra.mxu0 %v1771_v6  ;;  %v1796_v33 = vld [vmem:[%s1953_s10 + $0xb0] sm:$0xff]   ;;  %v1800_v35 = vld [vmem:[%s1948_s7] ss:$0 sps:$4 sm:$0x44]   ;;  %v1798_v36 = vld [vmem:[%s1953_s10 + $0xb8] sm:$0xff]  }
  0x27   : > { %1586 = vmatpush3.bf16.msra.mxu1 %v1772_v7  ;;  %1567 = vmatprep.subr.bf16.mxu0 %v1876_v2  ;;  %v1797_v34 = vld [vmem:[%s1953_s10 + $0x70] sm:$0xff]   ;;  %v1801_v37 = vld [vmem:[%s1948_s7 + $0x4] ss:$0 sps:$4 sm:$0x22]   ;;  %v1799_v38 = vld [vmem:[%s1953_s10 + $0x78] sm:$0xff]   ;;  %v549_v39 = vrot.slane %v1800_v35, 2 }
  0x28   : > { %1587 = vmatprep.subr.bf16.mxu1 %v1876_v2  ;;  %v681_v40 = vrot.slane %v1801_v37, 1  ;;  %v1802_v41 = vld [vmem:[%s1953_s10] sm:$0xff]   ;;  %v1804_v43 = vld [vmem:[%s1953_s10 + $0x8] sm:$0xff]   ;;  %v1806_v45 = vld [vmem:[%s1953_s10 + $0x10] sm:$0xff]  }
  0x29   : > { %v1803_v42 = vld [vmem:[%s1953_s10 + $0x80] sm:$0xff]   ;;  %v1805_v44 = vld [vmem:[%s1953_s10 + $0x88] sm:$0xff]   ;;  %v1807_v46 = vld [vmem:[%s1953_s10 + $0x90] sm:$0xff]  }
  0x2a   : > { %1568 = vmatpush3.bf16.msra.mxu0 %v1773_v8  ;;  %v1808_v47 = vld [vmem:[%s1953_s10 + $0x18] sm:$0xff]   ;;  %v1810_v49 = vld [vmem:[%s1953_s10 + $0x20] sm:$0xff]   ;;  %v1812_v51 = vld [vmem:[%s1953_s10 + $0x28] sm:$0xff]  }
  0x2b   : > { %1588 = vmatpush3.bf16.msra.mxu1 %v1774_v9  ;;  %1569 = vmatprep.subr.bf16.mxu0 %v1876_v2  ;;  %v1809_v48 = vld [vmem:[%s1953_s10 + $0x98] sm:$0xff]   ;;  %v1811_v50 = vld [vmem:[%s1953_s10 + $0xa0] sm:$0xff]   ;;  %v1813_v52 = vld [vmem:[%s1953_s10 + $0xa8] sm:$0xff]  }
  0x2c   : > { %1589 = vmatprep.subr.bf16.mxu1 %v1876_v2  ;;  %v1814_v53 = vld [vmem:[%s1953_s10 + $0x30] sm:$0xff]   ;;  %v1816_v55 = vld [vmem:[%s1953_s10 + $0x38] sm:$0xff]   ;;  %v1818_v56 = vld [vmem:[%s1948_s7 + $0x4] ss:$0 sps:$4 sm:$0x44]  }
  0x2d   : > { %v1815_v54 = vld [vmem:[%s1953_s10 + $0xb0] sm:$0xff]   ;;  %v1817_v57 = vld [vmem:[%s1953_s10 + $0xb8] sm:$0xff]   ;;  %v1402_v58 = vld [vmem:[%s1948_s7 + $0x4] sm:$0x1]  ;;  %v879_v59 = vrot.slane %v1818_v56, 2 }
  0x2e   : > { %1570 = vmatpush3.bf16.msra.mxu0 %v1775_v10  ;;  %v640_v7 = vld [vmem:[#allocation2] sm:$0x3]  ;;  %v1825_v35 = vld [vmem:[%s2150_s3 + $0x18] sm:$0xff] (!%p1463_p9)  }
  0x2f   : > { %1590 = vmatpush3.bf16.msra.mxu1 %v1776_v11  ;;  %1571 = vmatprep.subr.bf16.mxu0 %v1876_v2  ;;  %v1827_v37 = vld [vmem:[%s2150_s3 + $0x20] sm:$0xff] (!%p1463_p9)  }
  0x30   : > { %1591 = vmatprep.subr.bf16.mxu1 %v1876_v2 }
  0x32   : > { %1572 = vmatpush3.bf16.msra.mxu0 %v1777_v12 }
  0x33   : > { %1592 = vmatpush3.bf16.msra.mxu1 %v1778_v13  ;;  %1573 = vmatprep.subr.bf16.mxu0 %v1876_v2 }
  0x34   : > { %1593 = vmatprep.subr.bf16.mxu1 %v1876_v2 }
  0x36   : > { %1574 = vmatpush3.bf16.msra.mxu0 %v1779_v14 }
  0x37   : > { %1594 = vmatpush3.bf16.msra.mxu1 %v1780_v15  ;;  %1575 = vmatprep.subr.bf16.mxu0 %v1876_v2 }
  0x38   : > { %1595 = vmatprep.subr.bf16.mxu1 %v1876_v2 }
  0x3a   : > { %1576 = vmatpush3.bf16.msra.mxu0 %v1781_v17 }
  0x3b   : > { %1596 = vmatpush3.bf16.msra.mxu1 %v1782_v18  ;;  %1601 = vmatprep.subr.bf16.mxu0 %v1876_v2 }
  0x3c   : > { %1621 = vmatprep.subr.bf16.mxu1 %v1876_v2 }
  0x3d   : > { %1578 = vmatmul.mubr.bf16.vlgmr.msra.gmra.mrb[0].mxu0 %v350_v19 }
  0x3e   : > { %1598 = vmatmul.mubr.bf16.vlgmr.msra.gmra.mrb[0].mxu1 %v312_v21  ;;  %1602 = vmatpush3.bf16.msra.mxu0 %v1784_v20  ;;  %v971_v20 = vld [vmem:[#allocation2 + $0x2] sm:$0x3] }
  0x3f   : > { %1622 = vmatpush3.bf16.msra.mxu1 %v1785_v22  ;;  %1603 = vmatprep.subr.bf16.mxu0 %v1876_v2 }
  0x40   : > { %1623 = vmatprep.subr.bf16.mxu1 %v1876_v2  ;;  %1617 = vmatprep.mubr.msk.bf16.mxu0 %vm1877_vm0, %v1876_v2 }
  0x41   : > { %1637 = vmatprep.mubr.msk.bf16.mxu1 %vm1877_vm0, %v1876_v2 }
  0x42   : > { %1604 = vmatpush3.bf16.msra.mxu0 %v1786_v23 }
  0x43   : > { %1624 = vmatpush3.bf16.msra.mxu1 %v1787_v24  ;;  %1605 = vmatprep.subr.bf16.mxu0 %v1876_v2 }
  0x44   : > { %1625 = vmatprep.subr.bf16.mxu1 %v1876_v2 }
  0x46   : > { %1606 = vmatpush3.bf16.msra.mxu0 %v1788_v25 }
  0x47   : > { %1626 = vmatpush3.bf16.msra.mxu1 %v1789_v26  ;;  %1607 = vmatprep.subr.bf16.mxu0 %v1876_v2 }
  0x48   : > { %1627 = vmatprep.subr.bf16.mxu1 %v1876_v2 }
  0x4a   : > { %1608 = vmatpush3.bf16.msra.mxu0 %v1790_v27 }
  0x4b   : > { %1628 = vmatpush3.bf16.msra.mxu1 %v1791_v28  ;;  %1609 = vmatprep.subr.bf16.mxu0 %v1876_v2  ;;  %v1819_v28 = vld [vmem:[%s2150_s3] sm:$0xff] (!%p1463_p9)  }
  0x4c   : > { %1629 = vmatprep.subr.bf16.mxu1 %v1876_v2 }
  0x4e   : > { %1610 = vmatpush3.bf16.msra.mxu0 %v1792_v29  ;;  %v1878_v29 = vmov (!%p1463_p9), 0.0  }
  0x4f   : > { %1630 = vmatpush3.bf16.msra.mxu1 %v1793_v30  ;;  %1611 = vmatprep.subr.bf16.mxu0 %v1876_v2  ;;  %v1820_v30 = vld [vmem:[%s2150_s3] sm:$0xff] (!%p1463_p9)  }
  0x50   : > { %1631 = vmatprep.subr.bf16.mxu1 %v1876_v2 }
  0x52   : > { %1612 = vmatpush3.bf16.msra.mxu0 %v1794_v31  ;;  %v1821_v31 = vld [vmem:[%s2150_s3 + $0x8] sm:$0xff] (!%p1463_p9)  }
  0x53   : > { %1632 = vmatpush3.bf16.msra.mxu1 %v1795_v32  ;;  %1613 = vmatprep.subr.bf16.mxu0 %v1876_v2  ;;  %v1822_v32 = vld [vmem:[%s2150_s3 + $0x8] sm:$0xff] (!%p1463_p9)  }
  0x54   : > { %1633 = vmatprep.subr.bf16.mxu1 %v1876_v2 }
  0x56   : > { %1614 = vmatpush3.bf16.msra.mxu0 %v1796_v33  ;;  %v1823_v33 = vld [vmem:[%s2150_s3 + $0x10] sm:$0xff] (!%p1463_p9)  }
  0x57   : > { %1634 = vmatpush3.bf16.msra.mxu1 %v1797_v34  ;;  %1615 = vmatprep.subr.bf16.mxu0 %v1876_v2  ;;  %v1824_v34 = vld [vmem:[%s2150_s3 + $0x10] sm:$0xff] (!%p1463_p9)  }
  0x58   : > { %1635 = vmatprep.subr.bf16.mxu1 %v1876_v2 }
  0x5a   : > { %1616 = vmatpush3.bf16.msra.mxu0 %v1798_v36  ;;  %v1826_v36 = vld [vmem:[%s2150_s3 + $0x18] sm:$0xff] (!%p1463_p9)  }
  0x5b   : > { %1636 = vmatpush3.bf16.msra.mxu1 %v1799_v38  ;;  %1641 = vmatprep.subr.bf16.mxu0 %v1876_v2  ;;  %v1828_v38 = vld [vmem:[%s2150_s3 + $0x20] sm:$0xff] (!%p1463_p9)  }
  0x5c   : > { %1661 = vmatprep.subr.bf16.mxu1 %v1876_v2 }
  0x5d   : > { %1618 = vmatmul.mubr.bf16.vlgmr.msra.gmra.mrb[4].mxu0 %v549_v39  ;;  %v1829_v39 = vld [vmem:[%s2150_s3 + $0x28] sm:$0xff] (!%p1463_p9)  }
  0x5e   : > { %1638 = vmatmul.mubr.bf16.vlgmr.msra.gmra.mrb[4].mxu1 %v681_v40  ;;  %1642 = vmatpush3.bf16.msra.mxu0 %v1802_v41  ;;  %v1464_v41 = vld [vmem:[%s2149_s2] ss:$0 sm:$0xff] (!%p1463_p9) }
  0x5f   : > { %1662 = vmatpush3.bf16.msra.mxu1 %v1803_v42  ;;  %1643 = vmatprep.subr.bf16.mxu0 %v1876_v2  ;;  %v1830_v42 = vld [vmem:[%s2150_s3 + $0x28] sm:$0xff] (!%p1463_p9)  }
  0x60   : > { %1663 = vmatprep.subr.bf16.mxu1 %v1876_v2  ;;  %1657 = vmatprep.mubr.msk.bf16.mxu0 %vm1877_vm0, %v1876_v2 }
  0x61   : > { %1677 = vmatprep.mubr.msk.bf16.mxu1 %vm1877_vm0, %v1876_v2 }
  0x62   : > { %1644 = vmatpush3.bf16.msra.mxu0 %v1804_v43 }
  0x63   : > { %1664 = vmatpush3.bf16.msra.mxu1 %v1805_v44  ;;  %1645 = vmatprep.subr.bf16.mxu0 %v1876_v2 }
  0x64   : > { %1665 = vmatprep.subr.bf16.mxu1 %v1876_v2 }
  0x66   : > { %1646 = vmatpush3.bf16.msra.mxu0 %v1806_v45  ;;  %v1831_v45 = vld [vmem:[%s2150_s3 + $0x30] sm:$0xff] (!%p1463_p9)  }
  0x67   : > { %1666 = vmatpush3.bf16.msra.mxu1 %v1807_v46  ;;  %1647 = vmatprep.subr.bf16.mxu0 %v1876_v2 }
  0x68   : > { %1667 = vmatprep.subr.bf16.mxu1 %v1876_v2 }
  0x6a   : > { %1648 = vmatpush3.bf16.msra.mxu0 %v1808_v47  ;;  %v1832_v47 = vld [vmem:[%s2150_s3 + $0x30] sm:$0xff] (!%p1463_p9)  }
  0x6b   : > { %1668 = vmatpush3.bf16.msra.mxu1 %v1809_v48  ;;  %1649 = vmatprep.subr.bf16.mxu0 %v1876_v2 }
  0x6c   : > { %1669 = vmatprep.subr.bf16.mxu1 %v1876_v2 }
  0x6e   : > { %1650 = vmatpush3.bf16.msra.mxu0 %v1810_v49  ;;  %v1833_v49 = vld [vmem:[%s2150_s3 + $0x38] sm:$0xff] (!%p1463_p9)  }
  0x6f   : > { %1670 = vmatpush3.bf16.msra.mxu1 %v1811_v50  ;;  %1651 = vmatprep.subr.bf16.mxu0 %v1876_v2 }
  0x70   : > { %1671 = vmatprep.subr.bf16.mxu1 %v1876_v2 }
  0x72   : > { %1652 = vmatpush3.bf16.msra.mxu0 %v1812_v51  ;;  %v1834_v51 = vld [vmem:[%s2150_s3 + $0x38] sm:$0xff] (!%p1463_p9)  }
  0x73   : > { %1672 = vmatpush3.bf16.msra.mxu1 %v1813_v52  ;;  %1653 = vmatprep.subr.bf16.mxu0 %v1876_v2 }
  0x74   : > { %1673 = vmatprep.subr.bf16.mxu1 %v1876_v2 }
  0x76   : > { %1654 = vmatpush3.bf16.msra.mxu0 %v1814_v53 }
  0x77   : > { %1674 = vmatpush3.bf16.msra.mxu1 %v1815_v54  ;;  %1655 = vmatprep.subr.bf16.mxu0 %v1876_v2  ;;  %v1465_v54 = vld [vmem:[%s2151_s4] ss:$0 sm:$0xff] (!%p1463_p9) }
  0x78   : > { %1675 = vmatprep.subr.bf16.mxu1 %v1876_v2 }
  0x7a   : > { %1656 = vmatpush3.bf16.msra.mxu0 %v1816_v55 }
  0x7b   : > { %1676 = vmatpush3.bf16.msra.mxu1 %v1817_v57  ;;  %1681 = vmatprep.subr.bf16.mxu0 (!%p1463_p9), %v1878_v29 }
  0x7c   : > { %1701 = vmatprep.subr.bf16.mxu1 (!%p1463_p9), %v1878_v29 }
  0x7d   : > { %1658 = vmatmul.mubr.bf16.vlgmr.msra.gmra.mrb[8].mxu0 %v1402_v58 }
  0x7e   : > { %1678 = vmatmul.mubr.bf16.vlgmr.msra.gmra.mrb[8].mxu1 %v879_v59  ;;  %1682 = vmatpush3.bf16.msra.mxu0 (!%p1463_p9), %v1819_v28 }
  0x7f   : > { %1697 = vmatprep.mubr.msk.bf16.mxu0 (!%p1463_p9), %vm1879_vm1, %v1878_v29  ;;  %1702 = vmatpush3.bf16.msra.mxu1 (!%p1463_p9), %v1820_v30 }
  0x80   : > { %1683 = vmatprep.subr.bf16.mxu0 (!%p1463_p9), %v1878_v29  ;;  %1703 = vmatprep.subr.bf16.mxu1 (!%p1463_p9), %v1878_v29 }
  0x81   : > { %1717 = vmatprep.mubr.msk.bf16.mxu1 (!%p1463_p9), %vm1879_vm1, %v1878_v29 }
  0x82   : > { %1684 = vmatpush3.bf16.msra.mxu0 (!%p1463_p9), %v1821_v31 }
  0x83   : > { %1704 = vmatpush3.bf16.msra.mxu1 (!%p1463_p9), %v1822_v32  ;;  %1685 = vmatprep.subr.bf16.mxu0 (!%p1463_p9), %v1878_v29 }
  0x84   : > { %1705 = vmatprep.subr.bf16.mxu1 (!%p1463_p9), %v1878_v29 }
  0x86   : > { %1686 = vmatpush3.bf16.msra.mxu0 (!%p1463_p9), %v1823_v33 }
  0x87   : > { %1706 = vmatpush3.bf16.msra.mxu1 (!%p1463_p9), %v1824_v34  ;;  %1687 = vmatprep.subr.bf16.mxu0 (!%p1463_p9), %v1878_v29 }
  0x88   : > { %1707 = vmatprep.subr.bf16.mxu1 (!%p1463_p9), %v1878_v29 }
  0x8a   : > { %1688 = vmatpush3.bf16.msra.mxu0 (!%p1463_p9), %v1825_v35 }
  0x8b   : > { %1708 = vmatpush3.bf16.msra.mxu1 (!%p1463_p9), %v1826_v36  ;;  %1689 = vmatprep.subr.bf16.mxu0 (!%p1463_p9), %v1878_v29 }
  0x8c   : > { %1709 = vmatprep.subr.bf16.mxu1 (!%p1463_p9), %v1878_v29 }
  0x8e   : > { %1690 = vmatpush3.bf16.msra.mxu0 (!%p1463_p9), %v1827_v37 }
  0x8f   : > { %1710 = vmatpush3.bf16.msra.mxu1 (!%p1463_p9), %v1828_v38  ;;  %1691 = vmatprep.subr.bf16.mxu0 (!%p1463_p9), %v1878_v29 }
  0x90   : > { %1711 = vmatprep.subr.bf16.mxu1 (!%p1463_p9), %v1878_v29 }
  0x92   : > { %1692 = vmatpush3.bf16.msra.mxu0 (!%p1463_p9), %v1829_v39 }
  0x93   : > { %1712 = vmatpush3.bf16.msra.mxu1 (!%p1463_p9), %v1830_v42  ;;  %1693 = vmatprep.subr.bf16.mxu0 (!%p1463_p9), %v1878_v29 }
  0x94   : > { %1713 = vmatprep.subr.bf16.mxu1 (!%p1463_p9), %v1878_v29 }
  0x96   : > { %1694 = vmatpush3.bf16.msra.mxu0 (!%p1463_p9), %v1831_v45 }
  0x97   : > { %1714 = vmatpush3.bf16.msra.mxu1 (!%p1463_p9), %v1832_v47  ;;  %1695 = vmatprep.subr.bf16.mxu0 (!%p1463_p9), %v1878_v29 }
  0x98   : > { %1715 = vmatprep.subr.bf16.mxu1 (!%p1463_p9), %v1878_v29 }
  0x9a   : > { %1696 = vmatpush3.bf16.msra.mxu0 (!%p1463_p9), %v1833_v49 }
  0x9b   : > { %1716 = vmatpush3.bf16.msra.mxu1 (!%p1463_p9), %v1834_v51 }
 0x110   : > { %v434_v60 = vpop.f32.mrb[0].mxu0 }
 0x111   : > { %v522_v61 = vpop.f32.mrb[0].mxu1  ;;  %v1579_v62 = vpop.f32.mrb[1].mxu0 }
 0x112   : > { %v523_v63 = vadd.f32 %v522_v61, %v434_v60  ;;  %v1599_v0 = vpop.f32.mrb[1].mxu1  ;;  %v437_v1 = vpop.f32.mrb[2].mxu0 }
 0x113   : > { %v525_v3 = vpop.f32.mrb[2].mxu1  ;;  %v1580_v4 = vpop.f32.mrb[3].mxu0 }
 0x114   : > { %v1600_v5 = vpop.f32.mrb[3].mxu1 }
 0x130   : > { %v633_v6 = vpop.f32.mrb[4].mxu0 }
 0x131   : > { %v639_v8 = vadd.f32 %v633_v6, %v523_v63  ;;  %v765_v9 = vpop.f32.mrb[4].mxu1  ;;  %v1619_v2 = vpop.f32.mrb[5].mxu0 }
 0x132   : > { %v1639_v10 = vpop.f32.mrb[5].mxu1  ;;  %v636_v11 = vpop.f32.mrb[6].mxu0 }
 0x133   : > { %v641_v12 = vadd.f32 %v640_v7, %v639_v8  ;;  %v768_v13 = vpop.f32.mrb[6].mxu1  ;;  %v1620_v14 = vpop.f32.mrb[7].mxu0 }
 0x134   : > { %v1640_v15 = vpop.f32.mrb[7].mxu1 }
 0x135   : > { %642 = vst [vmem:[#allocation2] sm:$0x3] %v641_v12 }
 0x13c   : > { %v978_v40 = vld [vmem:[#allocation2] sm:$0x3] (!%p1463_p9) }
 0x13d   : > { %v986_v44 = vadd.f32 (!%p1463_p9), %v1464_v41, %v978_v40 }
 0x13f   : > { %v987_v48 = vmax.f32 (!%p1463_p9), %v986_v44, 0.0 }
 0x141   : > { %v988_v52 = vpack.c.bf16 (!%p1463_p9), %v987_v48, %v987_v48 }
 0x143   : > { %1698 = vmatmul.mubr.bf16.vlgmr.msra.gmra.mrb[0].mxu0 (!%p1463_p9), %v988_v52 }
 0x150   : > { %v853_v16 = vpop.f32.mrb[8].mxu0 }
 0x151   : > { %v854_v17 = vadd.f32 %v853_v16, %v765_v9  ;;  %v963_v18 = vpop.f32.mrb[8].mxu1  ;;  %v1659_v19 = vpop.f32.mrb[9].mxu0  ;;  %977 = sbr.rel (%p1463_p9) target bundleno = 572 (0x23c), region = 48 }
 0x152   : > { %v1679_v21 = vpop.f32.mrb[9].mxu1  ;;  %v856_v22 = vpop.f32.mrb[10].mxu0 }
 0x153   : > { %v969_v23 = vadd.f32 %v963_v18, %v854_v17  ;;  %v966_v24 = vpop.f32.mrb[10].mxu1  ;;  %v1660_v25 = vpop.f32.mrb[11].mxu0 }
 0x154   : > { %v1680_v26 = vpop.f32.mrb[11].mxu1 }
 0x155   : > { %v972_v27 = vadd.f32 %v971_v20, %v969_v23 }
 0x157   : > { %973 = vst [vmem:[#allocation2 + $0x2] sm:$0x3] %v972_v27 }
 0x15e   : > { %v1101_v43 = vld [vmem:[#allocation2 + $0x2] sm:$0x3] }
 0x15f   : > { %v1109_v46 = vadd.f32 %v1464_v41, %v1101_v43 }
 0x161   : > { %v1110_v50 = vmax.f32 %v1109_v46, 0.0 }
 0x163   : > { %v1111_v53 = vpack.c.bf16 %v1110_v50, %v1110_v50 }
 0x165   : > { %1718 = vmatmul.mubr.bf16.vlgmr.msra.gmra.mrb[0].mxu1 %v1111_v53 }
 0x216   : > { %v1094_v55 = vpop.f32.mrb[0].mxu0 }
 0x217   : > { %v1095_v56 = vadd.f32 %v1465_v54, %v1094_v55  ;;  %v1699_v58 = vpop.f32.mrb[1].mxu0 }
 0x218   : > { %v1097_v61 = vpop.f32.mrb[2].mxu0 }
 0x219   : > { %1100 = vst [vmem:[%s1958_s14] sm:$0x3] %v1095_v56  ;;  %v1700_v63 = vpop.f32.mrb[3].mxu0 }
 0x238   : > { %v1217_v57 = vpop.f32.mrb[0].mxu1 }
 0x239   : > { %v1218_v59 = vadd.f32 %v1465_v54, %v1217_v57  ;;  %v1719_v60 = vpop.f32.mrb[1].mxu1 }
 0x23a   : > { %v1220_v62 = vpop.f32.mrb[2].mxu1 }
 0x23b   : > { %1484 = vst [vmem:[%s1958_s14 + $0x2] sm:$0x3] %v1218_v59  ;;  %v1720_v0 = vpop.f32.mrb[3].mxu1 }
 0x23c PF: > { %s15_s22 = sadd.s32 1, %s1873_s22   ;;  %s2153_s18 = smov %s1865_s20 }
 0x23d   : > { %p12_p10 = scmp.ge.s32.totalorder %s15_s22, 8   ;;  %s2154_s19 = smov %s1869_s21 }
 0x23e   : > { %s2155_s20 = smov %s2158_s23  ;;  %s2156_s21 = smov %s2162_s24 }
 0x23f   :  { %14 = sbr.rel (!%p12_p10) target bundleno = 3 (0x3), region = 86 }

// kernel: bigtail11i_forward.11
= control target key start
LH: loop header
LB: loop body
LE: loop exit
PB: predicated region body
PF: predicated region fallthrough
CT: control target
= control target key end

     0   :  { %s4675_s12 = smov 0   ;;  %s4677_s13 = smov 0   ;;  %s5214_s0 = inlined_call_operand.vmem [shape: bf16[6,8,12,128], index: 0, kind: input, shape index: {}]   ;;  %s5215_s1 = inlined_call_operand.vmem [shape: bf16[3,3,128,128], index: 1, kind: input, shape index: {}]   ;;  %s5216_s2 = inlined_call_operand.vmem [shape: f32[1,128], index: 2, kind: input, shape index: {}]   ;;  %s5217_s3 = inlined_call_operand.vmem [shape: bf16[2,8,8,128], index: 3, kind: output, shape index: {}]  }
   0x1   :  { %s4679_s14 = smov 0   ;;  %s4681_s15 = smov 0  }
   0x2   :  { %s4683_s16 = smov 0  }
   0x3 LB: > { %s25_s17 = sadd.s32 1, %s4642_s14  ;;  %s32_s18 = sadd.s32 1, %s4646_s15  ;;  %s4650_s16 = sphi %s4683_s16, %s13_s16   ;;  %s4646_s15 = sphi %s4681_s15, %s5221_s15   ;;  %s4642_s14 = sphi %s4679_s14, %s5220_s14   ;;  %s4638_s13 = sphi %s4677_s13, %s5219_s13   ;;  %s4634_s12 = sphi %s4675_s12, %s5218_s12  }
   0x4   : > { %p26_p0 = scmp.ge.s32.totalorder %s25_s17, 3  ;;  %p3128_p1 = scmp.ge.s32.totalorder %s4650_s16, 1 }
   0x5   : > { %p184_p2 = scmp.lt.s32.totalorder %s4650_s16, 7 }
   0x6   : > { %s5223_s17 = smov (%p26_p0, %s25_s17), 0  ;;  %s5225_s18 = smov (!%p26_p0, %s32_s18), %s4646_s15 }
   0x7   : > { %p185_p3 = pnand %p3128_p1, %p184_p2  ;;  %p34_p4 = scmp.ge.s32.totalorder %s5225_s18, 2 }
   0x8   : > { %s3129_s19 = sshll.u32 (!%p185_p3), %s4634_s12, 1  ;;  %p239_p5 = scmp.lt.s32.totalorder (!%p185_p3), %s4634_s12, 2 }
   0x9   : > { %s5227_s18 = smov (%p34_p4, %s5225_s18), 0  ;;  %188 = sbr.rel (%p185_p3) target bundleno = 646 (0x286), region = 32 }
   0xa   : > { %s225_s20 = sadd.s32 (!%p185_p3), %s4638_s13, %s3129_s19  ;;  %p245_p7 = scmp.lt.s32.totalorder (!%p185_p3), %s4638_s13, 1 }
   0xb   : > { %p227_p6 = scmp.lt.s32.totalorder (!%p185_p3), %s225_s20, 5  ;;  %p3135_p8 = scmp.ne.s32.totalorder (!%p185_p3), %s4634_s12, 0 }
  0x10   : > { %s240_s21 = scalar_select %p239_p5, %s4634_s12, 2 }
  0x11   : > { %s5229_s20 = smov (!%p227_p6, %s225_s20), 5  ;;  %s5231_s13 = smov (!%p245_p7, %s4638_s13), 1 }
  0x12   : > { %s4360_s22 = smul.u32 192, %s240_s21  ;;  %s3639_s23 = sshll.u32 %s5229_s20, 6  ;;  %v4652_v0 = vmov (!%p3135_p8), 0.0  }
  0x13   : > { %s4713_s26 = scalar_lea.vmem %s5214_s0, %s3639_s23  ;;  %s3640_s30 = sshll.u32 %s5231_s13, 5  ;;  %259 = vst [vmem:[#allocation2] sm:$0xff] (!%p3135_p8), %v4652_v0  ;;  %260 = vst [vmem:[#allocation2 + $0x8] sm:$0xff] (!%p3135_p8), %v4652_v0 }
  0x14   : > { %s4718_s29 = scalar_lea.vmem %s5215_s1, %s4360_s22  ;;  %s4723_s6 = scalar_lea.vmem %s5217_s3, %s3640_s30  ;;  %261 = vst [vmem:[#allocation2 + $0x10] sm:$0xff] (!%p3135_p8), %v4652_v0  ;;  %262 = vst [vmem:[#allocation2 + $0x18] sm:$0xff] (!%p3135_p8), %v4652_v0 }
  0x15   : > { %258 = sbr.rel (%p3135_p8) target bundleno = 28 (0x1c), region = 36  ;;  %263 = vst [vmem:[#allocation2 + $0x20] sm:$0xff] (!%p3135_p8), %v4652_v0  ;;  %264 = vst [vmem:[#allocation2 + $0x28] sm:$0xff] (!%p3135_p8), %v4652_v0 }
  0x16   : > { %265 = vst [vmem:[#allocation2 + $0x30] sm:$0xff] (!%p3135_p8), %v4652_v0  ;;  %266 = vst [vmem:[#allocation2 + $0x38] sm:$0xff] (!%p3135_p8), %v4652_v0 }
  0x1c PF: > { %v4404_v1 = vld [vmem:[%s4718_s29 + $0x40] sm:$0xff]   ;;  %v4653_v2 = vmov 0.0   ;;  %v4406_v4 = vld [vmem:[%s4718_s29 + $0x48] sm:$0xff]   ;;  %vm4654_vm0 = vmmov 0   ;;  %v4408_v6 = vld [vmem:[%s4718_s29 + $0x50] sm:$0xff]   ;;  %p3635_p9 = scmp.ne.s32.totalorder %s4634_s12, 2 }
  0x1d   : > { %3880 = vmatprep.subr.bf16.mxu0 %v4653_v2  ;;  %3900 = vmatprep.subr.bf16.mxu1 %v4653_v2  ;;  %v4405_v3 = vld [vmem:[%s4718_s29] sm:$0xff]   ;;  %v4407_v5 = vld [vmem:[%s4718_s29 + $0x8] sm:$0xff]   ;;  %v4409_v7 = vld [vmem:[%s4718_s29 + $0x10] sm:$0xff]  }
  0x1e   : > { %3881 = vmatpush3.bf16.msra.mxu0 %v4404_v1  ;;  %3896 = vmatprep.mubr.msk.bf16.mxu0 %vm4654_vm0, %v4653_v2  ;;  %v4410_v8 = vld [vmem:[%s4718_s29 + $0x58] sm:$0xff]   ;;  %v4412_v10 = vld [vmem:[%s4718_s29 + $0x60] sm:$0xff]   ;;  %v4414_v12 = vld [vmem:[%s4718_s29 + $0x68] sm:$0xff]  }
  0x1f   : > { %3901 = vmatpush3.bf16.msra.mxu1 %v4405_v3  ;;  %3882 = vmatprep.subr.bf16.mxu0 %v4653_v2  ;;  %v4411_v9 = vld [vmem:[%s4718_s29 + $0x18] sm:$0xff]   ;;  %v4413_v11 = vld [vmem:[%s4718_s29 + $0x20] sm:$0xff]   ;;  %v4415_v13 = vld [vmem:[%s4718_s29 + $0x28] sm:$0xff]  }
  0x20   : > { %3902 = vmatprep.subr.bf16.mxu1 %v4653_v2  ;;  %3916 = vmatprep.mubr.msk.bf16.mxu1 %vm4654_vm0, %v4653_v2  ;;  %v4416_v14 = vld [vmem:[%s4718_s29 + $0x70] sm:$0xff]   ;;  %v4420_v16 = vld [vmem:[%s4713_s26] sm:$0x1e]   ;;  %v4418_v17 = vld [vmem:[%s4718_s29 + $0x78] sm:$0xff]  }
  0x21   : > { %v4417_v15 = vld [vmem:[%s4718_s29 + $0x30] sm:$0xff]   ;;  %v4419_v18 = vld [vmem:[%s4718_s29 + $0x38] sm:$0xff]   ;;  %v308_v19 = vrot.slane %v4420_v16, 1  ;;  %v267_v20 = vld [vmem:[%s4713_s26] sm:$0xf] }
  0x22   : > { %3883 = vmatpush3.bf16.msra.mxu0 %v4406_v4  ;;  %v4421_v21 = vld [vmem:[%s4718_s29 + $0x80] sm:$0xff]   ;;  %v4423_v23 = vld [vmem:[%s4718_s29 + $0x88] sm:$0xff]   ;;  %v4425_v25 = vld [vmem:[%s4718_s29 + $0x90] sm:$0xff]  }
  0x23   : > { %3903 = vmatpush3.bf16.msra.mxu1 %v4407_v5  ;;  %3884 = vmatprep.subr.bf16.mxu0 %v4653_v2  ;;  %v4422_v22 = vld [vmem:[%s4718_s29 + $0x40] sm:$0xff]   ;;  %v4424_v24 = vld [vmem:[%s4718_s29 + $0x48] sm:$0xff]   ;;  %v4426_v26 = vld [vmem:[%s4718_s29 + $0x50] sm:$0xff]  }
  0x24   : > { %3904 = vmatprep.subr.bf16.mxu1 %v4653_v2  ;;  %v4427_v27 = vld [vmem:[%s4718_s29 + $0x98] sm:$0xff]   ;;  %v4429_v29 = vld [vmem:[%s4718_s29 + $0xa0] sm:$0xff]   ;;  %v4431_v31 = vld [vmem:[%s4718_s29 + $0xa8] sm:$0xff]  }
  0x25   : > { %v4428_v28 = vld [vmem:[%s4718_s29 + $0x58] sm:$0xff]   ;;  %v4430_v30 = vld [vmem:[%s4718_s29 + $0x60] sm:$0xff]   ;;  %v4432_v32 = vld [vmem:[%s4718_s29 + $0x68] sm:$0xff]  }
  0x26   : > { %3885 = vmatpush3.bf16.msra.mxu0 %v4408_v6  ;;  %v4433_v33 = vld [vmem:[%s4718_s29 + $0xb0] sm:$0xff]   ;;  %v4435_v35 = vld [vmem:[%s4718_s29 + $0xb8] sm:$0xff]   ;;  %v4437_v36 = vld [vmem:[%s4713_s26] sm:$0x3c]  }
  0x27   : > { %3905 = vmatpush3.bf16.msra.mxu1 %v4409_v7  ;;  %3886 = vmatprep.subr.bf16.mxu0 %v4653_v2  ;;  %v4434_v34 = vld [vmem:[%s4718_s29 + $0x70] sm:$0xff]   ;;  %v4438_v37 = vld [vmem:[%s4713_s26 + $0x8] sm:$0x1e]   ;;  %v4436_v38 = vld [vmem:[%s4718_s29 + $0x78] sm:$0xff]   ;;  %v510_v39 = vrot.slane %v4437_v36, 2 }
  0x28   : > { %3906 = vmatprep.subr.bf16.mxu1 %v4653_v2  ;;  %v645_v40 = vrot.slane %v4438_v37, 1  ;;  %v4439_v41 = vld [vmem:[%s4718_s29] sm:$0xff]   ;;  %v4441_v43 = vld [vmem:[%s4718_s29 + $0x8] sm:$0xff]   ;;  %v4443_v45 = vld [vmem:[%s4718_s29 + $0x10] sm:$0xff]  }
  0x29   : > { %v4440_v42 = vld [vmem:[%s4718_s29 + $0x80] sm:$0xff]   ;;  %v4442_v44 = vld [vmem:[%s4718_s29 + $0x88] sm:$0xff]   ;;  %v4444_v46 = vld [vmem:[%s4718_s29 + $0x90] sm:$0xff]  }
  0x2a   : > { %3887 = vmatpush3.bf16.msra.mxu0 %v4410_v8  ;;  %v4445_v47 = vld [vmem:[%s4718_s29 + $0x18] sm:$0xff]   ;;  %v4447_v49 = vld [vmem:[%s4718_s29 + $0x20] sm:$0xff]   ;;  %v4449_v51 = vld [vmem:[%s4718_s29 + $0x28] sm:$0xff]  }
  0x2b   : > { %3907 = vmatpush3.bf16.msra.mxu1 %v4411_v9  ;;  %3888 = vmatprep.subr.bf16.mxu0 %v4653_v2  ;;  %v4446_v48 = vld [vmem:[%s4718_s29 + $0x98] sm:$0xff]   ;;  %v4448_v50 = vld [vmem:[%s4718_s29 + $0xa0] sm:$0xff]   ;;  %v4450_v52 = vld [vmem:[%s4718_s29 + $0xa8] sm:$0xff]  }
  0x2c   : > { %3908 = vmatprep.subr.bf16.mxu1 %v4653_v2  ;;  %v4451_v53 = vld [vmem:[%s4718_s29 + $0x30] sm:$0xff]   ;;  %v4453_v55 = vld [vmem:[%s4718_s29 + $0x38] sm:$0xff]   ;;  %v4455_v56 = vld [vmem:[%s4713_s26 + $0x8] sm:$0x3c]  }
  0x2d   : > { %v4452_v54 = vld [vmem:[%s4718_s29 + $0xb0] sm:$0xff]   ;;  %v4454_v57 = vld [vmem:[%s4718_s29 + $0xb8] sm:$0xff]   ;;  %v3194_v58 = vld [vmem:[%s4713_s26 + $0x8] sm:$0xf]  ;;  %v846_v59 = vrot.slane %v4455_v56, 2 }
  0x2e   : > { %3889 = vmatpush3.bf16.msra.mxu0 %v4412_v10  ;;  %v4456_v60 = vld [vmem:[%s4718_s29 + $0x40] sm:$0xff]   ;;  %v4458_v62 = vld [vmem:[%s4718_s29 + $0x48] sm:$0xff]   ;;  %v4460_v0 = vld [vmem:[%s4718_s29 + $0x50] sm:$0xff]  }
  0x2f   : > { %3909 = vmatpush3.bf16.msra.mxu1 %v4413_v11  ;;  %3890 = vmatprep.subr.bf16.mxu0 %v4653_v2  ;;  %v4457_v61 = vld [vmem:[%s4718_s29] sm:$0xff]   ;;  %v4459_v63 = vld [vmem:[%s4718_s29 + $0x8] sm:$0xff]   ;;  %v4461_v1 = vld [vmem:[%s4718_s29 + $0x10] sm:$0xff]  }
  0x30   : > { %3910 = vmatprep.subr.bf16.mxu1 %v4653_v2  ;;  %v4462_v3 = vld [vmem:[%s4718_s29 + $0x58] sm:$0xff]   ;;  %v4464_v5 = vld [vmem:[%s4718_s29 + $0x60] sm:$0xff]   ;;  %v4466_v7 = vld [vmem:[%s4718_s29 + $0x68] sm:$0xff]  }
  0x31   : > { %v4463_v4 = vld [vmem:[%s4718_s29 + $0x18] sm:$0xff]   ;;  %v4465_v6 = vld [vmem:[%s4718_s29 + $0x20] sm:$0xff]   ;;  %v4467_v8 = vld [vmem:[%s4718_s29 + $0x28] sm:$0xff]  }
  0x32   : > { %3891 = vmatpush3.bf16.msra.mxu0 %v4414_v12  ;;  %v4468_v9 = vld [vmem:[%s4718_s29 + $0x70] sm:$0xff]   ;;  %v4470_v12 = vld [vmem:[%s4718_s29 + $0x78] sm:$0xff]   ;;  %v4473_v16 = vld [vmem:[%s4718_s29 + $0x80] sm:$0xff]  }
  0x33   : > { %3911 = vmatpush3.bf16.msra.mxu1 %v4415_v13  ;;  %3892 = vmatprep.subr.bf16.mxu0 %v4653_v2  ;;  %v4469_v10 = vld [vmem:[%s4718_s29 + $0x30] sm:$0xff]   ;;  %v4471_v13 = vld [vmem:[%s4718_s29 + $0x38] sm:$0xff]   ;;  %v4491_v36 = vld [vmem:[%s4718_s29] sm:$0xff]  }
  0x34   : > { %3912 = vmatprep.subr.bf16.mxu1 %v4653_v2  ;;  %v4472_v11 = vld [vmem:[%s4713_s26 + $0x10] sm:$0x1e]   ;;  %v4492_v37 = vld [vmem:[%s4718_s29 + $0x80] sm:$0xff]  }
  0x35   : > { %v4509_v56 = vld [vmem:[%s4718_s29] sm:$0xff]  }
  0x36   : > { %3893 = vmatpush3.bf16.msra.mxu0 %v4416_v14  ;;  %v982_v14 = vrot.slane %v4472_v11, 1  ;;  %v3383_v11 = vld [vmem:[%s4713_s26 + $0x20] sm:$0xf] }
  0x37   : > { %3913 = vmatpush3.bf16.msra.mxu1 %v4417_v15  ;;  %3894 = vmatprep.subr.bf16.mxu0 %v4653_v2  ;;  %v3257_v15 = vld [vmem:[%s4713_s26 + $0x10] sm:$0xf] }
  0x38   : > { %3914 = vmatprep.subr.bf16.mxu1 %v4653_v2 }
  0x3a   : > { %3895 = vmatpush3.bf16.msra.mxu0 %v4418_v17  ;;  %v4474_v17 = vld [vmem:[%s4718_s29 + $0x40] sm:$0xff]  }
  0x3b   : > { %3915 = vmatpush3.bf16.msra.mxu1 %v4419_v18  ;;  %3920 = vmatprep.subr.bf16.mxu0 %v4653_v2  ;;  %v4475_v18 = vld [vmem:[%s4718_s29 + $0x88] sm:$0xff]  }
  0x3c   : > { %3940 = vmatprep.subr.bf16.mxu1 %v4653_v2 }
  0x3d   : > { %3897 = vmatmul.mubr.bf16.vlgmr.msra.gmra.mrb[0].mxu0 %v308_v19  ;;  %v4476_v19 = vld [vmem:[%s4718_s29 + $0x48] sm:$0xff]  }
  0x3e   : > { %3917 = vmatmul.mubr.bf16.vlgmr.msra.gmra.mrb[0].mxu1 %v267_v20  ;;  %3921 = vmatpush3.bf16.msra.mxu0 %v4421_v21  ;;  %v4477_v20 = vld [vmem:[%s4718_s29 + $0x90] sm:$0xff]  }
  0x3f   : > { %3941 = vmatpush3.bf16.msra.mxu1 %v4422_v22  ;;  %3922 = vmatprep.subr.bf16.mxu0 %v4653_v2  ;;  %v4478_v21 = vld [vmem:[%s4718_s29 + $0x50] sm:$0xff]   ;;  %v4479_v22 = vld [vmem:[%s4718_s29 + $0x98] sm:$0xff]  }
  0x40   : > { %3942 = vmatprep.subr.bf16.mxu1 %v4653_v2  ;;  %3936 = vmatprep.mubr.msk.bf16.mxu0 %vm4654_vm0, %v4653_v2 }
  0x41   : > { %3956 = vmatprep.mubr.msk.bf16.mxu1 %vm4654_vm0, %v4653_v2 }
  0x42   : > { %3923 = vmatpush3.bf16.msra.mxu0 %v4423_v23  ;;  %v4480_v23 = vld [vmem:[%s4718_s29 + $0x58] sm:$0xff]  }
  0x43   : > { %3943 = vmatpush3.bf16.msra.mxu1 %v4424_v24  ;;  %3924 = vmatprep.subr.bf16.mxu0 %v4653_v2  ;;  %v4481_v24 = vld [vmem:[%s4718_s29 + $0xa0] sm:$0xff]  }
  0x44   : > { %3944 = vmatprep.subr.bf16.mxu1 %v4653_v2 }
  0x46   : > { %3925 = vmatpush3.bf16.msra.mxu0 %v4425_v25  ;;  %v4482_v25 = vld [vmem:[%s4718_s29 + $0x60] sm:$0xff]  }
  0x47   : > { %3945 = vmatpush3.bf16.msra.mxu1 %v4426_v26  ;;  %3926 = vmatprep.subr.bf16.mxu0 %v4653_v2  ;;  %v4483_v26 = vld [vmem:[%s4718_s29 + $0xa8] sm:$0xff]  }
  0x48   : > { %3946 = vmatprep.subr.bf16.mxu1 %v4653_v2 }
  0x4a   : > { %3927 = vmatpush3.bf16.msra.mxu0 %v4427_v27  ;;  %v4484_v27 = vld [vmem:[%s4718_s29 + $0x68] sm:$0xff]  }
  0x4b   : > { %3947 = vmatpush3.bf16.msra.mxu1 %v4428_v28  ;;  %3928 = vmatprep.subr.bf16.mxu0 %v4653_v2  ;;  %v4485_v28 = vld [vmem:[%s4718_s29 + $0xb0] sm:$0xff]  }
  0x4c   : > { %3948 = vmatprep.subr.bf16.mxu1 %v4653_v2 }
  0x4e   : > { %3929 = vmatpush3.bf16.msra.mxu0 %v4429_v29  ;;  %v4486_v29 = vld [vmem:[%s4718_s29 + $0x70] sm:$0xff]  }
  0x4f   : > { %3949 = vmatpush3.bf16.msra.mxu1 %v4430_v30  ;;  %3930 = vmatprep.subr.bf16.mxu0 %v4653_v2  ;;  %v4487_v30 = vld [vmem:[%s4718_s29 + $0xb8] sm:$0xff]  }
  0x50   : > { %3950 = vmatprep.subr.bf16.mxu1 %v4653_v2 }
  0x52   : > { %3931 = vmatpush3.bf16.msra.mxu0 %v4431_v31  ;;  %v4488_v31 = vld [vmem:[%s4718_s29 + $0x78] sm:$0xff]  }
  0x53   : > { %3951 = vmatpush3.bf16.msra.mxu1 %v4432_v32  ;;  %3932 = vmatprep.subr.bf16.mxu0 %v4653_v2  ;;  %v4489_v32 = vld [vmem:[%s4713_s26 + $0x10] sm:$0x3c]  }
  0x54   : > { %3952 = vmatprep.subr.bf16.mxu1 %v4653_v2 }
  0x56   : > { %3933 = vmatpush3.bf16.msra.mxu0 %v4433_v33  ;;  %v4490_v33 = vld [vmem:[%s4713_s26 + $0x18] sm:$0x1e]  }
  0x57   : > { %3953 = vmatpush3.bf16.msra.mxu1 %v4434_v34  ;;  %3934 = vmatprep.subr.bf16.mxu0 %v4653_v2  ;;  %v1183_v34 = vrot.slane %v4489_v32, 2  ;;  %v4538_v32 = vld [vmem:[%s4718_s29 + $0x70] sm:$0xff]  }
  0x58   : > { %3954 = vmatprep.subr.bf16.mxu1 %v4653_v2 }
  0x5a   : > { %3935 = vmatpush3.bf16.msra.mxu0 %v4435_v35  ;;  %v1319_v35 = vrot.slane %v4490_v33, 1 }
  0x5b   : > { %3955 = vmatpush3.bf16.msra.mxu1 %v4436_v38  ;;  %3960 = vmatprep.subr.bf16.mxu0 %v4653_v2  ;;  %v4493_v38 = vld [vmem:[%s4718_s29 + $0x8] sm:$0xff]  }
  0x5c   : > { %3980 = vmatprep.subr.bf16.mxu1 %v4653_v2 }
  0x5d   : > { %3937 = vmatmul.mubr.bf16.vlgmr.msra.gmra.mrb[4].mxu0 %v510_v39  ;;  %v4494_v39 = vld [vmem:[%s4718_s29 + $0x88] sm:$0xff]  }
  0x5e   : > { %3957 = vmatmul.mubr.bf16.vlgmr.msra.gmra.mrb[4].mxu1 %v645_v40  ;;  %3961 = vmatpush3.bf16.msra.mxu0 %v4439_v41  ;;  %v4495_v40 = vld [vmem:[%s4718_s29 + $0x10] sm:$0xff]  }
  0x5f   : > { %3981 = vmatpush3.bf16.msra.mxu1 %v4440_v42  ;;  %3962 = vmatprep.subr.bf16.mxu0 %v4653_v2  ;;  %v4496_v41 = vld [vmem:[%s4718_s29 + $0x90] sm:$0xff]   ;;  %v4497_v42 = vld [vmem:[%s4718_s29 + $0x18] sm:$0xff]  }
  0x60   : > { %3982 = vmatprep.subr.bf16.mxu1 %v4653_v2  ;;  %3976 = vmatprep.mubr.msk.bf16.mxu0 %vm4654_vm0, %v4653_v2 }
  0x61   : > { %3996 = vmatprep.mubr.msk.bf16.mxu1 %vm4654_vm0, %v4653_v2 }
  0x62   : > { %3963 = vmatpush3.bf16.msra.mxu0 %v4441_v43  ;;  %v4498_v43 = vld [vmem:[%s4718_s29 + $0x98] sm:$0xff]  }
  0x63   : > { %3983 = vmatpush3.bf16.msra.mxu1 %v4442_v44  ;;  %3964 = vmatprep.subr.bf16.mxu0 %v4653_v2  ;;  %v4499_v44 = vld [vmem:[%s4718_s29 + $0x20] sm:$0xff]  }
  0x64   : > { %3984 = vmatprep.subr.bf16.mxu1 %v4653_v2 }
  0x66   : > { %3965 = vmatpush3.bf16.msra.mxu0 %v4443_v45  ;;  %v4500_v45 = vld [vmem:[%s4718_s29 + $0xa0] sm:$0xff]  }
  0x67   : > { %3985 = vmatpush3.bf16.msra.mxu1 %v4444_v46  ;;  %3966 = vmatprep.subr.bf16.mxu0 %v4653_v2  ;;  %v4501_v46 = vld [vmem:[%s4718_s29 + $0x28] sm:$0xff]  }
  0x68   : > { %3986 = vmatprep.subr.bf16.mxu1 %v4653_v2 }
  0x6a   : > { %3967 = vmatpush3.bf16.msra.mxu0 %v4445_v47  ;;  %v4502_v47 = vld [vmem:[%s4718_s29 + $0xa8] sm:$0xff]  }
  0x6b   : > { %3987 = vmatpush3.bf16.msra.mxu1 %v4446_v48  ;;  %3968 = vmatprep.subr.bf16.mxu0 %v4653_v2  ;;  %v4503_v48 = vld [vmem:[%s4718_s29 + $0x30] sm:$0xff]  }
  0x6c   : > { %3988 = vmatprep.subr.bf16.mxu1 %v4653_v2 }
  0x6e   : > { %3969 = vmatpush3.bf16.msra.mxu0 %v4447_v49  ;;  %v4504_v49 = vld [vmem:[%s4718_s29 + $0xb0] sm:$0xff]  }
  0x6f   : > { %3989 = vmatpush3.bf16.msra.mxu1 %v4448_v50  ;;  %3970 = vmatprep.subr.bf16.mxu0 %v4653_v2  ;;  %v4505_v50 = vld [vmem:[%s4718_s29 + $0x38] sm:$0xff]  }
  0x70   : > { %3990 = vmatprep.subr.bf16.mxu1 %v4653_v2 }
  0x72   : > { %3971 = vmatpush3.bf16.msra.mxu0 %v4449_v51  ;;  %v4506_v51 = vld [vmem:[%s4718_s29 + $0xb8] sm:$0xff]  }
  0x73   : > { %3991 = vmatpush3.bf16.msra.mxu1 %v4450_v52  ;;  %3972 = vmatprep.subr.bf16.mxu0 %v4653_v2  ;;  %v4507_v52 = vld [vmem:[%s4713_s26 + $0x18] sm:$0x3c]  }
  0x74   : > { %3992 = vmatprep.subr.bf16.mxu1 %v4653_v2 }
  0x76   : > { %3973 = vmatpush3.bf16.msra.mxu0 %v4451_v53  ;;  %v3320_v53 = vld [vmem:[%s4713_s26 + $0x18] sm:$0xf] }
  0x77   : > { %3993 = vmatpush3.bf16.msra.mxu1 %v4452_v54  ;;  %3974 = vmatprep.subr.bf16.mxu0 %v4653_v2  ;;  %v4508_v54 = vld [vmem:[%s4718_s29 + $0x40] sm:$0xff]  }
  0x78   : > { %3994 = vmatprep.subr.bf16.mxu1 %v4653_v2 }
  0x7a   : > { %3975 = vmatpush3.bf16.msra.mxu0 %v4453_v55  ;;  %v1520_v55 = vrot.slane %v4507_v52, 2 }
  0x7b   : > { %3995 = vmatpush3.bf16.msra.mxu1 %v4454_v57  ;;  %4000 = vmatprep.subr.bf16.mxu0 %v4653_v2  ;;  %v4510_v57 = vld [vmem:[%s4718_s29 + $0x48] sm:$0xff]  }
  0x7c   : > { %4020 = vmatprep.subr.bf16.mxu1 %v4653_v2 }
  0x7d   : > { %3977 = vmatmul.mubr.bf16.vlgmr.msra.gmra.mrb[8].mxu0 %v3194_v58  ;;  %v4511_v58 = vld [vmem:[%s4718_s29 + $0x8] sm:$0xff]  }
  0x7e   : > { %3997 = vmatmul.mubr.bf16.vlgmr.msra.gmra.mrb[8].mxu1 %v846_v59  ;;  %4001 = vmatpush3.bf16.msra.mxu0 %v4456_v60  ;;  %v4512_v59 = vld [vmem:[%s4718_s29 + $0x50] sm:$0xff]  }
  0x7f   : > { %4021 = vmatpush3.bf16.msra.mxu1 %v4457_v61  ;;  %4002 = vmatprep.subr.bf16.mxu0 %v4653_v2  ;;  %v4513_v60 = vld [vmem:[%s4718_s29 + $0x10] sm:$0xff]   ;;  %v4514_v61 = vld [vmem:[%s4718_s29 + $0x58] sm:$0xff]  }
  0x80   : > { %4022 = vmatprep.subr.bf16.mxu1 %v4653_v2  ;;  %4016 = vmatprep.mubr.msk.bf16.mxu0 %vm4654_vm0, %v4653_v2 }
  0x81   : > { %4036 = vmatprep.mubr.msk.bf16.mxu1 %vm4654_vm0, %v4653_v2 }
  0x82   : > { %4003 = vmatpush3.bf16.msra.mxu0 %v4458_v62  ;;  %v4515_v62 = vld [vmem:[%s4718_s29 + $0x18] sm:$0xff]  }
  0x83   : > { %4023 = vmatpush3.bf16.msra.mxu1 %v4459_v63  ;;  %4004 = vmatprep.subr.bf16.mxu0 %v4653_v2  ;;  %v4516_v63 = vld [vmem:[%s4718_s29 + $0x60] sm:$0xff]  }
  0x84   : > { %4024 = vmatprep.subr.bf16.mxu1 %v4653_v2 }
  0x86   : > { %4005 = vmatpush3.bf16.msra.mxu0 %v4460_v0  ;;  %v4517_v0 = vld [vmem:[%s4718_s29 + $0x20] sm:$0xff]  }
  0x87   : > { %4025 = vmatpush3.bf16.msra.mxu1 %v4461_v1  ;;  %4006 = vmatprep.subr.bf16.mxu0 %v4653_v2  ;;  %v4518_v1 = vld [vmem:[%s4718_s29 + $0x68] sm:$0xff]  }
  0x88   : > { %4026 = vmatprep.subr.bf16.mxu1 %v4653_v2 }
  0x8a   : > { %4007 = vmatpush3.bf16.msra.mxu0 %v4462_v3  ;;  %v4519_v3 = vld [vmem:[%s4718_s29 + $0x28] sm:$0xff]  }
  0x8b   : > { %4027 = vmatpush3.bf16.msra.mxu1 %v4463_v4  ;;  %4008 = vmatprep.subr.bf16.mxu0 %v4653_v2  ;;  %v4520_v4 = vld [vmem:[%s4718_s29 + $0x70] sm:$0xff]  }
  0x8c   : > { %4028 = vmatprep.subr.bf16.mxu1 %v4653_v2 }
  0x8e   : > { %4009 = vmatpush3.bf16.msra.mxu0 %v4464_v5  ;;  %v4521_v5 = vld [vmem:[%s4718_s29 + $0x30] sm:$0xff]  }
  0x8f   : > { %4029 = vmatpush3.bf16.msra.mxu1 %v4465_v6  ;;  %4010 = vmatprep.subr.bf16.mxu0 %v4653_v2  ;;  %v4524_v6 = vld [vmem:[%s4713_s26 + $0x20] sm:$0x1e]  }
  0x90   : > { %4030 = vmatprep.subr.bf16.mxu1 %v4653_v2 }
  0x92   : > { %4011 = vmatpush3.bf16.msra.mxu0 %v4466_v7  ;;  %v4522_v7 = vld [vmem:[%s4718_s29 + $0x78] sm:$0xff]  }
  0x93   : > { %4031 = vmatpush3.bf16.msra.mxu1 %v4467_v8  ;;  %4012 = vmatprep.subr.bf16.mxu0 %v4653_v2  ;;  %v4523_v8 = vld [vmem:[%s4718_s29 + $0x38] sm:$0xff]  }
  0x94   : > { %4032 = vmatprep.subr.bf16.mxu1 %v4653_v2 }
  0x96   : > { %4013 = vmatpush3.bf16.msra.mxu0 %v4468_v9  ;;  %v1656_v9 = vrot.slane %v4524_v6, 1 }
  0x97   : > { %4033 = vmatpush3.bf16.msra.mxu1 %v4469_v10  ;;  %4014 = vmatprep.subr.bf16.mxu0 %v4653_v2  ;;  %v4525_v10 = vld [vmem:[%s4718_s29 + $0x80] sm:$0xff]  }
  0x98   : > { %4034 = vmatprep.subr.bf16.mxu1 %v4653_v2 }
  0x9a   : > { %4015 = vmatpush3.bf16.msra.mxu0 %v4470_v12  ;;  %v4526_v12 = vld [vmem:[%s4718_s29 + $0x40] sm:$0xff]  }
  0x9b   : > { %4035 = vmatpush3.bf16.msra.mxu1 %v4471_v13  ;;  %4040 = vmatprep.subr.bf16.mxu0 %v4653_v2  ;;  %v4527_v13 = vld [vmem:[%s4718_s29 + $0x88] sm:$0xff]  }
  0x9c   : > { %4060 = vmatprep.subr.bf16.mxu1 %v4653_v2 }
  0x9d   : > { %4017 = vmatmul.mubr.bf16.vlgmr.msra.gmra.mrb[12].mxu0 %v982_v14  ;;  %v4528_v14 = vld [vmem:[%s4718_s29 + $0x48] sm:$0xff]  }
  0x9e   : > { %4037 = vmatmul.mubr.bf16.vlgmr.msra.gmra.mrb[12].mxu1 %v3257_v15  ;;  %4041 = vmatpush3.bf16.msra.mxu0 %v4473_v16  ;;  %v4529_v15 = vld [vmem:[%s4718_s29 + $0x90] sm:$0xff]  }
  0x9f   : > { %4061 = vmatpush3.bf16.msra.mxu1 %v4474_v17  ;;  %4042 = vmatprep.subr.bf16.mxu0 %v4653_v2  ;;  %v4530_v16 = vld [vmem:[%s4718_s29 + $0x50] sm:$0xff]   ;;  %v4531_v17 = vld [vmem:[%s4718_s29 + $0x98] sm:$0xff]  }
  0xa0   : > { %4062 = vmatprep.subr.bf16.mxu1 %v4653_v2  ;;  %4056 = vmatprep.mubr.msk.bf16.mxu0 %vm4654_vm0, %v4653_v2 }
  0xa1   : > { %4076 = vmatprep.mubr.msk.bf16.mxu1 %vm4654_vm0, %v4653_v2 }
  0xa2   : > { %4043 = vmatpush3.bf16.msra.mxu0 %v4475_v18  ;;  %v4532_v18 = vld [vmem:[%s4718_s29 + $0x58] sm:$0xff]  }
  0xa3   : > { %4063 = vmatpush3.bf16.msra.mxu1 %v4476_v19  ;;  %4044 = vmatprep.subr.bf16.mxu0 %v4653_v2  ;;  %v4533_v19 = vld [vmem:[%s4718_s29 + $0xa0] sm:$0xff]  }
  0xa4   : > { %4064 = vmatprep.subr.bf16.mxu1 %v4653_v2 }
  0xa6   : > { %4045 = vmatpush3.bf16.msra.mxu0 %v4477_v20  ;;  %v4534_v20 = vld [vmem:[%s4718_s29 + $0x60] sm:$0xff]  }
  0xa7   : > { %4065 = vmatpush3.bf16.msra.mxu1 %v4478_v21  ;;  %4046 = vmatprep.subr.bf16.mxu0 %v4653_v2  ;;  %v4535_v21 = vld [vmem:[%s4718_s29 + $0xa8] sm:$0xff]  }
  0xa8   : > { %4066 = vmatprep.subr.bf16.mxu1 %v4653_v2 }
  0xaa   : > { %4047 = vmatpush3.bf16.msra.mxu0 %v4479_v22  ;;  %v4536_v22 = vld [vmem:[%s4718_s29 + $0x68] sm:$0xff]  }
  0xab   : > { %4067 = vmatpush3.bf16.msra.mxu1 %v4480_v23  ;;  %4048 = vmatprep.subr.bf16.mxu0 %v4653_v2 }
  0xac   : > { %4068 = vmatprep.subr.bf16.mxu1 %v4653_v2 }
  0xae   : > { %4049 = vmatpush3.bf16.msra.mxu0 %v4481_v24 }
  0xaf   : > { %4069 = vmatpush3.bf16.msra.mxu1 %v4482_v25  ;;  %4050 = vmatprep.subr.bf16.mxu0 %v4653_v2 }
  0xb0   : > { %4070 = vmatprep.subr.bf16.mxu1 %v4653_v2 }
  0xb2   : > { %4051 = vmatpush3.bf16.msra.mxu0 %v4483_v26 }
  0xb3   : > { %4071 = vmatpush3.bf16.msra.mxu1 %v4484_v27  ;;  %4052 = vmatprep.subr.bf16.mxu0 %v4653_v2 }
  0xb4   : > { %4072 = vmatprep.subr.bf16.mxu1 %v4653_v2 }
  0xb6   : > { %4053 = vmatpush3.bf16.msra.mxu0 %v4485_v28 }
  0xb7   : > { %4073 = vmatpush3.bf16.msra.mxu1 %v4486_v29  ;;  %4054 = vmatprep.subr.bf16.mxu0 %v4653_v2  ;;  %v4537_v29 = vld [vmem:[%s4718_s29 + $0xb0] sm:$0xff]  }
  0xb8   : > { %4074 = vmatprep.subr.bf16.mxu1 %v4653_v2 }
  0xba   : > { %4055 = vmatpush3.bf16.msra.mxu0 %v4487_v30 }
  0xbb   : > { %4075 = vmatpush3.bf16.msra.mxu1 %v4488_v31  ;;  %4080 = vmatprep.subr.bf16.mxu0 %v4653_v2 }
  0xbc   : > { %4100 = vmatprep.subr.bf16.mxu1 %v4653_v2 }
  0xbd   : > { %4057 = vmatmul.mubr.bf16.vlgmr.msra.gmra.mrb[16].mxu0 %v1183_v34  ;;  %v4541_v34 = vld [vmem:[%s4713_s26 + $0x20] sm:$0x3c]  }
  0xbe   : > { %4077 = vmatmul.mubr.bf16.vlgmr.msra.gmra.mrb[16].mxu1 %v1319_v35  ;;  %4081 = vmatpush3.bf16.msra.mxu0 %v4491_v36  ;;  %v4539_v35 = vld [vmem:[%s4718_s29 + $0xb8] sm:$0xff]   ;;  %v4542_v36 = vld [vmem:[%s4713_s26 + $0x28] sm:$0x1e]  }
  0xbf   : > { %4101 = vmatpush3.bf16.msra.mxu1 %v4492_v37  ;;  %4082 = vmatprep.subr.bf16.mxu0 %v4653_v2  ;;  %v4540_v37 = vld [vmem:[%s4718_s29 + $0x78] sm:$0xff]  }
  0xc0   : > { %4102 = vmatprep.subr.bf16.mxu1 %v4653_v2  ;;  %4096 = vmatprep.mubr.msk.bf16.mxu0 %vm4654_vm0, %v4653_v2 }
  0xc1   : > { %4116 = vmatprep.mubr.msk.bf16.mxu1 %vm4654_vm0, %v4653_v2 }
  0xc2   : > { %4083 = vmatpush3.bf16.msra.mxu0 %v4493_v38  ;;  %v1857_v38 = vrot.slane %v4541_v34, 2  ;;  %v4574_v34 = vld [vmem:[%s4718_s29 + $0x78] sm:$0xff]  }
  0xc3   : > { %4103 = vmatpush3.bf16.msra.mxu1 %v4494_v39  ;;  %4084 = vmatprep.subr.bf16.mxu0 %v4653_v2  ;;  %v1993_v39 = vrot.slane %v4542_v36, 1 }
  0xc4   : > { %4104 = vmatprep.subr.bf16.mxu1 %v4653_v2 }
  0xc6   : > { %4085 = vmatpush3.bf16.msra.mxu0 %v4495_v40  ;;  %v4543_v40 = vld [vmem:[%s4718_s29] sm:$0xff]  }
  0xc7   : > { %4105 = vmatpush3.bf16.msra.mxu1 %v4496_v41  ;;  %4086 = vmatprep.subr.bf16.mxu0 %v4653_v2  ;;  %v4544_v41 = vld [vmem:[%s4718_s29 + $0x80] sm:$0xff]  }
  0xc8   : > { %4106 = vmatprep.subr.bf16.mxu1 %v4653_v2 }
  0xca   : > { %4087 = vmatpush3.bf16.msra.mxu0 %v4497_v42  ;;  %v4545_v42 = vld [vmem:[%s4718_s29 + $0x8] sm:$0xff]  }
  0xcb   : > { %4107 = vmatpush3.bf16.msra.mxu1 %v4498_v43  ;;  %4088 = vmatprep.subr.bf16.mxu0 %v4653_v2  ;;  %v4546_v43 = vld [vmem:[%s4718_s29 + $0x88] sm:$0xff]  }
  0xcc   : > { %4108 = vmatprep.subr.bf16.mxu1 %v4653_v2 }
  0xce   : > { %4089 = vmatpush3.bf16.msra.mxu0 %v4499_v44  ;;  %v4547_v44 = vld [vmem:[%s4718_s29 + $0x10] sm:$0xff]  }
  0xcf   : > { %4109 = vmatpush3.bf16.msra.mxu1 %v4500_v45  ;;  %4090 = vmatprep.subr.bf16.mxu0 %v4653_v2  ;;  %v4548_v45 = vld [vmem:[%s4718_s29 + $0x90] sm:$0xff]  }
  0xd0   : > { %4110 = vmatprep.subr.bf16.mxu1 %v4653_v2 }
  0xd2   : > { %4091 = vmatpush3.bf16.msra.mxu0 %v4501_v46  ;;  %v4549_v46 = vld [vmem:[%s4718_s29 + $0x18] sm:$0xff]  }
  0xd3   : > { %4111 = vmatpush3.bf16.msra.mxu1 %v4502_v47  ;;  %4092 = vmatprep.subr.bf16.mxu0 %v4653_v2  ;;  %v4550_v47 = vld [vmem:[%s4718_s29 + $0x98] sm:$0xff]  }
  0xd4   : > { %4112 = vmatprep.subr.bf16.mxu1 %v4653_v2 }
  0xd6   : > { %4093 = vmatpush3.bf16.msra.mxu0 %v4503_v48  ;;  %v4551_v48 = vld [vmem:[%s4718_s29 + $0x20] sm:$0xff]  }
  0xd7   : > { %4113 = vmatpush3.bf16.msra.mxu1 %v4504_v49  ;;  %4094 = vmatprep.subr.bf16.mxu0 %v4653_v2  ;;  %v4552_v49 = vld [vmem:[%s4718_s29 + $0xa0] sm:$0xff]  }
  0xd8   : > { %4114 = vmatprep.subr.bf16.mxu1 %v4653_v2 }
  0xda   : > { %4095 = vmatpush3.bf16.msra.mxu0 %v4505_v50  ;;  %v4553_v50 = vld [vmem:[%s4718_s29 + $0x28] sm:$0xff]  }
  0xdb   : > { %4115 = vmatpush3.bf16.msra.mxu1 %v4506_v51  ;;  %4120 = vmatprep.subr.bf16.mxu0 %v4653_v2  ;;  %v4554_v51 = vld [vmem:[%s4718_s29 + $0xa8] sm:$0xff]  }
  0xdc   : > { %4140 = vmatprep.subr.bf16.mxu1 %v4653_v2 }
  0xdd   : > { %4097 = vmatmul.mubr.bf16.vlgmr.msra.gmra.mrb[20].mxu0 %v3320_v53  ;;  %v601_v53 = vld [vmem:[#allocation2] sm:$0xff] }
  0xde   : > { %4117 = vmatmul.mubr.bf16.vlgmr.msra.gmra.mrb[20].mxu1 %v1520_v55  ;;  %4121 = vmatpush3.bf16.msra.mxu0 %v4508_v54 }
  0xdf   : > { %4141 = vmatpush3.bf16.msra.mxu1 %v4509_v56  ;;  %4122 = vmatprep.subr.bf16.mxu0 %v4653_v2 }
  0xe0   : > { %4142 = vmatprep.subr.bf16.mxu1 %v4653_v2  ;;  %4136 = vmatprep.mubr.msk.bf16.mxu0 %vm4654_vm0, %v4653_v2 }
  0xe1   : > { %4156 = vmatprep.mubr.msk.bf16.mxu1 %vm4654_vm0, %v4653_v2 }
  0xe2   : > { %4123 = vmatpush3.bf16.msra.mxu0 %v4510_v57 }
  0xe3   : > { %4143 = vmatpush3.bf16.msra.mxu1 %v4511_v58  ;;  %4124 = vmatprep.subr.bf16.mxu0 %v4653_v2 }
  0xe4   : > { %4144 = vmatprep.subr.bf16.mxu1 %v4653_v2 }
  0xe6   : > { %4125 = vmatpush3.bf16.msra.mxu0 %v4512_v59  ;;  %v4555_v59 = vld [vmem:[%s4718_s29 + $0x30] sm:$0xff]  }
  0xe7   : > { %4145 = vmatpush3.bf16.msra.mxu1 %v4513_v60  ;;  %4126 = vmatprep.subr.bf16.mxu0 %v4653_v2 }
  0xe8   : > { %4146 = vmatprep.subr.bf16.mxu1 %v4653_v2 }
  0xea   : > { %4127 = vmatpush3.bf16.msra.mxu0 %v4514_v61 }
  0xeb   : > { %4147 = vmatpush3.bf16.msra.mxu1 %v4515_v62  ;;  %4128 = vmatprep.subr.bf16.mxu0 %v4653_v2 }
  0xec   : > { %4148 = vmatprep.subr.bf16.mxu1 %v4653_v2 }
  0xee   : > { %4129 = vmatpush3.bf16.msra.mxu0 %v4516_v63  ;;  %v4556_v63 = vld [vmem:[%s4718_s29 + $0xb0] sm:$0xff]  }
  0xef   : > { %4149 = vmatpush3.bf16.msra.mxu1 %v4517_v0  ;;  %4130 = vmatprep.subr.bf16.mxu0 %v4653_v2 }
  0xf0   : > { %4150 = vmatprep.subr.bf16.mxu1 %v4653_v2 }
  0xf2   : > { %4131 = vmatpush3.bf16.msra.mxu0 %v4518_v1  ;;  %v4557_v1 = vld [vmem:[%s4718_s29 + $0x38] sm:$0xff]  }
  0xf3   : > { %4151 = vmatpush3.bf16.msra.mxu1 %v4519_v3  ;;  %4132 = vmatprep.subr.bf16.mxu0 %v4653_v2  ;;  %v4559_v3 = vld [vmem:[%s4713_s26 + $0x28] sm:$0x3c]  }
  0xf4   : > { %4152 = vmatprep.subr.bf16.mxu1 %v4653_v2  ;;  %v2194_v6 = vrot.slane %v4559_v3, 2 }
  0xf6   : > { %4133 = vmatpush3.bf16.msra.mxu0 %v4520_v4  ;;  %v4558_v4 = vld [vmem:[%s4718_s29 + $0xb8] sm:$0xff]  }
  0xf7   : > { %4153 = vmatpush3.bf16.msra.mxu1 %v4521_v5  ;;  %4134 = vmatprep.subr.bf16.mxu0 %v4653_v2  ;;  %v3446_v5 = vld [vmem:[%s4713_s26 + $0x28] sm:$0xf] }
  0xf8   : > { %4154 = vmatprep.subr.bf16.mxu1 %v4653_v2 }
  0xfa   : > { %4135 = vmatpush3.bf16.msra.mxu0 %v4522_v7  ;;  %v4560_v7 = vld [vmem:[%s4718_s29 + $0x40] sm:$0xff]  }
  0xfb   : > { %4155 = vmatpush3.bf16.msra.mxu1 %v4523_v8  ;;  %4160 = vmatprep.subr.bf16.mxu0 %v4653_v2  ;;  %v4561_v8 = vld [vmem:[%s4718_s29] sm:$0xff]  }
  0xfc   : > { %4180 = vmatprep.subr.bf16.mxu1 %v4653_v2 }
  0xfd   : > { %4137 = vmatmul.mubr.bf16.vlgmr.msra.gmra.mrb[24].mxu0 %v1656_v9  ;;  %v4562_v9 = vld [vmem:[%s4718_s29 + $0x48] sm:$0xff]  }
  0xfe   : > { %4157 = vmatmul.mubr.bf16.vlgmr.msra.gmra.mrb[24].mxu1 %v3383_v11  ;;  %4161 = vmatpush3.bf16.msra.mxu0 %v4525_v10  ;;  %v4563_v10 = vld [vmem:[%s4718_s29 + $0x8] sm:$0xff]   ;;  %v4564_v11 = vld [vmem:[%s4718_s29 + $0x50] sm:$0xff]  }
  0xff   : > { %4181 = vmatpush3.bf16.msra.mxu1 %v4526_v12  ;;  %4162 = vmatprep.subr.bf16.mxu0 %v4653_v2  ;;  %v4565_v12 = vld [vmem:[%s4718_s29 + $0x10] sm:$0xff]  }
 0x100   : > { %4182 = vmatprep.subr.bf16.mxu1 %v4653_v2  ;;  %4176 = vmatprep.mubr.msk.bf16.mxu0 %vm4654_vm0, %v4653_v2 }
 0x101   : > { %4196 = vmatprep.mubr.msk.bf16.mxu1 %vm4654_vm0, %v4653_v2 }
 0x102   : > { %4163 = vmatpush3.bf16.msra.mxu0 %v4527_v13  ;;  %v4566_v13 = vld [vmem:[%s4718_s29 + $0x58] sm:$0xff]  }
 0x103   : > { %4183 = vmatpush3.bf16.msra.mxu1 %v4528_v14  ;;  %4164 = vmatprep.subr.bf16.mxu0 %v4653_v2  ;;  %v4567_v14 = vld [vmem:[%s4718_s29 + $0x18] sm:$0xff]  }
 0x104   : > { %4184 = vmatprep.subr.bf16.mxu1 %v4653_v2 }
 0x106   : > { %4165 = vmatpush3.bf16.msra.mxu0 %v4529_v15  ;;  %v4568_v15 = vld [vmem:[%s4718_s29 + $0x60] sm:$0xff]  }
 0x107   : > { %4185 = vmatpush3.bf16.msra.mxu1 %v4530_v16  ;;  %4166 = vmatprep.subr.bf16.mxu0 %v4653_v2  ;;  %v4569_v16 = vld [vmem:[%s4718_s29 + $0x20] sm:$0xff]  }
 0x108   : > { %4186 = vmatprep.subr.bf16.mxu1 %v4653_v2 }
 0x10a   : > { %4167 = vmatpush3.bf16.msra.mxu0 %v4531_v17  ;;  %v4570_v17 = vld [vmem:[%s4718_s29 + $0x68] sm:$0xff]  }
 0x10b   : > { %4187 = vmatpush3.bf16.msra.mxu1 %v4532_v18  ;;  %4168 = vmatprep.subr.bf16.mxu0 %v4653_v2  ;;  %v4571_v18 = vld [vmem:[%s4718_s29 + $0x28] sm:$0xff]  }
 0x10c   : > { %4188 = vmatprep.subr.bf16.mxu1 %v4653_v2 }
 0x10e   : > { %4169 = vmatpush3.bf16.msra.mxu0 %v4533_v19 }
 0x10f   : > { %4189 = vmatpush3.bf16.msra.mxu1 %v4534_v20  ;;  %4170 = vmatprep.subr.bf16.mxu0 %v4653_v2 }
 0x110   : > { %v392_v23 = vpop.f32.mrb[0].mxu0  ;;  %4190 = vmatprep.subr.bf16.mxu1 %v4653_v2 }
 0x111   : > { %v480_v24 = vpop.f32.mrb[0].mxu1  ;;  %v3898_v25 = vpop.f32.mrb[1].mxu0 }
 0x112   : > { %v5020_v26 = vadd.f32 %v480_v24, %v392_v23  ;;  %v3918_v27 = vpop.f32.mrb[1].mxu1  ;;  %v395_v28 = vpop.f32.mrb[2].mxu0  ;;  %4171 = vmatpush3.bf16.msra.mxu0 %v4535_v21  ;;  %v938_v23 = vld [vmem:[#allocation2 + $0x8] sm:$0xff] }
 0x113   : > { %v483_v30 = vpop.f32.mrb[2].mxu1  ;;  %4191 = vmatpush3.bf16.msra.mxu1 %v4536_v22  ;;  %v3899_v31 = vpop.f32.mrb[3].mxu0  ;;  %4172 = vmatprep.subr.bf16.mxu0 %v4653_v2 }
 0x114   : > { %v3919_v33 = vpop.f32.mrb[3].mxu1  ;;  %4192 = vmatprep.subr.bf16.mxu1 %v4653_v2  ;;  %v4573_v30 = vld [vmem:[%s4718_s29 + $0x30] sm:$0xff]  }
 0x115   : > { %v4576_v33 = vld [vmem:[%s4713_s26 + $0x30] sm:$0x1e]  }
 0x116   : > { %4173 = vmatpush3.bf16.msra.mxu0 %v4537_v29  ;;  %v2330_v36 = vrot.slane %v4576_v33, 1 }
 0x117   : > { %4193 = vmatpush3.bf16.msra.mxu1 %v4538_v32  ;;  %4174 = vmatprep.subr.bf16.mxu0 %v4653_v2 }
 0x118   : > { %4194 = vmatprep.subr.bf16.mxu1 %v4653_v2 }
 0x11a   : > { %4175 = vmatpush3.bf16.msra.mxu0 %v4539_v35  ;;  %v4575_v35 = vld [vmem:[%s4718_s29 + $0x38] sm:$0xff]  }
 0x11b   : > { %4195 = vmatpush3.bf16.msra.mxu1 %v4540_v37  ;;  %4200 = vmatprep.subr.bf16.mxu0 %v4653_v2  ;;  %v4577_v37 = vld [vmem:[%s4718_s29 + $0x80] sm:$0xff]  }
 0x11c   : > { %4220 = vmatprep.subr.bf16.mxu1 %v4653_v2 }
 0x11d   : > { %4177 = vmatmul.mubr.bf16.vlgmr.msra.gmra.mrb[28].mxu0 %v1857_v38  ;;  %v3509_v38 = vld [vmem:[%s4713_s26 + $0x30] sm:$0xf] }
 0x11e   : > { %4197 = vmatmul.mubr.bf16.vlgmr.msra.gmra.mrb[28].mxu1 %v1993_v39  ;;  %4201 = vmatpush3.bf16.msra.mxu0 %v4543_v40  ;;  %v4578_v39 = vld [vmem:[%s4718_s29 + $0x40] sm:$0xff]   ;;  %v4579_v40 = vld [vmem:[%s4718_s29 + $0x88] sm:$0xff]  }
 0x11f   : > { %4221 = vmatpush3.bf16.msra.mxu1 %v4544_v41  ;;  %4202 = vmatprep.subr.bf16.mxu0 %v4653_v2  ;;  %v4580_v41 = vld [vmem:[%s4718_s29 + $0x48] sm:$0xff]  }
 0x120   : > { %4222 = vmatprep.subr.bf16.mxu1 %v4653_v2  ;;  %4216 = vmatprep.mubr.msk.bf16.mxu0 %vm4654_vm0, %v4653_v2 }
 0x121   : > { %4236 = vmatprep.mubr.msk.bf16.mxu1 %vm4654_vm0, %v4653_v2 }
 0x122   : > { %4203 = vmatpush3.bf16.msra.mxu0 %v4545_v42  ;;  %v4581_v42 = vld [vmem:[%s4718_s29 + $0x90] sm:$0xff]  }
 0x123   : > { %4223 = vmatpush3.bf16.msra.mxu1 %v4546_v43  ;;  %4204 = vmatprep.subr.bf16.mxu0 %v4653_v2  ;;  %v4582_v43 = vld [vmem:[%s4718_s29 + $0x50] sm:$0xff]  }
 0x124   : > { %4224 = vmatprep.subr.bf16.mxu1 %v4653_v2 }
 0x126   : > { %4205 = vmatpush3.bf16.msra.mxu0 %v4547_v44  ;;  %v4583_v44 = vld [vmem:[%s4718_s29 + $0x98] sm:$0xff]  }
 0x127   : > { %4225 = vmatpush3.bf16.msra.mxu1 %v4548_v45  ;;  %4206 = vmatprep.subr.bf16.mxu0 %v4653_v2  ;;  %v4584_v45 = vld [vmem:[%s4718_s29 + $0x58] sm:$0xff]  }
 0x128   : > { %4226 = vmatprep.subr.bf16.mxu1 %v4653_v2 }
 0x12a   : > { %4207 = vmatpush3.bf16.msra.mxu0 %v4549_v46  ;;  %v4585_v46 = vld [vmem:[%s4718_s29 + $0xa0] sm:$0xff]  }
 0x12b   : > { %4227 = vmatpush3.bf16.msra.mxu1 %v4550_v47  ;;  %4208 = vmatprep.subr.bf16.mxu0 %v4653_v2  ;;  %v4586_v47 = vld [vmem:[%s4718_s29 + $0x60] sm:$0xff]  }
 0x12c   : > { %4228 = vmatprep.subr.bf16.mxu1 %v4653_v2 }
 0x12e   : > { %4209 = vmatpush3.bf16.msra.mxu0 %v4551_v48  ;;  %v4587_v48 = vld [vmem:[%s4718_s29 + $0xa8] sm:$0xff]  }
 0x12f   : > { %4229 = vmatpush3.bf16.msra.mxu1 %v4552_v49  ;;  %4210 = vmatprep.subr.bf16.mxu0 %v4653_v2  ;;  %v4588_v49 = vld [vmem:[%s4718_s29 + $0x68] sm:$0xff]  }
 0x130   : > { %v594_v52 = vpop.f32.mrb[4].mxu0  ;;  %4230 = vmatprep.subr.bf16.mxu1 %v4653_v2 }
 0x131   : > { %v600_v54 = vadd.f32 %v594_v52, %v5020_v26  ;;  %v5061_v55 = vpop.f32.mrb[4].mxu1  ;;  %v3938_v56 = vpop.f32.mrb[5].mxu0  ;;  %v4572_v26 = vld [vmem:[%s4718_s29 + $0x70] sm:$0xff]  }
 0x132   : > { %v3958_v57 = vpop.f32.mrb[5].mxu1  ;;  %v597_v58 = vpop.f32.mrb[6].mxu0  ;;  %4211 = vmatpush3.bf16.msra.mxu0 %v4553_v50  ;;  %v4589_v56 = vld [vmem:[%s4718_s29 + $0xb0] sm:$0xff]  }
 0x133   : > { %v602_v60 = vadd.f32 %v601_v53, %v600_v54  ;;  %v732_v61 = vpop.f32.mrb[6].mxu1  ;;  %4231 = vmatpush3.bf16.msra.mxu1 %v4554_v51  ;;  %v3939_v62 = vpop.f32.mrb[7].mxu0  ;;  %4212 = vmatprep.subr.bf16.mxu0 %v4653_v2 }
 0x134   : > { %v3959_v0 = vpop.f32.mrb[7].mxu1  ;;  %4232 = vmatprep.subr.bf16.mxu1 %v4653_v2  ;;  %v4593_v61 = vld [vmem:[%s4713_s26 + $0x30] sm:$0x3c]   ;;  %v4591_v62 = vld [vmem:[%s4718_s29 + $0xb8] sm:$0xff]  }
 0x135   : > { %603 = vst [vmem:[#allocation2] sm:$0xff] %v602_v60  ;;  %v4592_v0 = vld [vmem:[%s4718_s29 + $0x78] sm:$0xff]  }
 0x136   : > { %4213 = vmatpush3.bf16.msra.mxu0 %v4555_v59  ;;  %v4590_v59 = vld [vmem:[%s4718_s29 + $0x70] sm:$0xff]  }
 0x137   : > { %4233 = vmatpush3.bf16.msra.mxu1 %v4556_v63  ;;  %4214 = vmatprep.subr.bf16.mxu0 %v4653_v2  ;;  %v4594_v63 = vld [vmem:[%s4713_s26 + $0x38] sm:$0x1e]  }
 0x138   : > { %4234 = vmatprep.subr.bf16.mxu1 %v4653_v2  ;;  %v2667_v3 = vrot.slane %v4594_v63, 1 }
 0x13a   : > { %4215 = vmatpush3.bf16.msra.mxu0 %v4557_v1  ;;  %v2531_v1 = vrot.slane %v4593_v61, 2 }
 0x13b   : > { %4235 = vmatpush3.bf16.msra.mxu1 %v4558_v4  ;;  %4240 = vmatprep.subr.bf16.mxu0 %v4653_v2  ;;  %v4595_v4 = vld [vmem:[%s4718_s29] sm:$0xff]  }
 0x13c   : > { %4260 = vmatprep.subr.bf16.mxu1 %v4653_v2 }
 0x13d   : > { %4217 = vmatmul.mubr.bf16.vlgmr.msra.gmra.mrb[32].mxu0 %v3446_v5  ;;  %v4596_v5 = vld [vmem:[%s4718_s29 + $0x80] sm:$0xff]  }
 0x13e   : > { %4237 = vmatmul.mubr.bf16.vlgmr.msra.gmra.mrb[32].mxu1 %v2194_v6  ;;  %4241 = vmatpush3.bf16.msra.mxu0 %v4560_v7  ;;  %v4597_v6 = vld [vmem:[%s4718_s29 + $0x8] sm:$0xff]  }
 0x13f   : > { %4261 = vmatpush3.bf16.msra.mxu1 %v4561_v8  ;;  %4242 = vmatprep.subr.bf16.mxu0 %v4653_v2  ;;  %v4598_v7 = vld [vmem:[%s4718_s29 + $0x88] sm:$0xff]   ;;  %v4599_v8 = vld [vmem:[%s4718_s29 + $0x10] sm:$0xff]  }
 0x140   : > { %4262 = vmatprep.subr.bf16.mxu1 %v4653_v2  ;;  %4256 = vmatprep.mubr.msk.bf16.mxu0 %vm4654_vm0, %v4653_v2 }
 0x141   : > { %4276 = vmatprep.mubr.msk.bf16.mxu1 %vm4654_vm0, %v4653_v2 }
 0x142   : > { %4243 = vmatpush3.bf16.msra.mxu0 %v4562_v9  ;;  %v4600_v9 = vld [vmem:[%s4718_s29 + $0x90] sm:$0xff]  }
 0x143   : > { %4263 = vmatpush3.bf16.msra.mxu1 %v4563_v10  ;;  %4244 = vmatprep.subr.bf16.mxu0 %v4653_v2  ;;  %v4601_v10 = vld [vmem:[%s4718_s29 + $0x18] sm:$0xff]  }
 0x144   : > { %4264 = vmatprep.subr.bf16.mxu1 %v4653_v2 }
 0x146   : > { %4245 = vmatpush3.bf16.msra.mxu0 %v4564_v11  ;;  %v4602_v11 = vld [vmem:[%s4718_s29 + $0x98] sm:$0xff]  }
 0x147   : > { %4265 = vmatpush3.bf16.msra.mxu1 %v4565_v12  ;;  %4246 = vmatprep.subr.bf16.mxu0 %v4653_v2  ;;  %v4603_v12 = vld [vmem:[%s4718_s29 + $0x20] sm:$0xff]  }
 0x148   : > { %4266 = vmatprep.subr.bf16.mxu1 %v4653_v2 }
 0x14a   : > { %4247 = vmatpush3.bf16.msra.mxu0 %v4566_v13  ;;  %v4604_v13 = vld [vmem:[%s4718_s29 + $0xa0] sm:$0xff]  }
 0x14b   : > { %4267 = vmatpush3.bf16.msra.mxu1 %v4567_v14  ;;  %4248 = vmatprep.subr.bf16.mxu0 %v4653_v2  ;;  %v4605_v14 = vld [vmem:[%s4718_s29 + $0x28] sm:$0xff]  }
 0x14c   : > { %4268 = vmatprep.subr.bf16.mxu1 %v4653_v2 }
 0x14e   : > { %4249 = vmatpush3.bf16.msra.mxu0 %v4568_v15  ;;  %v4606_v15 = vld [vmem:[%s4718_s29 + $0xa8] sm:$0xff]  }
 0x14f   : > { %4269 = vmatpush3.bf16.msra.mxu1 %v4569_v16  ;;  %4250 = vmatprep.subr.bf16.mxu0 %v4653_v2 }
 0x150   : > { %v817_v19 = vpop.f32.mrb[8].mxu0  ;;  %4270 = vmatprep.subr.bf16.mxu1 %v4653_v2 }
 0x151   : > { %v818_v20 = vadd.f32 %v817_v19, %v5061_v55  ;;  %v930_v21 = vpop.f32.mrb[8].mxu1  ;;  %v3978_v22 = vpop.f32.mrb[9].mxu0 }
 0x152   : > { %v3998_v24 = vpop.f32.mrb[9].mxu1  ;;  %v820_v25 = vpop.f32.mrb[10].mxu0  ;;  %4251 = vmatpush3.bf16.msra.mxu0 %v4570_v17  ;;  %v1275_v17 = vld [vmem:[#allocation2 + $0x10] sm:$0xff] }
 0x153   : > { %v936_v27 = vadd.f32 %v930_v21, %v818_v20  ;;  %v933_v28 = vpop.f32.mrb[10].mxu1  ;;  %4271 = vmatpush3.bf16.msra.mxu1 %v4571_v18  ;;  %v3979_v29 = vpop.f32.mrb[11].mxu0  ;;  %4252 = vmatprep.subr.bf16.mxu0 %v4653_v2 }
 0x154   : > { %v3999_v31 = vpop.f32.mrb[11].mxu1  ;;  %4272 = vmatprep.subr.bf16.mxu1 %v4653_v2  ;;  %v4609_v29 = vld [vmem:[%s4718_s29 + $0x38] sm:$0xff]  }
 0x155   : > { %v939_v32 = vadd.f32 %v938_v23, %v936_v27  ;;  %v4607_v23 = vld [vmem:[%s4718_s29 + $0x30] sm:$0xff]   ;;  %v4610_v31 = vld [vmem:[%s4718_s29 + $0xb8] sm:$0xff]  }
 0x156   : > { %4253 = vmatpush3.bf16.msra.mxu0 %v4572_v26  ;;  %v4608_v27 = vld [vmem:[%s4718_s29 + $0xb0] sm:$0xff]  }
 0x157   : > { %940 = vst [vmem:[#allocation2 + $0x8] sm:$0xff] %v939_v32  ;;  %4273 = vmatpush3.bf16.msra.mxu1 %v4573_v30  ;;  %4254 = vmatprep.subr.bf16.mxu0 %v4653_v2  ;;  %v4611_v30 = vld [vmem:[%s4713_s26 + $0x38] sm:$0x3c]  }
 0x158   : > { %4274 = vmatprep.subr.bf16.mxu1 %v4653_v2  ;;  %v3572_v32 = vld [vmem:[%s4713_s26 + $0x38] sm:$0xf]  ;;  %v2868_v33 = vrot.slane %v4611_v30, 2 }
 0x15a   : > { %4255 = vmatpush3.bf16.msra.mxu0 %v4574_v34 }
 0x15b   : > { %4275 = vmatpush3.bf16.msra.mxu1 %v4575_v35  ;;  %4280 = vmatprep.subr.bf16.mxu0 %v4653_v2 }
 0x15c   : > { %4300 = vmatprep.subr.bf16.mxu1 %v4653_v2 }
 0x15d   : > { %4257 = vmatmul.mubr.bf16.vlgmr.msra.gmra.mrb[36].mxu0 %v2330_v36 }
 0x15e   : > { %4277 = vmatmul.mubr.bf16.vlgmr.msra.gmra.mrb[36].mxu1 %v3509_v38  ;;  %4281 = vmatpush3.bf16.msra.mxu0 %v4577_v37  ;;  %v1612_v38 = vld [vmem:[#allocation2 + $0x18] sm:$0xff] }
 0x15f   : > { %4301 = vmatpush3.bf16.msra.mxu1 %v4578_v39  ;;  %4282 = vmatprep.subr.bf16.mxu0 %v4653_v2 }
 0x160   : > { %4302 = vmatprep.subr.bf16.mxu1 %v4653_v2  ;;  %4296 = vmatprep.mubr.msk.bf16.mxu0 %vm4654_vm0, %v4653_v2 }
 0x161   : > { %4316 = vmatprep.mubr.msk.bf16.mxu1 %vm4654_vm0, %v4653_v2 }
 0x162   : > { %4283 = vmatpush3.bf16.msra.mxu0 %v4579_v40 }
 0x163   : > { %4303 = vmatpush3.bf16.msra.mxu1 %v4580_v41  ;;  %4284 = vmatprep.subr.bf16.mxu0 %v4653_v2 }
 0x164   : > { %4304 = vmatprep.subr.bf16.mxu1 %v4653_v2 }
 0x166   : > { %4285 = vmatpush3.bf16.msra.mxu0 %v4581_v42 }
 0x167   : > { %4305 = vmatpush3.bf16.msra.mxu1 %v4582_v43  ;;  %4286 = vmatprep.subr.bf16.mxu0 %v4653_v2 }
 0x168   : > { %4306 = vmatprep.subr.bf16.mxu1 %v4653_v2 }
 0x16a   : > { %4287 = vmatpush3.bf16.msra.mxu0 %v4583_v44 }
 0x16b   : > { %4307 = vmatpush3.bf16.msra.mxu1 %v4584_v45  ;;  %4288 = vmatprep.subr.bf16.mxu0 %v4653_v2 }
 0x16c   : > { %4308 = vmatprep.subr.bf16.mxu1 %v4653_v2 }
 0x16e   : > { %4289 = vmatpush3.bf16.msra.mxu0 %v4585_v46 }
 0x16f   : > { %4309 = vmatpush3.bf16.msra.mxu1 %v4586_v47  ;;  %4290 = vmatprep.subr.bf16.mxu0 %v4653_v2 }
 0x170   : > { %v1066_v50 = vpop.f32.mrb[12].mxu0  ;;  %4310 = vmatprep.subr.bf16.mxu1 %v4653_v2 }
 0x171   : > { %v1154_v51 = vpop.f32.mrb[12].mxu1  ;;  %v4018_v52 = vpop.f32.mrb[13].mxu0 }
 0x172   : > { %v5140_v53 = vadd.f32 %v1154_v51, %v1066_v50  ;;  %v4038_v54 = vpop.f32.mrb[13].mxu1  ;;  %v1069_v55 = vpop.f32.mrb[14].mxu0  ;;  %4291 = vmatpush3.bf16.msra.mxu0 %v4587_v48 }
 0x173   : > { %v1157_v57 = vpop.f32.mrb[14].mxu1  ;;  %4311 = vmatpush3.bf16.msra.mxu1 %v4588_v49  ;;  %v4019_v58 = vpop.f32.mrb[15].mxu0  ;;  %4292 = vmatprep.subr.bf16.mxu0 %v4653_v2  ;;  %v1949_v55 = vld [vmem:[#allocation2 + $0x20] sm:$0xff] }
 0x174   : > { %v4039_v60 = vpop.f32.mrb[15].mxu1  ;;  %4312 = vmatprep.subr.bf16.mxu1 %v4653_v2 }
 0x176   : > { %4293 = vmatpush3.bf16.msra.mxu0 %v4589_v56 }
 0x177   : > { %4313 = vmatpush3.bf16.msra.mxu1 %v4590_v59  ;;  %4294 = vmatprep.subr.bf16.mxu0 %v4653_v2 }
 0x178   : > { %4314 = vmatprep.subr.bf16.mxu1 %v4653_v2 }
 0x17a   : > { %4295 = vmatpush3.bf16.msra.mxu0 %v4591_v62 }
 0x17b   : > { %4315 = vmatpush3.bf16.msra.mxu1 %v4592_v0  ;;  %4320 = vmatprep.subr.bf16.mxu0 %v4653_v2 }
 0x17c   : > { %4340 = vmatprep.subr.bf16.mxu1 %v4653_v2 }
 0x17d   : > { %4297 = vmatmul.mubr.bf16.vlgmr.msra.gmra.mrb[40].mxu0 %v2531_v1 }
 0x17e   : > { %4317 = vmatmul.mubr.bf16.vlgmr.msra.gmra.mrb[40].mxu1 %v2667_v3  ;;  %4321 = vmatpush3.bf16.msra.mxu0 %v4595_v4 }
 0x17f   : > { %4341 = vmatpush3.bf16.msra.mxu1 %v4596_v5  ;;  %4322 = vmatprep.subr.bf16.mxu0 %v4653_v2 }
 0x180   : > { %4342 = vmatprep.subr.bf16.mxu1 %v4653_v2  ;;  %4336 = vmatprep.mubr.msk.bf16.mxu0 %vm4654_vm0, %v4653_v2 }
 0x181   : > { %4356 = vmatprep.mubr.msk.bf16.mxu1 %vm4654_vm0, %v4653_v2 }
 0x182   : > { %4323 = vmatpush3.bf16.msra.mxu0 %v4597_v6  ;;  %v2286_v6 = vld [vmem:[#allocation2 + $0x28] sm:$0xff] }
 0x183   : > { %4343 = vmatpush3.bf16.msra.mxu1 %v4598_v7  ;;  %4324 = vmatprep.subr.bf16.mxu0 %v4653_v2 }
 0x184   : > { %4344 = vmatprep.subr.bf16.mxu1 %v4653_v2 }
 0x186   : > { %4325 = vmatpush3.bf16.msra.mxu0 %v4599_v8 }
 0x187   : > { %4345 = vmatpush3.bf16.msra.mxu1 %v4600_v9  ;;  %4326 = vmatprep.subr.bf16.mxu0 %v4653_v2 }
 0x188   : > { %4346 = vmatprep.subr.bf16.mxu1 %v4653_v2 }
 0x18a   : > { %4327 = vmatpush3.bf16.msra.mxu0 %v4601_v10 }
 0x18b   : > { %4347 = vmatpush3.bf16.msra.mxu1 %v4602_v11  ;;  %4328 = vmatprep.subr.bf16.mxu0 %v4653_v2 }
 0x18c   : > { %4348 = vmatprep.subr.bf16.mxu1 %v4653_v2 }
 0x18e   : > { %4329 = vmatpush3.bf16.msra.mxu0 %v4603_v12 }
 0x18f   : > { %4349 = vmatpush3.bf16.msra.mxu1 %v4604_v13  ;;  %4330 = vmatprep.subr.bf16.mxu0 %v4653_v2 }
 0x190   : > { %v1267_v16 = vpop.f32.mrb[16].mxu0  ;;  %4350 = vmatprep.subr.bf16.mxu1 %v4653_v2 }
 0x191   : > { %v1273_v18 = vadd.f32 %v1267_v16, %v5140_v53  ;;  %v1403_v19 = vpop.f32.mrb[16].mxu1  ;;  %v4058_v20 = vpop.f32.mrb[17].mxu0 }
 0x192   : > { %v4078_v21 = vpop.f32.mrb[17].mxu1  ;;  %v1270_v22 = vpop.f32.mrb[18].mxu0  ;;  %4331 = vmatpush3.bf16.msra.mxu0 %v4605_v14 }
 0x193   : > { %v1276_v24 = vadd.f32 %v1275_v17, %v1273_v18  ;;  %v1406_v25 = vpop.f32.mrb[18].mxu1  ;;  %4351 = vmatpush3.bf16.msra.mxu1 %v4606_v15  ;;  %v4059_v26 = vpop.f32.mrb[19].mxu0  ;;  %4332 = vmatprep.subr.bf16.mxu0 %v4653_v2 }
 0x194   : > { %v4079_v28 = vpop.f32.mrb[19].mxu1  ;;  %4352 = vmatprep.subr.bf16.mxu1 %v4653_v2 }
 0x195   : > { %1277 = vst [vmem:[#allocation2 + $0x10] sm:$0xff] %v1276_v24  ;;  %v2623_v24 = vld [vmem:[#allocation2 + $0x30] sm:$0xff] }
 0x196   : > { %4333 = vmatpush3.bf16.msra.mxu0 %v4607_v23 }
 0x197   : > { %4353 = vmatpush3.bf16.msra.mxu1 %v4608_v27  ;;  %4334 = vmatprep.subr.bf16.mxu0 %v4653_v2 }
 0x198   : > { %4354 = vmatprep.subr.bf16.mxu1 %v4653_v2 }
 0x19a   : > { %4335 = vmatpush3.bf16.msra.mxu0 %v4609_v29 }
 0x19b   : > { %4355 = vmatpush3.bf16.msra.mxu1 %v4610_v31 }
 0x19d   : > { %4337 = vmatmul.mubr.bf16.vlgmr.msra.gmra.mrb[44].mxu0 %v3572_v32 }
 0x19e   : > { %4357 = vmatmul.mubr.bf16.vlgmr.msra.gmra.mrb[44].mxu1 %v2868_v33 }
 0x1b0   : > { %v1491_v34 = vpop.f32.mrb[20].mxu0 }
 0x1b1   : > { %v1492_v35 = vadd.f32 %v1491_v34, %v1403_v19  ;;  %v1604_v36 = vpop.f32.mrb[20].mxu1  ;;  %v4098_v37 = vpop.f32.mrb[21].mxu0 }
 0x1b2   : > { %v4118_v39 = vpop.f32.mrb[21].mxu1  ;;  %v1494_v40 = vpop.f32.mrb[22].mxu0 }
 0x1b3   : > { %v1610_v41 = vadd.f32 %v1604_v36, %v1492_v35  ;;  %v1607_v42 = vpop.f32.mrb[22].mxu1  ;;  %v4099_v43 = vpop.f32.mrb[23].mxu0 }
 0x1b4   : > { %v4119_v44 = vpop.f32.mrb[23].mxu1 }
 0x1b5   : > { %v1613_v45 = vadd.f32 %v1612_v38, %v1610_v41  ;;  %v2960_v38 = vld [vmem:[#allocation2 + $0x38] sm:$0xff] }
 0x1b7   : > { %1614 = vst [vmem:[#allocation2 + $0x18] sm:$0xff] %v1613_v45 }
 0x1d0   : > { %v1740_v2 = vpop.f32.mrb[24].mxu0 }
 0x1d1   : > { %v1828_v46 = vpop.f32.mrb[24].mxu1  ;;  %v4138_v47 = vpop.f32.mrb[25].mxu0 }
 0x1d2   : > { %v1829_v48 = vadd.f32 %v1828_v46, %v1740_v2  ;;  %v4158_v49 = vpop.f32.mrb[25].mxu1  ;;  %v1743_v50 = vpop.f32.mrb[26].mxu0  ;;  %v2967_v2 = vld [vmem:[#allocation2] sm:$0xff] (!%p3635_p9)  ;;  %v2968_v46 = vld [vmem:[#allocation2 + $0x8] sm:$0xff] (!%p3635_p9) }
 0x1d3   : > { %v1831_v51 = vpop.f32.mrb[26].mxu1  ;;  %v4139_v52 = vpop.f32.mrb[27].mxu0  ;;  %v3636_v47 = vld [vmem:[%s5216_s2] ss:$0 sm:$0xff] (!%p3635_p9)  ;;  %v2969_v50 = vld [vmem:[#allocation2 + $0x10] sm:$0xff] (!%p3635_p9) }
 0x1d4   : > { %v4159_v53 = vpop.f32.mrb[27].mxu1  ;;  %v2983_v49 = vadd.f32 (!%p3635_p9), %v3636_v47, %v2968_v46  ;;  %v2970_v51 = vld [vmem:[#allocation2 + $0x18] sm:$0xff] (!%p3635_p9) }
 0x1d5   : > { %v2984_v53 = vadd.f32 (!%p3635_p9), %v3636_v47, %v2969_v50 }
 0x1f0   : > { %v1941_v54 = vpop.f32.mrb[28].mxu0 }
 0x1f1   : > { %v1947_v56 = vadd.f32 %v1941_v54, %v1829_v48  ;;  %v2077_v57 = vpop.f32.mrb[28].mxu1  ;;  %v4178_v58 = vpop.f32.mrb[29].mxu0  ;;  %v2982_v48 = vadd.f32 (!%p3635_p9), %v3636_v47, %v2967_v2  ;;  %v2985_v54 = vadd.f32 (!%p3635_p9), %v3636_v47, %v2970_v51 }
 0x1f2   : > { %v4198_v59 = vpop.f32.mrb[29].mxu1  ;;  %v1944_v60 = vpop.f32.mrb[30].mxu0 }
 0x1f3   : > { %v1950_v61 = vadd.f32 %v1949_v55, %v1947_v56  ;;  %v2080_v62 = vpop.f32.mrb[30].mxu1  ;;  %v4179_v63 = vpop.f32.mrb[31].mxu0  ;;  %v2990_v59 = vmax.f32 (!%p3635_p9), %v2982_v48, 0.0  ;;  %v2991_v60 = vmax.f32 (!%p3635_p9), %v2983_v49, 0.0 }
 0x1f4   : > { %v4199_v0 = vpop.f32.mrb[31].mxu1  ;;  %v2992_v63 = vmax.f32 (!%p3635_p9), %v2984_v53, 0.0 }
 0x1f5   : > { %1951 = vst [vmem:[#allocation2 + $0x20] sm:$0xff] %v1950_v61  ;;  %v2993_v0 = vmax.f32 (!%p3635_p9), %v2985_v54, 0.0 }
 0x1fc   : > { %v2971_v52 = vld [vmem:[#allocation2 + $0x20] sm:$0xff] (!%p3635_p9) }
 0x1fd   : > { %v2986_v56 = vadd.f32 (!%p3635_p9), %v3636_v47, %v2971_v52 }
 0x210   : > { %v2165_v1 = vpop.f32.mrb[32].mxu0 }
 0x211   : > { %v2166_v3 = vadd.f32 %v2165_v1, %v2077_v57  ;;  %v2278_v4 = vpop.f32.mrb[32].mxu1  ;;  %v4218_v5 = vpop.f32.mrb[33].mxu0  ;;  %v2994_v1 = vmax.f32 (!%p3635_p9), %v2986_v56, 0.0 }
 0x212   : > { %v4238_v7 = vpop.f32.mrb[33].mxu1  ;;  %v2168_v8 = vpop.f32.mrb[34].mxu0 }
 0x213   : > { %v2284_v9 = vadd.f32 %v2278_v4, %v2166_v3  ;;  %v2281_v10 = vpop.f32.mrb[34].mxu1  ;;  %v4219_v11 = vpop.f32.mrb[35].mxu0  ;;  %v3644_v4 = vpack.c.bf16 (!%p3635_p9), %v2991_v60, %v2990_v59  ;;  %v3649_v7 = vpack.c.bf16 (!%p3635_p9), %v2993_v0, %v2992_v63 }
 0x214   : > { %v4239_v12 = vpop.f32.mrb[35].mxu1 }
 0x215   : > { %v2287_v13 = vadd.f32 %v2286_v6, %v2284_v9  ;;  %3645 = vst [vmem:[%s4723_s6] sm:$0xff] (!%p3635_p9), %v3644_v4   ;;  %3661 = vst [vmem:[%s4723_s6 + $0x8] sm:$0xff] (!%p3635_p9), %v3649_v7  }
 0x217   : > { %2288 = vst [vmem:[#allocation2 + $0x28] sm:$0xff] %v2287_v13 }
 0x21e   : > { %v2972_v55 = vld [vmem:[#allocation2 + $0x28] sm:$0xff] (!%p3635_p9) }
 0x21f   : > { %v2987_v61 = vadd.f32 (!%p3635_p9), %v3636_v47, %v2972_v55 }
 0x221   : > { %v2995_v5 = vmax.f32 (!%p3635_p9), %v2987_v61, 0.0 }
 0x223   : > { %v3654_v9 = vpack.c.bf16 (!%p3635_p9), %v2995_v5, %v2994_v1 }
 0x225   : > { %3662 = vst [vmem:[%s4723_s6 + $0x10] sm:$0xff] (!%p3635_p9), %v3654_v9  }
 0x230   : > { %v2414_v14 = vpop.f32.mrb[36].mxu0 }
 0x231   : > { %v2502_v15 = vpop.f32.mrb[36].mxu1  ;;  %v4258_v16 = vpop.f32.mrb[37].mxu0 }
 0x232   : > { %v2503_v17 = vadd.f32 %v2502_v15, %v2414_v14  ;;  %v4278_v18 = vpop.f32.mrb[37].mxu1  ;;  %v2417_v19 = vpop.f32.mrb[38].mxu0 }
 0x233   : > { %v2505_v20 = vpop.f32.mrb[38].mxu1  ;;  %v4259_v21 = vpop.f32.mrb[39].mxu0 }
 0x234   : > { %v4279_v22 = vpop.f32.mrb[39].mxu1 }
 0x250   : > { %v2615_v23 = vpop.f32.mrb[40].mxu0 }
 0x251   : > { %v2621_v25 = vadd.f32 %v2615_v23, %v2503_v17  ;;  %v2751_v26 = vpop.f32.mrb[40].mxu1  ;;  %v4298_v27 = vpop.f32.mrb[41].mxu0 }
 0x252   : > { %v4318_v28 = vpop.f32.mrb[41].mxu1  ;;  %v2618_v29 = vpop.f32.mrb[42].mxu0 }
 0x253   : > { %v2624_v30 = vadd.f32 %v2623_v24, %v2621_v25  ;;  %v2754_v31 = vpop.f32.mrb[42].mxu1  ;;  %v4299_v32 = vpop.f32.mrb[43].mxu0 }
 0x254   : > { %v4319_v33 = vpop.f32.mrb[43].mxu1 }
 0x255   : > { %2625 = vst [vmem:[#allocation2 + $0x30] sm:$0xff] %v2624_v30 }
 0x25c   : > { %v2973_v57 = vld [vmem:[#allocation2 + $0x30] sm:$0xff] (!%p3635_p9) }
 0x25d   : > { %v2988_v62 = vadd.f32 (!%p3635_p9), %v3636_v47, %v2973_v57 }
 0x25f   : > { %v2996_v6 = vmax.f32 (!%p3635_p9), %v2988_v62, 0.0 }
 0x270   : > { %v2839_v34 = vpop.f32.mrb[44].mxu0 }
 0x271   : > { %v2840_v35 = vadd.f32 %v2839_v34, %v2751_v26  ;;  %v2952_v36 = vpop.f32.mrb[44].mxu1  ;;  %v4338_v37 = vpop.f32.mrb[45].mxu0  ;;  %2966 = sbr.rel (%p3635_p9) target bundleno = 646 (0x286), region = 40 }
 0x272   : > { %v4358_v39 = vpop.f32.mrb[45].mxu1  ;;  %v2842_v40 = vpop.f32.mrb[46].mxu0 }
 0x273   : > { %v2958_v41 = vadd.f32 %v2952_v36, %v2840_v35  ;;  %v2955_v42 = vpop.f32.mrb[46].mxu1  ;;  %v4339_v43 = vpop.f32.mrb[47].mxu0 }
 0x274   : > { %v4359_v44 = vpop.f32.mrb[47].mxu1 }
 0x275   : > { %v2961_v45 = vadd.f32 %v2960_v38, %v2958_v41 }
 0x277   : > { %2962 = vst [vmem:[#allocation2 + $0x38] sm:$0xff] %v2961_v45 }
 0x27e   : > { %v2974_v58 = vld [vmem:[#allocation2 + $0x38] sm:$0xff] }
 0x27f   : > { %v2989_v3 = vadd.f32 %v3636_v47, %v2974_v58 }
 0x281   : > { %v2997_v8 = vmax.f32 %v2989_v3, 0.0 }
 0x283   : > { %v3659_v10 = vpack.c.bf16 %v2997_v8, %v2996_v6 }
 0x285   : > { %3663 = vst [vmem:[%s4723_s6 + $0x18] sm:$0xff] %v3659_v10  }
 0x286 PF: > { %s13_s16 = sadd.s32 1, %s4650_s16   ;;  %s5218_s12 = smov %s4642_s14 }
 0x287   : > { %p10_p10 = scmp.ge.s32.totalorder %s13_s16, 8   ;;  %s5219_s13 = smov %s4646_s15 }
 0x288   : > { %s5220_s14 = smov %s5223_s17  ;;  %s5221_s15 = smov %s5227_s18 }
 0x289   :  { %12 = sbr.rel (!%p10_p10) target bundleno = 3 (0x3), region = 89 }

</bundles_post_ra>
